<compile_context>
chip_gen: v7x
topology: tpu7x:2x2x1
jax: 0.10.0
libtpu: 0.0.40
codegen_flags: <defaults>
</compile_context>

<pallas_src>
import functools
import math

import jax
import jax.numpy as jnp
from jax import lax
from jax.experimental import pallas as pl
from jax.experimental.pallas import tpu as pltpu


def _resblock_kernel(x_ref, w1_ref, t1_ref, w2_ref, t2_ref, o_ref, y1p_ref,
                     *, TH, W, Cp, H):
    """One (batch, row-strip) tile of the fused residual block.

    x_ref  : (1, 1, TH+4, W+2, Cp) bf16  input strip (2-row / 1-col zero halo)
    w1_ref : (3, 3, Cp, Cp)        bf16  conv1 weights with BN1 scale folded in
    t1_ref : (1, Cp)               f32   conv1 bias + BN1 shift
    w2_ref : (3, 3, Cp, Cp)        bf16  conv2 weights with BN2*BN3 scale folded in
    t2_ref : (1, Cp)               f32   conv2 bias + BN2/BN3 shifts
    o_ref  : (1, TH, W, Cp)              output strip (lane-dense, Cp = k*128)
    y1p_ref: (TH+2, W+2, Cp)       bf16  VMEM scratch: conv1 output (+1-row halo)
                                         zero-padded as conv2's input
    """
    r0 = pl.program_id(1) * TH          # first output row of this strip
    rows1 = TH + 2                      # conv1 rows needed (1-row halo each side)

    # ---- conv1 + folded BN1 + ReLU over the extended row range ------------
    acc1 = jnp.zeros((rows1 * W, Cp), jnp.float32)
    for dh in range(3):
        for dw in range(3):
            patch = x_ref[0, 0, dh:dh + rows1, dw:dw + W, :].reshape(rows1 * W, Cp)
            acc1 += jnp.dot(patch, w1_ref[dh, dw],
                            preferred_element_type=jnp.float32)
    y1 = jnp.maximum(acc1 + t1_ref[0], 0.0).reshape(rows1, W, Cp)

    # Halo rows outside the image must be conv2's *zero padding*, not conv1
    # applied to the halo (the folded bias/shift would otherwise leak in).
    row = r0 - 1 + lax.broadcasted_iota(jnp.int32, (rows1, 1, 1), 0)
    y1 = jnp.where((row >= 0) & (row < H), y1, 0.0)

    # Stage conv2's input with zeroed left/right border columns.
    y1p_ref[...] = jnp.zeros_like(y1p_ref)
    y1p_ref[:, 1:W + 1, :] = y1.astype(y1p_ref.dtype)

    # ---- conv2 + folded (BN2 o BN3) ----------------------------------------
    acc2 = jnp.zeros((TH * W, Cp), jnp.float32)
    for dh in range(3):
        for dw in range(3):
            patch = y1p_ref[dh:dh + TH, dw:dw + W, :].reshape(TH * W, Cp)
            acc2 += jnp.dot(patch, w2_ref[dh, dw],
                            preferred_element_type=jnp.float32)
    z = acc2 + t2_ref[0]

    # ---- residual add + final ReLU -----------------------------------------
    x_c = x_ref[0, 0, 2:2 + TH, 1:1 + W, :].reshape(TH * W, Cp).astype(jnp.float32)
    o_ref[0] = jnp.maximum(z + x_c, 0.0).reshape(TH, W, Cp).astype(o_ref.dtype)


# ---------------------------------------------------------------------------
# Wrapper: eval-mode BN folding, channel padding, row-strip construction.
# ---------------------------------------------------------------------------
def _fold_bn(gamma, beta, mean, var, eps):
    scale = gamma / jnp.sqrt(var + eps)
    return scale, beta - mean * scale


def _fold_params(p, *, eps=1e-5, final_bn=True):
    """Fold conv bias + eval-mode BatchNorm into (scaled weights, shift)."""
    # TODO(synk): training-mode BatchNorm (per-batch statistics) is not
    # implemented; running statistics (eval mode) are folded here.
    s1, sh1 = _fold_bn(p["bn1_gamma"], p["bn1_beta"], p["bn1_mean"], p["bn1_var"], eps)
    t1 = p["b1"] * s1 + sh1
    s2, sh2 = _fold_bn(p["bn2_gamma"], p["bn2_beta"], p["bn2_mean"], p["bn2_var"], eps)
    t2 = p["b2"] * s2 + sh2
    if final_bn:
        s3, sh3 = _fold_bn(p["bn3_gamma"], p["bn3_beta"], p["bn3_mean"], p["bn3_var"], eps)
        s2, t2 = s2 * s3, t2 * s3 + sh3
    # OIHW -> HWIO, then scale the output channels by the folded BN scale.
    w1 = jnp.transpose(p["w1"], (2, 3, 1, 0)) * s1
    w2 = jnp.transpose(p["w2"], (2, 3, 1, 0)) * s2
    return w1, t1, w2, t2


def residual_block(x_nchw, params, *, batch_norm=True, eps=1e-5,
                   row_tile=8, compute_dtype=jnp.bfloat16):
    """Fused ResidualBlock forward (eval mode). x_nchw: (N, C, H, W) like PyTorch."""
    N, C, H, W = x_nchw.shape
    assert params["w1"].shape == (C, C, 3, 3) and params["w2"].shape == (C, C, 3, 3), \
        "ResidualBlock requires in_channels == num_filters"

    w1, t1, w2, t2 = _fold_params(params, eps=eps, final_bn=batch_norm)

    # --- pad channels to a multiple of 128 so the lane dim is dense ---------
    Cp = ((C + 127) // 128) * 128
    pc = Cp - C
    w1p = jnp.pad(w1, ((0, 0), (0, 0), (0, pc), (0, pc))).astype(compute_dtype)
    w2p = jnp.pad(w2, ((0, 0), (0, 0), (0, pc), (0, pc))).astype(compute_dtype)
    t1p = jnp.pad(t1, (0, pc)).astype(jnp.float32).reshape(1, Cp)
    t2p = jnp.pad(t2, (0, pc)).astype(jnp.float32).reshape(1, Cp)

    # --- NCHW -> NHWC, spatial halo pad, channel pad, bf16, row strips ------
    TH = row_tile if (H % row_tile == 0 and H >= row_tile) else H
    S = H // TH
    x_nhwc = jnp.transpose(x_nchw, (0, 2, 3, 1))
    xp = jnp.pad(x_nhwc, ((0, 0), (2, 2), (1, 1), (0, pc))).astype(compute_dtype)
    # Overlapping row strips (2-row halo each side) so a plain Blocked
    # BlockSpec can address them: (N, S, TH+4, W+2, Cp).
    rows = jnp.arange(S)[:, None] * TH + jnp.arange(TH + 4)[None, :]
    x_strips = jnp.take(xp, rows, axis=1)

    kernel = functools.partial(_resblock_kernel, TH=TH, W=W, Cp=Cp, H=H)

    out = pl.pallas_call(
        kernel,
        out_shape=jax.ShapeDtypeStruct((N, H, W, Cp), x_nchw.dtype),
        grid_spec=pltpu.PrefetchScalarGridSpec(
            num_scalar_prefetch=0,
            grid=(N, S),
            in_specs=[
                pl.BlockSpec((1, 1, TH + 4, W + 2, Cp),
                             lambda n, s: (n, s, 0, 0, 0)),
                pl.BlockSpec((3, 3, Cp, Cp), lambda n, s: (0, 0, 0, 0)),
                pl.BlockSpec((1, Cp), lambda n, s: (0, 0)),
                pl.BlockSpec((3, 3, Cp, Cp), lambda n, s: (0, 0, 0, 0)),
                pl.BlockSpec((1, Cp), lambda n, s: (0, 0)),
            ],
            out_specs=pl.BlockSpec((1, TH, W, Cp), lambda n, s: (n, s, 0, 0)),
            scratch_shapes=[pltpu.VMEM((TH + 2, W + 2, Cp), compute_dtype)],
        ),
        compiler_params=pltpu.CompilerParams(
            dimension_semantics=("parallel", "parallel")),
    )(x_strips, w1p, t1p, w2p, t2p)

    return jnp.transpose(out[..., :C], (0, 3, 1, 2))      # back to NCHW


# ---------------------------------------------------------------------------
# References for correctness checking.
# ---------------------------------------------------------------------------
def _reference_folded(x_nchw, params, *, batch_norm=True, eps=1e-5,
                      compute_dtype=jnp.bfloat16):
    """Mirrors the kernel's numerics: folded params, bf16-rounded operands,
    f32 accumulation. Used for a tight correctness check."""
    w1, t1, w2, t2 = _fold_params(params, eps=eps, final_bn=batch_norm)
    f32 = jnp.float32
    rnd = lambda a: a.astype(compute_dtype).astype(f32)
    x = rnd(jnp.transpose(x_nchw, (0, 2, 3, 1)))
    dn = ("NHWC", "HWIO", "NHWC")
    conv = lambda a, w: lax.conv_general_dilated(
        a, w, (1, 1), ((1, 1), (1, 1)), dimension_numbers=dn,
        precision=lax.Precision.HIGHEST)
    y1 = rnd(jnp.maximum(conv(x, rnd(w1)) + t1, 0.0))
    y2 = conv(y1, rnd(w2)) + t2
    out = jnp.maximum(y2 + x, 0.0)
    return jnp.transpose(out, (0, 3, 1, 2))


def _reference_f32(x, params, *, batch_norm=True, eps=1e-5):
    """Plain eval-mode PyTorch math in f32 (semantic sanity check)."""
    def bn(u, g, b, m, v):
        rs = lambda a: a.reshape(1, -1, 1, 1)
        return (u - rs(m)) / jnp.sqrt(rs(v) + eps) * rs(g) + rs(b)
    dn = ("NCHW", "OIHW", "NCHW")
    conv = lambda a, w, b: lax.conv_general_dilated(
        a, w, (1, 1), ((1, 1), (1, 1)), dimension_numbers=dn,
        precision=lax.Precision.HIGHEST) + b.reshape(1, -1, 1, 1)
    p = params
    y = jnp.maximum(bn(conv(x, p["w1"], p["b1"]), p["bn1_gamma"], p["bn1_beta"],
                       p["bn1_mean"], p["bn1_var"]), 0.0)
    z = bn(conv(y, p["w2"], p["b2"]), p["bn2_gamma"], p["bn2_beta"],
           p["bn2_mean"], p["bn2_var"])
    if batch_norm:
        z = bn(z, p["bn3_gamma"], p["bn3_beta"], p["bn3_mean"], p["bn3_var"])
    return jnp.maximum(z + x, 0.0)


if __name__ == "__main__":
    key = jax.random.PRNGKey(0)
    ks = jax.random.split(key, 17)

    # ResidualBlock(in_channels=4, num_filters=4) at small shapes.
    N, C, H, W = 2, 4, 16, 16
    x = jax.random.normal(ks[0], (N, C, H, W), jnp.float32)

    bound = 1.0 / math.sqrt(C * 9)
    u = lambda k, shape, lo, hi: jax.random.uniform(k, shape, jnp.float32, lo, hi)
    params = dict(
        w1=u(ks[1], (C, C, 3, 3), -bound, bound), b1=u(ks[2], (C,), -bound, bound),
        w2=u(ks[3], (C, C, 3, 3), -bound, bound), b2=u(ks[4], (C,), -bound, bound),
        bn1_gamma=u(ks[5], (C,), 0.8, 1.2), bn1_beta=u(ks[6], (C,), -0.2, 0.2),
        bn1_mean=0.1 * jax.random.normal(ks[7], (C,)), bn1_var=u(ks[8], (C,), 0.8, 1.2),
        bn2_gamma=u(ks[9], (C,), 0.8, 1.2), bn2_beta=u(ks[10], (C,), -0.2, 0.2),
        bn2_mean=0.1 * jax.random.normal(ks[11], (C,)), bn2_var=u(ks[12], (C,), 0.8, 1.2),
        bn3_gamma=u(ks[13], (C,), 0.8, 1.2), bn3_beta=u(ks[14], (C,), -0.2, 0.2),
        bn3_mean=0.1 * jax.random.normal(ks[15], (C,)), bn3_var=u(ks[16], (C,), 0.8, 1.2),
    )

    out = residual_block(x, params, batch_norm=True)
    out = jax.block_until_ready(out)
    assert out.shape == (N, C, H, W)

    # Tight check vs a reference with identical numerics (bf16 operands,
    # folded eval-mode BN, f32 accumulation).
    ref_k = _reference_folded(x, params, batch_norm=True)
    assert jnp.allclose(out, ref_k, atol=5e-3, rtol=5e-3), \
        float(jnp.max(jnp.abs(out - ref_k)))

    # Loose sanity check vs plain f32 eval-mode PyTorch math (bf16 rounding of
    # inputs/weights is the only difference).
    ref_f = _reference_f32(x, params, batch_norm=True)
    assert jnp.allclose(out, ref_f, atol=5e-2, rtol=5e-2), \
        float(jnp.max(jnp.abs(out - ref_f)))

    print("KERNEL_OK")
</pallas_src>

<mosaic_0001>
module attributes {stable_mosaic.version = 11 : i64} {
  func.func @_resblock_kernel(%arg0: i32, %arg1: i32, %arg2: memref<1x1x12x18x128xbf16, #tpu.memory_space<vmem>>, %arg3: memref<3x3x128x128xbf16, #tpu.memory_space<vmem>>, %arg4: memref<1x128xf32, #tpu.memory_space<vmem>>, %arg5: memref<3x3x128x128xbf16, #tpu.memory_space<vmem>>, %arg6: memref<1x128xf32, #tpu.memory_space<vmem>>, %arg7: memref<1x8x16x128xf32, #tpu.memory_space<vmem>>, %arg8: memref<10x18x128xbf16, #tpu.memory_space<vmem>>) attributes {dimension_semantics = [#tpu.dimension_semantics<parallel>, #tpu.dimension_semantics<parallel>], iteration_bounds = array<i64: 2, 2>, scalar_prefetch = 0 : i64, scratch_operands = 1 : i64, tpu.core_type = #tpu.core_type<tc>, window_params = [{transform_indices = @transform_0, window_bounds = array<i64: 1, 1, 12, 18, 128>}, {pipeline_mode = #tpu.pipeline_mode<synchronous>, transform_indices = @transform_1, window_bounds = array<i64: 3, 3, 128, 128>}, {pipeline_mode = #tpu.pipeline_mode<synchronous>, transform_indices = @transform_2, window_bounds = array<i64: 1, 128>}, {pipeline_mode = #tpu.pipeline_mode<synchronous>, transform_indices = @transform_3, window_bounds = array<i64: 3, 3, 128, 128>}, {pipeline_mode = #tpu.pipeline_mode<synchronous>, transform_indices = @transform_4, window_bounds = array<i64: 1, 128>}, {transform_indices = @transform_5, window_bounds = array<i64: 1, 8, 16, 128>}]} {
    %c8_i32 = arith.constant 8 : i32
    %0 = arith.muli %arg1, %c8_i32 : i32
    %cst = arith.constant 0.000000e+00 : f32
    %1 = vector.broadcast %cst : f32 to vector<160x128xf32>
    %c0 = arith.constant 0 : index
    %c0_0 = arith.constant 0 : index
    %c0_1 = arith.constant 0 : index
    %c0_2 = arith.constant 0 : index
    %c0_3 = arith.constant 0 : index
    %2 = vector.load %arg2[%c0, %c0_0, %c0_1, %c0_2, %c0_3] : memref<1x1x12x18x128xbf16, #tpu.memory_space<vmem>>, vector<1x1x10x16x128xbf16>
    %3 = vector.shape_cast %2 : vector<1x1x10x16x128xbf16> to vector<10x16x128xbf16>
    %4 = vector.shape_cast %3 : vector<10x16x128xbf16> to vector<160x128xbf16>
    %c0_4 = arith.constant 0 : index
    %c0_5 = arith.constant 0 : index
    %c0_6 = arith.constant 0 : index
    %c0_7 = arith.constant 0 : index
    %5 = vector.load %arg3[%c0_4, %c0_5, %c0_6, %c0_7] : memref<3x3x128x128xbf16, #tpu.memory_space<vmem>>, vector<1x1x128x128xbf16>
    %6 = vector.shape_cast %5 : vector<1x1x128x128xbf16> to vector<128x128xbf16>
    %cst_8 = arith.constant dense<0.000000e+00> : vector<160x128xf32>
    %7 = tpu.matmul %4, %6, %cst_8 {dimension_numbers = #tpu.dot_dimension_numbers<[1], [0], [0], [1], [0, 0, 1, 1], [], []>} : vector<160x128xbf16>, vector<128x128xbf16>, vector<160x128xf32> -> vector<160x128xf32>
    %8 = arith.addf %1, %7 : vector<160x128xf32>
    %c0_9 = arith.constant 0 : index
    %c0_10 = arith.constant 0 : index
    %c0_11 = arith.constant 0 : index
    %c1 = arith.constant 1 : index
    %c0_12 = arith.constant 0 : index
    %9 = vector.load %arg2[%c0_9, %c0_10, %c0_11, %c1, %c0_12] : memref<1x1x12x18x128xbf16, #tpu.memory_space<vmem>>, vector<1x1x10x16x128xbf16>
    %10 = vector.shape_cast %9 : vector<1x1x10x16x128xbf16> to vector<10x16x128xbf16>
    %11 = vector.shape_cast %10 : vector<10x16x128xbf16> to vector<160x128xbf16>
    %c0_13 = arith.constant 0 : index
    %c1_14 = arith.constant 1 : index
    %c0_15 = arith.constant 0 : index
    %c0_16 = arith.constant 0 : index
    %12 = vector.load %arg3[%c0_13, %c1_14, %c0_15, %c0_16] : memref<3x3x128x128xbf16, #tpu.memory_space<vmem>>, vector<1x1x128x128xbf16>
    %13 = vector.shape_cast %12 : vector<1x1x128x128xbf16> to vector<128x128xbf16>
    %cst_17 = arith.constant dense<0.000000e+00> : vector<160x128xf32>
    %14 = tpu.matmul %11, %13, %cst_17 {dimension_numbers = #tpu.dot_dimension_numbers<[1], [0], [0], [1], [0, 0, 1, 1], [], []>} : vector<160x128xbf16>, vector<128x128xbf16>, vector<160x128xf32> -> vector<160x128xf32>
    %15 = arith.addf %8, %14 : vector<160x128xf32>
    %c0_18 = arith.constant 0 : index
    %c0_19 = arith.constant 0 : index
    %c0_20 = arith.constant 0 : index
    %c2 = arith.constant 2 : index
    %c0_21 = arith.constant 0 : index
    %16 = vector.load %arg2[%c0_18, %c0_19, %c0_20, %c2, %c0_21] : memref<1x1x12x18x128xbf16, #tpu.memory_space<vmem>>, vector<1x1x10x16x128xbf16>
    %17 = vector.shape_cast %16 : vector<1x1x10x16x128xbf16> to vector<10x16x128xbf16>
    %18 = vector.shape_cast %17 : vector<10x16x128xbf16> to vector<160x128xbf16>
    %c0_22 = arith.constant 0 : index
    %c2_23 = arith.constant 2 : index
    %c0_24 = arith.constant 0 : index
    %c0_25 = arith.constant 0 : index
    %19 = vector.load %arg3[%c0_22, %c2_23, %c0_24, %c0_25] : memref<3x3x128x128xbf16, #tpu.memory_space<vmem>>, vector<1x1x128x128xbf16>
    %20 = vector.shape_cast %19 : vector<1x1x128x128xbf16> to vector<128x128xbf16>
    %cst_26 = arith.constant dense<0.000000e+00> : vector<160x128xf32>
    %21 = tpu.matmul %18, %20, %cst_26 {dimension_numbers = #tpu.dot_dimension_numbers<[1], [0], [0], [1], [0, 0, 1, 1], [], []>} : vector<160x128xbf16>, vector<128x128xbf16>, vector<160x128xf32> -> vector<160x128xf32>
    %22 = arith.addf %15, %21 : vector<160x128xf32>
    %c0_27 = arith.constant 0 : index
    %c0_28 = arith.constant 0 : index
    %c1_29 = arith.constant 1 : index
    %c0_30 = arith.constant 0 : index
    %c0_31 = arith.constant 0 : index
    %23 = vector.load %arg2[%c0_27, %c0_28, %c1_29, %c0_30, %c0_31] : memref<1x1x12x18x128xbf16, #tpu.memory_space<vmem>>, vector<1x1x10x16x128xbf16>
    %24 = vector.shape_cast %23 : vector<1x1x10x16x128xbf16> to vector<10x16x128xbf16>
    %25 = vector.shape_cast %24 : vector<10x16x128xbf16> to vector<160x128xbf16>
    %c1_32 = arith.constant 1 : index
    %c0_33 = arith.constant 0 : index
    %c0_34 = arith.constant 0 : index
    %c0_35 = arith.constant 0 : index
    %26 = vector.load %arg3[%c1_32, %c0_33, %c0_34, %c0_35] : memref<3x3x128x128xbf16, #tpu.memory_space<vmem>>, vector<1x1x128x128xbf16>
    %27 = vector.shape_cast %26 : vector<1x1x128x128xbf16> to vector<128x128xbf16>
    %cst_36 = arith.constant dense<0.000000e+00> : vector<160x128xf32>
    %28 = tpu.matmul %25, %27, %cst_36 {dimension_numbers = #tpu.dot_dimension_numbers<[1], [0], [0], [1], [0, 0, 1, 1], [], []>} : vector<160x128xbf16>, vector<128x128xbf16>, vector<160x128xf32> -> vector<160x128xf32>
    %29 = arith.addf %22, %28 : vector<160x128xf32>
    %c0_37 = arith.constant 0 : index
    %c0_38 = arith.constant 0 : index
    %c1_39 = arith.constant 1 : index
    %c1_40 = arith.constant 1 : index
    %c0_41 = arith.constant 0 : index
    %30 = vector.load %arg2[%c0_37, %c0_38, %c1_39, %c1_40, %c0_41] : memref<1x1x12x18x128xbf16, #tpu.memory_space<vmem>>, vector<1x1x10x16x128xbf16>
    %31 = vector.shape_cast %30 : vector<1x1x10x16x128xbf16> to vector<10x16x128xbf16>
    %32 = vector.shape_cast %31 : vector<10x16x128xbf16> to vector<160x128xbf16>
    %c1_42 = arith.constant 1 : index
    %c1_43 = arith.constant 1 : index
    %c0_44 = arith.constant 0 : index
    %c0_45 = arith.constant 0 : index
    %33 = vector.load %arg3[%c1_42, %c1_43, %c0_44, %c0_45] : memref<3x3x128x128xbf16, #tpu.memory_space<vmem>>, vector<1x1x128x128xbf16>
    %34 = vector.shape_cast %33 : vector<1x1x128x128xbf16> to vector<128x128xbf16>
    %cst_46 = arith.constant dense<0.000000e+00> : vector<160x128xf32>
    %35 = tpu.matmul %32, %34, %cst_46 {dimension_numbers = #tpu.dot_dimension_numbers<[1], [0], [0], [1], [0, 0, 1, 1], [], []>} : vector<160x128xbf16>, vector<128x128xbf16>, vector<160x128xf32> -> vector<160x128xf32>
    %36 = arith.addf %29, %35 : vector<160x128xf32>
    %c0_47 = arith.constant 0 : index
    %c0_48 = arith.constant 0 : index
    %c1_49 = arith.constant 1 : index
    %c2_50 = arith.constant 2 : index
    %c0_51 = arith.constant 0 : index
    %37 = vector.load %arg2[%c0_47, %c0_48, %c1_49, %c2_50, %c0_51] : memref<1x1x12x18x128xbf16, #tpu.memory_space<vmem>>, vector<1x1x10x16x128xbf16>
    %38 = vector.shape_cast %37 : vector<1x1x10x16x128xbf16> to vector<10x16x128xbf16>
    %39 = vector.shape_cast %38 : vector<10x16x128xbf16> to vector<160x128xbf16>
    %c1_52 = arith.constant 1 : index
    %c2_53 = arith.constant 2 : index
    %c0_54 = arith.constant 0 : index
    %c0_55 = arith.constant 0 : index
    %40 = vector.load %arg3[%c1_52, %c2_53, %c0_54, %c0_55] : memref<3x3x128x128xbf16, #tpu.memory_space<vmem>>, vector<1x1x128x128xbf16>
    %41 = vector.shape_cast %40 : vector<1x1x128x128xbf16> to vector<128x128xbf16>
    %cst_56 = arith.constant dense<0.000000e+00> : vector<160x128xf32>
    %42 = tpu.matmul %39, %41, %cst_56 {dimension_numbers = #tpu.dot_dimension_numbers<[1], [0], [0], [1], [0, 0, 1, 1], [], []>} : vector<160x128xbf16>, vector<128x128xbf16>, vector<160x128xf32> -> vector<160x128xf32>
    %43 = arith.addf %36, %42 : vector<160x128xf32>
    %c0_57 = arith.constant 0 : index
    %c0_58 = arith.constant 0 : index
    %c2_59 = arith.constant 2 : index
    %c0_60 = arith.constant 0 : index
    %c0_61 = arith.constant 0 : index
    %44 = vector.load %arg2[%c0_57, %c0_58, %c2_59, %c0_60, %c0_61] : memref<1x1x12x18x128xbf16, #tpu.memory_space<vmem>>, vector<1x1x10x16x128xbf16>
    %45 = vector.shape_cast %44 : vector<1x1x10x16x128xbf16> to vector<10x16x128xbf16>
    %46 = vector.shape_cast %45 : vector<10x16x128xbf16> to vector<160x128xbf16>
    %c2_62 = arith.constant 2 : index
    %c0_63 = arith.constant 0 : index
    %c0_64 = arith.constant 0 : index
    %c0_65 = arith.constant 0 : index
    %47 = vector.load %arg3[%c2_62, %c0_63, %c0_64, %c0_65] : memref<3x3x128x128xbf16, #tpu.memory_space<vmem>>, vector<1x1x128x128xbf16>
    %48 = vector.shape_cast %47 : vector<1x1x128x128xbf16> to vector<128x128xbf16>
    %cst_66 = arith.constant dense<0.000000e+00> : vector<160x128xf32>
    %49 = tpu.matmul %46, %48, %cst_66 {dimension_numbers = #tpu.dot_dimension_numbers<[1], [0], [0], [1], [0, 0, 1, 1], [], []>} : vector<160x128xbf16>, vector<128x128xbf16>, vector<160x128xf32> -> vector<160x128xf32>
    %50 = arith.addf %43, %49 : vector<160x128xf32>
    %c0_67 = arith.constant 0 : index
    %c0_68 = arith.constant 0 : index
    %c2_69 = arith.constant 2 : index
    %c1_70 = arith.constant 1 : index
    %c0_71 = arith.constant 0 : index
    %51 = vector.load %arg2[%c0_67, %c0_68, %c2_69, %c1_70, %c0_71] : memref<1x1x12x18x128xbf16, #tpu.memory_space<vmem>>, vector<1x1x10x16x128xbf16>
    %52 = vector.shape_cast %51 : vector<1x1x10x16x128xbf16> to vector<10x16x128xbf16>
    %53 = vector.shape_cast %52 : vector<10x16x128xbf16> to vector<160x128xbf16>
    %c2_72 = arith.constant 2 : index
    %c1_73 = arith.constant 1 : index
    %c0_74 = arith.constant 0 : index
    %c0_75 = arith.constant 0 : index
    %54 = vector.load %arg3[%c2_72, %c1_73, %c0_74, %c0_75] : memref<3x3x128x128xbf16, #tpu.memory_space<vmem>>, vector<1x1x128x128xbf16>
    %55 = vector.shape_cast %54 : vector<1x1x128x128xbf16> to vector<128x128xbf16>
    %cst_76 = arith.constant dense<0.000000e+00> : vector<160x128xf32>
    %56 = tpu.matmul %53, %55, %cst_76 {dimension_numbers = #tpu.dot_dimension_numbers<[1], [0], [0], [1], [0, 0, 1, 1], [], []>} : vector<160x128xbf16>, vector<128x128xbf16>, vector<160x128xf32> -> vector<160x128xf32>
    %57 = arith.addf %50, %56 : vector<160x128xf32>
    %c0_77 = arith.constant 0 : index
    %c0_78 = arith.constant 0 : index
    %c2_79 = arith.constant 2 : index
    %c2_80 = arith.constant 2 : index
    %c0_81 = arith.constant 0 : index
    %58 = vector.load %arg2[%c0_77, %c0_78, %c2_79, %c2_80, %c0_81] : memref<1x1x12x18x128xbf16, #tpu.memory_space<vmem>>, vector<1x1x10x16x128xbf16>
    %59 = vector.shape_cast %58 : vector<1x1x10x16x128xbf16> to vector<10x16x128xbf16>
    %60 = vector.shape_cast %59 : vector<10x16x128xbf16> to vector<160x128xbf16>
    %c2_82 = arith.constant 2 : index
    %c2_83 = arith.constant 2 : index
    %c0_84 = arith.constant 0 : index
    %c0_85 = arith.constant 0 : index
    %61 = vector.load %arg3[%c2_82, %c2_83, %c0_84, %c0_85] : memref<3x3x128x128xbf16, #tpu.memory_space<vmem>>, vector<1x1x128x128xbf16>
    %62 = vector.shape_cast %61 : vector<1x1x128x128xbf16> to vector<128x128xbf16>
    %cst_86 = arith.constant dense<0.000000e+00> : vector<160x128xf32>
    %63 = tpu.matmul %60, %62, %cst_86 {dimension_numbers = #tpu.dot_dimension_numbers<[1], [0], [0], [1], [0, 0, 1, 1], [], []>} : vector<160x128xbf16>, vector<128x128xbf16>, vector<160x128xf32> -> vector<160x128xf32>
    %64 = arith.addf %57, %63 : vector<160x128xf32>
    %c0_87 = arith.constant 0 : index
    %c0_88 = arith.constant 0 : index
    %65 = vector.load %arg4[%c0_87, %c0_88] : memref<1x128xf32, #tpu.memory_space<vmem>>, vector<1x128xf32>
    %66 = vector.shape_cast %65 : vector<1x128xf32> to vector<128xf32>
    %67 = vector.shape_cast %66 : vector<128xf32> to vector<1x128xf32>
    %68 = vector.broadcast %67 : vector<1x128xf32> to vector<160x128xf32>
    %69 = arith.addf %64, %68 : vector<160x128xf32>
    %cst_89 = arith.constant 0.000000e+00 : f32
    %70 = vector.broadcast %cst_89 : f32 to vector<160x128xf32>
    %71 = arith.maximumf %69, %70 : vector<160x128xf32>
    %72 = vector.shape_cast %71 : vector<160x128xf32> to vector<10x16x128xf32>
    %c1_i32 = arith.constant 1 : i32
    %73 = arith.subi %0, %c1_i32 : i32
    %74 = tpu.iota {dimensions = array<i32: 0>} : vector<10x1x1xi32>
    %75 = vector.broadcast %73 : i32 to vector<10x1x1xi32>
    %76 = arith.addi %75, %74 : vector<10x1x1xi32>
    %c0_i32 = arith.constant 0 : i32
    %77 = vector.broadcast %c0_i32 : i32 to vector<10x1x1xi32>
    %78 = arith.cmpi sge, %76, %77 : vector<10x1x1xi32>
    %c16_i32 = arith.constant 16 : i32
    %79 = vector.broadcast %c16_i32 : i32 to vector<10x1x1xi32>
    %80 = arith.cmpi slt, %76, %79 : vector<10x1x1xi32>
    %81 = arith.andi %78, %80 : vector<10x1x1xi1>
    %cst_90 = arith.constant 0.000000e+00 : f32
    %82 = vector.shape_cast %81 : vector<10x1x1xi1> to vector<10x1x1xi1>
    %83 = vector.broadcast %82 : vector<10x1x1xi1> to vector<10x16x128xi1>
    %84 = vector.broadcast %cst_90 : f32 to vector<10x16x128xf32>
    %85 = arith.select %83, %72, %84 : vector<10x16x128xi1>, vector<10x16x128xf32>
    %cst_91 = arith.constant 0.000000e+00 : bf16
    %86 = vector.broadcast %cst_91 : bf16 to vector<10x18x128xbf16>
    %c0_92 = arith.constant 0 : index
    %c0_93 = arith.constant 0 : index
    %c0_94 = arith.constant 0 : index
    %87 = vector.load %arg8[%c0_92, %c0_93, %c0_94] : memref<10x18x128xbf16, #tpu.memory_space<vmem>>, vector<10x18x128xbf16>
    tpu.vector_store %arg8[%c0_92, %c0_93, %c0_94], %86 {strides = array<i32>} : memref<10x18x128xbf16, #tpu.memory_space<vmem>>, vector<10x18x128xbf16>,
    %88 = arith.truncf %85 : vector<10x16x128xf32> to vector<10x16x128xbf16>
    %c0_95 = arith.constant 0 : index
    %c1_96 = arith.constant 1 : index
    %c0_97 = arith.constant 0 : index
    %89 = vector.load %arg8[%c0_95, %c1_96, %c0_97] : memref<10x18x128xbf16, #tpu.memory_space<vmem>>, vector<10x16x128xbf16>
    tpu.vector_store %arg8[%c0_95, %c1_96, %c0_97], %88 {strides = array<i32>} : memref<10x18x128xbf16, #tpu.memory_space<vmem>>, vector<10x16x128xbf16>,
    %cst_98 = arith.constant 0.000000e+00 : f32
    %90 = vector.broadcast %cst_98 : f32 to vector<128x128xf32>
    %c0_99 = arith.constant 0 : index
    %c0_100 = arith.constant 0 : index
    %c0_101 = arith.constant 0 : index
    %91 = vector.load %arg8[%c0_99, %c0_100, %c0_101] : memref<10x18x128xbf16, #tpu.memory_space<vmem>>, vector<8x16x128xbf16>
    %92 = vector.shape_cast %91 : vector<8x16x128xbf16> to vector<128x128xbf16>
    %c0_102 = arith.constant 0 : index
    %c0_103 = arith.constant 0 : index
    %c0_104 = arith.constant 0 : index
    %c0_105 = arith.constant 0 : index
    %93 = vector.load %arg5[%c0_102, %c0_103, %c0_104, %c0_105] : memref<3x3x128x128xbf16, #tpu.memory_space<vmem>>, vector<1x1x128x128xbf16>
    %94 = vector.shape_cast %93 : vector<1x1x128x128xbf16> to vector<128x128xbf16>
    %cst_106 = arith.constant dense<0.000000e+00> : vector<128x128xf32>
    %95 = tpu.matmul %92, %94, %cst_106 {dimension_numbers = #tpu.dot_dimension_numbers<[1], [0], [0], [1], [0, 0, 1, 1], [], []>} : vector<128x128xbf16>, vector<128x128xbf16>, vector<128x128xf32> -> vector<128x128xf32>
    %96 = arith.addf %90, %95 : vector<128x128xf32>
    %c0_107 = arith.constant 0 : index
    %c1_108 = arith.constant 1 : index
    %c0_109 = arith.constant 0 : index
    %97 = vector.load %arg8[%c0_107, %c1_108, %c0_109] : memref<10x18x128xbf16, #tpu.memory_space<vmem>>, vector<8x16x128xbf16>
    %98 = vector.shape_cast %97 : vector<8x16x128xbf16> to vector<128x128xbf16>
    %c0_110 = arith.constant 0 : index
    %c1_111 = arith.constant 1 : index
    %c0_112 = arith.constant 0 : index
    %c0_113 = arith.constant 0 : index
    %99 = vector.load %arg5[%c0_110, %c1_111, %c0_112, %c0_113] : memref<3x3x128x128xbf16, #tpu.memory_space<vmem>>, vector<1x1x128x128xbf16>
    %100 = vector.shape_cast %99 : vector<1x1x128x128xbf16> to vector<128x128xbf16>
    %cst_114 = arith.constant dense<0.000000e+00> : vector<128x128xf32>
    %101 = tpu.matmul %98, %100, %cst_114 {dimension_numbers = #tpu.dot_dimension_numbers<[1], [0], [0], [1], [0, 0, 1, 1], [], []>} : vector<128x128xbf16>, vector<128x128xbf16>, vector<128x128xf32> -> vector<128x128xf32>
    %102 = arith.addf %96, %101 : vector<128x128xf32>
    %c0_115 = arith.constant 0 : index
    %c2_116 = arith.constant 2 : index
    %c0_117 = arith.constant 0 : index
    %103 = vector.load %arg8[%c0_115, %c2_116, %c0_117] : memref<10x18x128xbf16, #tpu.memory_space<vmem>>, vector<8x16x128xbf16>
    %104 = vector.shape_cast %103 : vector<8x16x128xbf16> to vector<128x128xbf16>
    %c0_118 = arith.constant 0 : index
    %c2_119 = arith.constant 2 : index
    %c0_120 = arith.constant 0 : index
    %c0_121 = arith.constant 0 : index
    %105 = vector.load %arg5[%c0_118, %c2_119, %c0_120, %c0_121] : memref<3x3x128x128xbf16, #tpu.memory_space<vmem>>, vector<1x1x128x128xbf16>
    %106 = vector.shape_cast %105 : vector<1x1x128x128xbf16> to vector<128x128xbf16>
    %cst_122 = arith.constant dense<0.000000e+00> : vector<128x128xf32>
    %107 = tpu.matmul %104, %106, %cst_122 {dimension_numbers = #tpu.dot_dimension_numbers<[1], [0], [0], [1], [0, 0, 1, 1], [], []>} : vector<128x128xbf16>, vector<128x128xbf16>, vector<128x128xf32> -> vector<128x128xf32>
    %108 = arith.addf %102, %107 : vector<128x128xf32>
    %c1_123 = arith.constant 1 : index
    %c0_124 = arith.constant 0 : index
    %c0_125 = arith.constant 0 : index
    %109 = vector.load %arg8[%c1_123, %c0_124, %c0_125] : memref<10x18x128xbf16, #tpu.memory_space<vmem>>, vector<8x16x128xbf16>
    %110 = vector.shape_cast %109 : vector<8x16x128xbf16> to vector<128x128xbf16>
    %c1_126 = arith.constant 1 : index
    %c0_127 = arith.constant 0 : index
    %c0_128 = arith.constant 0 : index
    %c0_129 = arith.constant 0 : index
    %111 = vector.load %arg5[%c1_126, %c0_127, %c0_128, %c0_129] : memref<3x3x128x128xbf16, #tpu.memory_space<vmem>>, vector<1x1x128x128xbf16>
    %112 = vector.shape_cast %111 : vector<1x1x128x128xbf16> to vector<128x128xbf16>
    %cst_130 = arith.constant dense<0.000000e+00> : vector<128x128xf32>
    %113 = tpu.matmul %110, %112, %cst_130 {dimension_numbers = #tpu.dot_dimension_numbers<[1], [0], [0], [1], [0, 0, 1, 1], [], []>} : vector<128x128xbf16>, vector<128x128xbf16>, vector<128x128xf32> -> vector<128x128xf32>
    %114 = arith.addf %108, %113 : vector<128x128xf32>
    %c1_131 = arith.constant 1 : index
    %c1_132 = arith.constant 1 : index
    %c0_133 = arith.constant 0 : index
    %115 = vector.load %arg8[%c1_131, %c1_132, %c0_133] : memref<10x18x128xbf16, #tpu.memory_space<vmem>>, vector<8x16x128xbf16>
    %116 = vector.shape_cast %115 : vector<8x16x128xbf16> to vector<128x128xbf16>
    %c1_134 = arith.constant 1 : index
    %c1_135 = arith.constant 1 : index
    %c0_136 = arith.constant 0 : index
    %c0_137 = arith.constant 0 : index
    %117 = vector.load %arg5[%c1_134, %c1_135, %c0_136, %c0_137] : memref<3x3x128x128xbf16, #tpu.memory_space<vmem>>, vector<1x1x128x128xbf16>
    %118 = vector.shape_cast %117 : vector<1x1x128x128xbf16> to vector<128x128xbf16>
    %cst_138 = arith.constant dense<0.000000e+00> : vector<128x128xf32>
    %119 = tpu.matmul %116, %118, %cst_138 {dimension_numbers = #tpu.dot_dimension_numbers<[1], [0], [0], [1], [0, 0, 1, 1], [], []>} : vector<128x128xbf16>, vector<128x128xbf16>, vector<128x128xf32> -> vector<128x128xf32>
    %120 = arith.addf %114, %119 : vector<128x128xf32>
    %c1_139 = arith.constant 1 : index
    %c2_140 = arith.constant 2 : index
    %c0_141 = arith.constant 0 : index
    %121 = vector.load %arg8[%c1_139, %c2_140, %c0_141] : memref<10x18x128xbf16, #tpu.memory_space<vmem>>, vector<8x16x128xbf16>
    %122 = vector.shape_cast %121 : vector<8x16x128xbf16> to vector<128x128xbf16>
    %c1_142 = arith.constant 1 : index
    %c2_143 = arith.constant 2 : index
    %c0_144 = arith.constant 0 : index
    %c0_145 = arith.constant 0 : index
    %123 = vector.load %arg5[%c1_142, %c2_143, %c0_144, %c0_145] : memref<3x3x128x128xbf16, #tpu.memory_space<vmem>>, vector<1x1x128x128xbf16>
    %124 = vector.shape_cast %123 : vector<1x1x128x128xbf16> to vector<128x128xbf16>
    %cst_146 = arith.constant dense<0.000000e+00> : vector<128x128xf32>
    %125 = tpu.matmul %122, %124, %cst_146 {dimension_numbers = #tpu.dot_dimension_numbers<[1], [0], [0], [1], [0, 0, 1, 1], [], []>} : vector<128x128xbf16>, vector<128x128xbf16>, vector<128x128xf32> -> vector<128x128xf32>
    %126 = arith.addf %120, %125 : vector<128x128xf32>
    %c2_147 = arith.constant 2 : index
    %c0_148 = arith.constant 0 : index
    %c0_149 = arith.constant 0 : index
    %127 = vector.load %arg8[%c2_147, %c0_148, %c0_149] : memref<10x18x128xbf16, #tpu.memory_space<vmem>>, vector<8x16x128xbf16>
    %128 = vector.shape_cast %127 : vector<8x16x128xbf16> to vector<128x128xbf16>
    %c2_150 = arith.constant 2 : index
    %c0_151 = arith.constant 0 : index
    %c0_152 = arith.constant 0 : index
    %c0_153 = arith.constant 0 : index
    %129 = vector.load %arg5[%c2_150, %c0_151, %c0_152, %c0_153] : memref<3x3x128x128xbf16, #tpu.memory_space<vmem>>, vector<1x1x128x128xbf16>
    %130 = vector.shape_cast %129 : vector<1x1x128x128xbf16> to vector<128x128xbf16>
    %cst_154 = arith.constant dense<0.000000e+00> : vector<128x128xf32>
    %131 = tpu.matmul %128, %130, %cst_154 {dimension_numbers = #tpu.dot_dimension_numbers<[1], [0], [0], [1], [0, 0, 1, 1], [], []>} : vector<128x128xbf16>, vector<128x128xbf16>, vector<128x128xf32> -> vector<128x128xf32>
    %132 = arith.addf %126, %131 : vector<128x128xf32>
    %c2_155 = arith.constant 2 : index
    %c1_156 = arith.constant 1 : index
    %c0_157 = arith.constant 0 : index
    %133 = vector.load %arg8[%c2_155, %c1_156, %c0_157] : memref<10x18x128xbf16, #tpu.memory_space<vmem>>, vector<8x16x128xbf16>
    %134 = vector.shape_cast %133 : vector<8x16x128xbf16> to vector<128x128xbf16>
    %c2_158 = arith.constant 2 : index
    %c1_159 = arith.constant 1 : index
    %c0_160 = arith.constant 0 : index
    %c0_161 = arith.constant 0 : index
    %135 = vector.load %arg5[%c2_158, %c1_159, %c0_160, %c0_161] : memref<3x3x128x128xbf16, #tpu.memory_space<vmem>>, vector<1x1x128x128xbf16>
    %136 = vector.shape_cast %135 : vector<1x1x128x128xbf16> to vector<128x128xbf16>
    %cst_162 = arith.constant dense<0.000000e+00> : vector<128x128xf32>
    %137 = tpu.matmul %134, %136, %cst_162 {dimension_numbers = #tpu.dot_dimension_numbers<[1], [0], [0], [1], [0, 0, 1, 1], [], []>} : vector<128x128xbf16>, vector<128x128xbf16>, vector<128x128xf32> -> vector<128x128xf32>
    %138 = arith.addf %132, %137 : vector<128x128xf32>
    %c2_163 = arith.constant 2 : index
    %c2_164 = arith.constant 2 : index
    %c0_165 = arith.constant 0 : index
    %139 = vector.load %arg8[%c2_163, %c2_164, %c0_165] : memref<10x18x128xbf16, #tpu.memory_space<vmem>>, vector<8x16x128xbf16>
    %140 = vector.shape_cast %139 : vector<8x16x128xbf16> to vector<128x128xbf16>
    %c2_166 = arith.constant 2 : index
    %c2_167 = arith.constant 2 : index
    %c0_168 = arith.constant 0 : index
    %c0_169 = arith.constant 0 : index
    %141 = vector.load %arg5[%c2_166, %c2_167, %c0_168, %c0_169] : memref<3x3x128x128xbf16, #tpu.memory_space<vmem>>, vector<1x1x128x128xbf16>
    %142 = vector.shape_cast %141 : vector<1x1x128x128xbf16> to vector<128x128xbf16>
    %cst_170 = arith.constant dense<0.000000e+00> : vector<128x128xf32>
    %143 = tpu.matmul %140, %142, %cst_170 {dimension_numbers = #tpu.dot_dimension_numbers<[1], [0], [0], [1], [0, 0, 1, 1], [], []>} : vector<128x128xbf16>, vector<128x128xbf16>, vector<128x128xf32> -> vector<128x128xf32>
    %144 = arith.addf %138, %143 : vector<128x128xf32>
    %c0_171 = arith.constant 0 : index
    %c0_172 = arith.constant 0 : index
    %145 = vector.load %arg6[%c0_171, %c0_172] : memref<1x128xf32, #tpu.memory_space<vmem>>, vector<1x128xf32>
    %146 = vector.shape_cast %145 : vector<1x128xf32> to vector<128xf32>
    %147 = vector.shape_cast %146 : vector<128xf32> to vector<1x128xf32>
    %148 = vector.broadcast %147 : vector<1x128xf32> to vector<128x128xf32>
    %149 = arith.addf %144, %148 : vector<128x128xf32>
    %c0_173 = arith.constant 0 : index
    %c0_174 = arith.constant 0 : index
    %c2_175 = arith.constant 2 : index
    %c1_176 = arith.constant 1 : index
    %c0_177 = arith.constant 0 : index
    %150 = vector.load %arg2[%c0_173, %c0_174, %c2_175, %c1_176, %c0_177] : memref<1x1x12x18x128xbf16, #tpu.memory_space<vmem>>, vector<1x1x8x16x128xbf16>
    %151 = vector.shape_cast %150 : vector<1x1x8x16x128xbf16> to vector<8x16x128xbf16>
    %152 = vector.shape_cast %151 : vector<8x16x128xbf16> to vector<128x128xbf16>
    %153 = arith.extf %152 : vector<128x128xbf16> to vector<128x128xf32>
    %154 = arith.addf %149, %153 : vector<128x128xf32>
    %cst_178 = arith.constant 0.000000e+00 : f32
    %155 = vector.broadcast %cst_178 : f32 to vector<128x128xf32>
    %156 = arith.maximumf %154, %155 : vector<128x128xf32>
    %157 = vector.shape_cast %156 : vector<128x128xf32> to vector<8x16x128xf32>
    %c0_179 = arith.constant 0 : index
    %c0_180 = arith.constant 0 : index
    %c0_181 = arith.constant 0 : index
    %c0_182 = arith.constant 0 : index
    %158 = vector.load %arg7[%c0_179, %c0_180, %c0_181, %c0_182] : memref<1x8x16x128xf32, #tpu.memory_space<vmem>>, vector<1x8x16x128xf32>
    %159 = vector.shape_cast %158 : vector<1x8x16x128xf32> to vector<8x16x128xf32>
    %160 = vector.shape_cast %157 : vector<8x16x128xf32> to vector<1x8x16x128xf32>
    tpu.vector_store %arg7[%c0_179, %c0_180, %c0_181, %c0_182], %160 {strides = array<i32>} : memref<1x8x16x128xf32, #tpu.memory_space<vmem>>, vector<1x8x16x128xf32>,
    return
  }
  func.func @transform_0(%arg0: i32, %arg1: i32) -> (i32, i32, i32, i32, i32) {
    %c0_i32 = arith.constant 0 : i32
    %c0_i32_0 = arith.constant 0 : i32
    %c0_i32_1 = arith.constant 0 : i32
    %c0_i32_2 = arith.constant 0 : i32
    return %arg0, %arg1, %c0_i32, %c0_i32_0, %c0_i32_1 : i32, i32, i32, i32, i32
  }
  func.func @transform_1(%arg0: i32, %arg1: i32) -> (i32, i32, i32, i32) {
    %c0_i32 = arith.constant 0 : i32
    %c0_i32_0 = arith.constant 0 : i32
    %c0_i32_1 = arith.constant 0 : i32
    %c0_i32_2 = arith.constant 0 : i32
    %c0_i32_3 = arith.constant 0 : i32
    return %c0_i32, %c0_i32_0, %c0_i32_1, %c0_i32_2 : i32, i32, i32, i32
  }
  func.func @transform_2(%arg0: i32, %arg1: i32) -> (i32, i32) {
    %c0_i32 = arith.constant 0 : i32
    %c0_i32_0 = arith.constant 0 : i32
    %c0_i32_1 = arith.constant 0 : i32
    return %c0_i32, %c0_i32_0 : i32, i32
  }
  func.func @transform_3(%arg0: i32, %arg1: i32) -> (i32, i32, i32, i32) {
    %c0_i32 = arith.constant 0 : i32
    %c0_i32_0 = arith.constant 0 : i32
    %c0_i32_1 = arith.constant 0 : i32
    %c0_i32_2 = arith.constant 0 : i32
    %c0_i32_3 = arith.constant 0 : i32
    return %c0_i32, %c0_i32_0, %c0_i32_1, %c0_i32_2 : i32, i32, i32, i32
  }
  func.func @transform_4(%arg0: i32, %arg1: i32) -> (i32, i32) {
    %c0_i32 = arith.constant 0 : i32
    %c0_i32_0 = arith.constant 0 : i32
    %c0_i32_1 = arith.constant 0 : i32
    return %c0_i32, %c0_i32_0 : i32, i32
  }
  func.func @transform_5(%arg0: i32, %arg1: i32) -> (i32, i32, i32, i32) {
    %c0_i32 = arith.constant 0 : i32
    %c0_i32_0 = arith.constant 0 : i32
    %c0_i32_1 = arith.constant 0 : i32
    return %arg0, %arg1, %c0_i32, %c0_i32_0 : i32, i32, i32, i32
  }
}

</mosaic_0001>

<bundles_post_ra>
// kernel: tpu_custom_call.1
= control target key start
LH: loop header
LB: loop body
LE: loop exit
PB: predicated region body
PF: predicated region fallthrough
CT: control target
= control target key end

     0   :  { %s12233_s0 = inlined_call_operand.vmem [shape: bf16[2,2,12,18,128], index: 0, kind: input, shape index: {}]   ;;  %s12234_s1 = inlined_call_operand.vmem [shape: bf16[3,3,128,128], index: 1, kind: input, shape index: {}]   ;;  %s12235_s2 = inlined_call_operand.vmem [shape: f32[1,128], index: 2, kind: input, shape index: {}]   ;;  %s12236_s3 = inlined_call_operand.hbm [shape: bf16[3,3,128,128], index: 3, kind: input, shape index: {}]   ;;  %s12237_s4 = inlined_call_operand.vmem [shape: f32[1,128], index: 4, kind: input, shape index: {}]   ;;  %s12238_s5 = inlined_call_operand.hbm [shape: f32[2,16,16,128], index: 5, kind: output, shape index: {}]  }
   0x1   :  { %12251 = sst [smem:[#allocation27_spill]] %s12236_s3 }
   0x2   :  { %10 = vsyncpa [#allocation4], 0 }
   0x3   :  { %11 = vsyncpa [#allocation5], 0 }
   0x4   :  { %13 = vsyncpa [#allocation5 + $0x1], 0  ;;  %s9755_s18 = smov 0   ;;  %s9757_s19 = smov 0  }
   0x5   :  { %s9759_s20 = smov 0   ;;  %s9761_s21 = smov 0  }
   0x6   :  { %s9763_s22 = smov 0   ;;  %s9765_s23 = smov 0  }
   0x7   :  { %s9767_s24 = smov 0   ;;  %s9769_s25 = smov 0  }
   0x8 LB: > { %s7380_s26 = sadd.s32 4294967295, %s9716_s25   ;;  %s7381_s27 = sadd.s32 4294967294, %s9716_s25   ;;  %s9716_s25 = sphi %s9769_s25, %s19_s25   ;;  %s9712_s24 = sphi %s9767_s24, %s12346_s24   ;;  %s9708_s23 = sphi %s9765_s23, %s12345_s23   ;;  %s9704_s22 = sphi %s9763_s22, %s12344_s22   ;;  %s9700_s21 = sphi %s9761_s21, %s12343_s21   ;;  %s9696_s20 = sphi %s9759_s20, %s12342_s20   ;;  %s9692_s19 = sphi %s9757_s19, %s12341_s19   ;;  %s9688_s18 = sphi %s9755_s18, %s12340_s18  }
   0x9   : > { %s28_s28 = sadd.s32 1, %s9708_s23  ;;  %s31_s29 = sadd.s32 1, %s9712_s24 }
   0xa   : > { %p29_p0 = scmp.ge.s32.totalorder %s28_s28, 2  ;;  %s152_s30 = sadd.s32 1, %s9696_s20 }
   0xb   : > { %p162_p1 = scmp.ne.s32.totalorder %s9696_s20, %s9692_s19  ;;  %p163_p2 = scmp.eq.s32.totalorder %s7380_s26, 3 }
   0xc   : > { %s12348_s28 = smov (%p29_p0, %s28_s28), 0  ;;  %s12350_s29 = smov (!%p29_p0, %s31_s29), %s9712_s24 }
   0xd   : > { %s148_s6 = ssub.s32 %s9708_s23, %s12348_s28  ;;  %p9807_p3 = por %p163_p2, %p162_p1 }
   0xe   : > { %p33_p4 = scmp.ge.s32.totalorder %s12350_s29, 2  ;;  %p168_p5 = scmp.ne.s32.totalorder %s9692_s19, %s9688_s18 }
   0xf   : > { %s12252_s7 = scalar_select %p9807_p3, 1, 0 }
  0x10   : > { %p169_p6 = scmp.eq.s32.totalorder %s7381_s27, 3  ;;  %p7382_p7 = scmp.ge.s32.totalorder %s9716_s25, 1 }
  0x11   : > { %s12352_s29 = smov (%p33_p4, %s12350_s29), 0  ;;  %p176_p9 = scmp.lt.s32.totalorder %s9716_s25, 5 }
  0x12   : > { %p9816_p8 = por %p169_p6, %p168_p5  ;;  %s147_s9 = ssub.s32 %s9712_s24, %s12352_s29 }
  0x13   : > { %s149_s10 = sor.u32 %s148_s6, %s147_s9  ;;  %p9823_p10 = pnand %p7382_p7, %p176_p9 }
  0x14   : > { %s12253_s8 = scalar_select %p9816_p8, 1, 0 }
  0x15   : > { %s12254_s11 = scalar_select %p9823_p10, 1, 0 }
  0x16   : > { %p150_p11 = scmp.eq.s32.totalorder %s149_s10, 0  ;;  %p9827_p12 = scmp.eq.s32.totalorder %s7380_s26, 0 }
  0x17   : > { %p9287_p13 = pneg %p9823_p10  ;;  %s9718_s14 = smov [#allocation3]  }
  0x18   : > { %s12255_s12 = scalar_select %p9827_p12, 1, 0 }
  0x19   : > { %s9834_s13 = scalar_select %p150_p11, %s9696_s20, %s152_s30  }
  0x1a   : > { %s194_s15 = sshll.u32 %s9718_s14, 4  ;;  %p9838_p0 = pnand %p9827_p12, %p9287_p13  ;;  %s195_s15 = int_to_ptr.vmem [resolvable:$true] %s194_s15 }
  0x1b   : > { %s12257_s3 = sld [smem:[#allocation27_spill]] }
  0x1c   : > { %p9592_p2 = pneg %p9838_p0 }
  0x21   : > { %s9590_s26 = scalar_lea.hbm %s12257_s3, 9216 }
  0x22   : > { %p9591_p1 = scmp.ne.s32.totalorder %s12257_s3, %s9590_s26  ;;  %p9597_p6 = scmp.lt.u32.totalorder %s9590_s26, %s12257_s3 }
  0x24   : > { %p9593_p4 = pnand %p9592_p2, %p9591_p1 }
  0x26   : > { %p9594_p5 = pneg %p9593_p4 }
  0x28   : > { %p9599_p7 = pnand %p9597_p6, %p9594_p5 }
  0x2a   : > { %9602 = shalt.err (!%p9599_p7)
}
  0x2b   : > { %s9603_s14 = scalar_lea.vmem %s195_s15, 9216  ;;  %p9611_p8 = scmp.lt.s32.totalorder %s195_s15, %s195_s15 }
  0x2c   : > { %p9604_p9 = scmp.ne.s32.totalorder %s195_s15, %s9603_s14  ;;  %p9612_p3 = scmp.lt.s32.totalorder %s9603_s14, %s9603_s14 }
  0x2e   : > { %p9606_p11 = pnand %p9604_p9, %p9592_p2  ;;  %p9613_p12 = por %p9612_p3, %p9611_p8 }
  0x30   : > { %p9607_p13 = pneg %p9606_p11 }
  0x32   : > { %p9614_p10 = pnand %p9613_p12, %p9607_p13 }
  0x34   : > { %9617 = shalt.err (!%p9614_p10)
}
  0x35   : > { %s9719_s17 = smov 64   ;;  %s9720_s27 = smov 4  }
  0x36   : > { %9290 = dma.hbm_to_vmem [thread:$0]  (!%p9838_p0), %s12257_s3, 9216, %s195_s15, [#allocation4], %s9719_s17, %s9719_s17, %s9720_s27  }
  0x37   : > { %p12258_p1 = scmp.ne.s32.totalorder %s12254_s11, 0 }
  0x39   : > { %225 = sbr.rel (%p12258_p1) target bundleno = 1188 (0x4a4), region = 40 }
  0x40   : > { %p12259_p4 = scmp.ne.s32.totalorder %s12255_s12, 0 }
  0x42   : > { %9679 = dma.done.wait (%p12259_p4), [#allocation4], 9216  }
  0x43   : > { %9681 = vsyncadd (%p12259_p4), [#allocation4], 4294958080  ;;  %p257_p3 = scmp.lt.s32.totalorder %s9704_s22, 1  ;;  %p259_p8 = scmp.lt.s32.totalorder %s9700_s21, 1  ;;  %v9368_v0 = vld [vmem:[%s12234_s1] sm:$0xff]   ;;  %v9369_v1 = vld [vmem:[%s12234_s1 + $0x8] sm:$0xff]  }
  0x44   : > { %8415 = vmatprep.subr.bf16.mxu0 %v9368_v0  ;;  %v9370_v2 = vld [vmem:[%s12234_s1 + $0x10] sm:$0xff]   ;;  %v9371_v3 = vld [vmem:[%s12234_s1 + $0x18] sm:$0xff]   ;;  %v9372_v7 = vld [vmem:[%s12234_s1 + $0x20] sm:$0xff]   ;;  %vm1027_vm0 = vcmask 1042432   ;;  %vm1028_vm1 = vcmask 1046532   ;;  %s7389_s17 = sshll.u32 %s9700_s21, 3 }
  0x45   : > { %s258_s16 = scalar_select %p257_p3, %s9704_s22, 1  ;;  %8416 = vmatpush3.bf16.msra.mxu0 %v9368_v0  ;;  %v9373_v8 = vld [vmem:[%s12234_s1 + $0x28] sm:$0xff]   ;;  %v9374_v9 = vld [vmem:[%s12234_s1 + $0x30] sm:$0xff]   ;;  %v9375_v10 = vld [vmem:[%s12234_s1 + $0x38] sm:$0xff]   ;;  %vm315_vm3 = vsmask.f32 3328 }
  0x46   : > { %s260_s26 = scalar_select %p259_p8, %s9700_s21, 1  ;;  %8417 = vmatprep.subr.bf16.mxu0 %v9369_v1  ;;  %v9378_v13 = vld [vmem:[%s12234_s1 + $0x80] sm:$0xff]   ;;  %v9379_v18 = vld [vmem:[%s12234_s1 + $0x88] sm:$0xff]   ;;  %v9382_v21 = vld [vmem:[%s12234_s1 + $0x90] sm:$0xff]   ;;  %vm316_vm4 = vsmask.f32 7440 }
  0x47   : > { %s9280_s30 = smul.u32 72, %s258_s16  ;;  %v9384_v26 = vld [vmem:[%s12234_s1 + $0x98] sm:$0xff]   ;;  %v9386_v27 = vld [vmem:[%s12234_s1 + $0xa0] sm:$0xff]   ;;  %v9389_v35 = vld [vmem:[%s12234_s1 + $0xa8] sm:$0xff]   ;;  %s7831_s27 = sadd.s32 4294967295, %s7389_s17  ;;  %vm4029_vm10 = vcmask 1043456  }
  0x48   : > { %s9279_s10 = smul.u32 36, %s260_s26  ;;  %v9390_v38 = vld [vmem:[%s12234_s1 + $0xb0] sm:$0xff]   ;;  %v9393_v46 = vld [vmem:[%s12234_s1 + $0xb8] sm:$0xff]   ;;  %vm9996_vm2 = vmor %vm1027_vm0, %vm1028_vm1  ;;  %vm4030_vm13 = vsmask.f32 7938  ;;  %vm4036_vm1 = vcmask 1040384  }
  0x49   : > { %8418 = vmatpush3.bf16.msra.mxu0 %v9369_v1  ;;  %v9394_v54 = vld [vmem:[%s12234_s1 + $0xc0] sm:$0xff]   ;;  %vm10238_vm5 = vmor %vm315_vm3, %vm316_vm4  ;;  %vm3826_vm14 = vsmask.f32 256  ;;  %vm3827_vm0 = vsmask.f32 4368  ;;  %s254_s9 = sand.u32 1, %s9692_s19  }
  0x4a   : > { %s263_s11 = sadd.s32 %s9280_s30, %s9279_s10  ;;  %8419 = vmatprep.subr.bf16.mxu0 %v9370_v2  ;;  %s12097_s10 = sshll.u32 %s254_s9, 7 }
  0x4b   : > { %s7388_s12 = sshll.u32 %s263_s11, 2  ;;  %s12116_s3 = scalar_lea.vmem [#allocation6], %s12097_s10 }
  0x4c   : > { %s9880_s26 = scalar_lea.vmem %s12233_s0, %s7388_s12  ;;  %s8048_s15 = sshll.u32 %s9704_s22, 5 }
  0x4d   : > { %v9886_v4 = vld [vmem:[%s9880_s26] sm:$0xf]  ;;  %v9889_v5 = vld [vmem:[%s9880_s26 + $0x4] sm:$0xf]  ;;  %8420 = vmatpush3.bf16.msra.mxu0 %v9370_v2  ;;  %v9906_v11 = vld [vmem:[%s9880_s26 + $0xc] sm:$0xf] }
  0x4e   : > { %v7424_v6 = vcombine.low %v9886_v4, %v9889_v5  ;;  %8421 = vmatprep.subr.bf16.mxu0 %v9371_v3  ;;  %v9909_v12 = vld [vmem:[%s9880_s26 + $0x10] sm:$0xf]  ;;  %v9915_v14 = vld [vmem:[%s9880_s26 + $0x18] sm:$0xf]  ;;  %v9918_v15 = vld [vmem:[%s9880_s26 + $0x1c] sm:$0xf] }
  0x4f   : > { %12260 = vst [vmem:[#allocation9_spill] sm:$0xff] %v9918_v15  ;;  %v7425_v16 = vcombine.low %v9906_v11, %v9909_v12  ;;  %v7426_v17 = vcombine.low %v9915_v14, %v9918_v15  ;;  %v9928_v19 = vld [vmem:[%s9880_s26 + $0x24] sm:$0xf]  ;;  %v9931_v20 = vld [vmem:[%s9880_s26 + $0x28] sm:$0xf]  ;;  %v1032_v34 = vrot.slane %v9889_v5, 5 }
  0x50   : > { %8431 = vmatprep.mubr.bf16.mxu0 %v7424_v6  ;;  %12261 = vst [vmem:[#allocation10_spill] sm:$0xff] %v9931_v20  ;;  %v9937_v22 = vld [vmem:[%s9880_s26 + $0x30] sm:$0xf]  ;;  %v9940_v23 = vld [vmem:[%s9880_s26 + $0x34] sm:$0xf]  ;;  %v7427_v24 = vcombine.low %v9928_v19, %v9931_v20  ;;  %v1039_v43 = vrot.slane %v9909_v12, 5 }
  0x51   : > { %8422 = vmatpush3.bf16.msra.mxu0 %v9371_v3  ;;  %12262 = vst [vmem:[#allocation11_spill] sm:$0xff] %v9940_v23  ;;  %v7428_v25 = vcombine.low %v9937_v22, %v9940_v23  ;;  %v9953_v28 = vld [vmem:[%s9880_s26 + $0x3c] sm:$0xf]  ;;  %v9956_v29 = vld [vmem:[%s9880_s26 + $0x40] sm:$0xf]  ;;  %v1034_v47 = vrot.slane %v1032_v34, 4 }
  0x52   : > { %8423 = vmatprep.subr.bf16.mxu0 %v9372_v7  ;;  %12263 = vst [vmem:[#allocation12_spill] sm:$0xff] %v9956_v29  ;;  %v9959_v30 = vld [vmem:[%s9880_s26 + $0x48] sm:$0xf]  ;;  %v9962_v31 = vld [vmem:[%s9880_s26 + $0x4c] sm:$0xf]  ;;  %v7429_v32 = vcombine.low %v9953_v28, %v9956_v29  ;;  %v1046_v55 = vrot.slane %v9918_v15, 5 }
  0x53   : > { %12264 = vst [vmem:[#allocation13_spill] sm:$0xff] %v9962_v31  ;;  %v7430_v33 = vcombine.low %v9959_v30, %v9962_v31  ;;  %v9973_v36 = vld [vmem:[%s9880_s26 + $0x54] sm:$0xf]  ;;  %v9976_v37 = vld [vmem:[%s9880_s26 + $0x58] sm:$0xf]  ;;  %v1041_v61 = vrot.slane %v1039_v43, 4 }
  0x54   : > { %12265 = vst [vmem:[#allocation14_spill] sm:$0xff] %v9976_v37  ;;  %v285_v39 = vld [vmem:[%s9880_s26 + $0x60] sm:$0xf]  ;;  %v9983_v40 = vld [vmem:[%s9880_s26 + $0x64] sm:$0xf]  ;;  %v7431_v44 = vcombine.low %v9973_v36, %v9976_v37  ;;  %v1048_v2 = vrot.slane %v1046_v55, 4 }
  0x55   : > { %8424 = vmatpush3.bf16.msra.mxu0 %v9372_v7  ;;  %v305_v41 = vld [vmem:[%s9880_s26 + $0x8] sm:$0x1]  ;;  %v997_v42 = vld [vmem:[%s9880_s26] sm:$0xe]  ;;  %v7432_v45 = vcombine.low %v285_v39, %v9983_v40  ;;  %v287_v51 = vld [vmem:[%s9880_s26 + $0x6c] sm:$0xf] }
  0x56   : > { %8425 = vmatprep.subr.bf16.mxu0 %v9373_v8  ;;  %v7442_v49 = vrot.slane %v997_v42, 9  ;;  %v1035_v50 = vrot.slane %v305_v41, 5  ;;  %v10002_v52 = vld [vmem:[%s9880_s26 + $0x70] sm:$0xf]  ;;  %v306_v53 = vld [vmem:[%s9880_s26 + $0x14] sm:$0x1] }
  0x57   : > { %v998_v56 = vld [vmem:[%s9880_s26 + $0xc] sm:$0xe]  ;;  %v307_v59 = vld [vmem:[%s9880_s26 + $0x20] sm:$0x1]  ;;  %v999_v60 = vld [vmem:[%s9880_s26 + $0x18] sm:$0xe]  ;;  %v7433_v62 = vcombine.low %v287_v51, %v10002_v52 }
  0x58   : > { %v1033_v57 = vsel %vm9996_vm2, %v7442_v49, %v1032_v34  ;;  %v1036_v58 = vsel %vm9996_vm2, %v1034_v47, %v1035_v50  ;;  %v1042_v63 = vrot.slane %v306_v53, 5  ;;  %v7443_v1 = vrot.slane %v998_v56, 9  ;;  %v9395_v34 = vld [vmem:[%s12234_s1 + $0xc8] sm:$0xff]   ;;  %v310_v47 = vld [vmem:[%s9880_s26 + $0x44] sm:$0x1]  ;;  %s7283_s22 = sshll.u32 %s12116_s3, 4  ;;  %s12174_s22 = int_to_ptr.vmem [resolvable:$true] %s7283_s22 }
  0x59   : > { %8426 = vmatpush3.bf16.msra.mxu0 %v9373_v8  ;;  %v7468_v0 = vcombine.low %v1033_v57, %v1036_v58  ;;  %v7444_v3 = vrot.slane %v999_v60, 9  ;;  %v1049_v6 = vrot.slane %v307_v59, 5  ;;  %v1002_v49 = vld [vmem:[%s9880_s26 + $0x3c] sm:$0xe]  ;;  %v1074_v50 = vrot.slane %v9962_v31, 5  ;;  %s12181_s12 = scalar_lea.sflag [#allocation5], %s254_s9 }
  0x5a   : > { %8427 = vmatprep.subr.bf16.mxu0 %v9374_v9  ;;  %v1040_v7 = vsel %vm9996_vm2, %v7443_v1, %v1039_v43  ;;  %v1043_v8 = vsel %vm9996_vm2, %v1041_v61, %v1042_v63  ;;  %v1067_v43 = vrot.slane %v9956_v29, 5  ;;  %v311_v51 = vld [vmem:[%s9880_s26 + $0x50] sm:$0x1]  ;;  %v1003_v53 = vld [vmem:[%s9880_s26 + $0x48] sm:$0xe]  ;;  %v7447_v56 = vrot.slane %v1002_v49, 9 }
  0x5b   : > { %v1070_v58 = vrot.slane %v310_v47, 5  ;;  %v9397_v59 = vld [vmem:[%s12234_s1 + $0xd8] sm:$0xff]   ;;  %v7448_v60 = vrot.slane %v1003_v53, 9  ;;  %v1076_v61 = vrot.slane %v1074_v50, 4  ;;  %v1004_v1 = vld [vmem:[%s9880_s26 + $0x54] sm:$0xe] }
  0x5c   : > { %v1069_v57 = vrot.slane %v1067_v43, 4  ;;  %v1068_v63 = vsel %vm9996_vm2, %v7447_v56, %v1067_v43  ;;  %v322_v53 = vshll.u32 %v9886_v4, 16  ;;  %v343_v56 = vshrl.u32 %v9906_v11, 16  ;;  %v7558_v29 = vld [vmem:[%s9880_s26 + $0x54] sm:$0xf]  ;;  %s9618_s6 = scalar_lea.vmem %s12174_s22, 2048 }
  0x5d   : > { %8428 = vmatpush3.bf16.msra.mxu0 %v9374_v9  ;;  %v1053_v9 = vrot.slane %v9931_v20, 5  ;;  %p9619_p10 = scmp.ne.s32.totalorder %s12174_s22, %s9618_s6  ;;  %p12338_p12 = scmp.ne.s32.totalorder %s12252_s7, 0 }
  0x5e   : > { %8429 = vmatprep.subr.bf16.mxu0 %v9375_v10  ;;  %s9722_s16 = smov [#allocation6]  }
  0x5f   : > { %p9620_p0 = pnand %p9619_p10, %p12338_p12  ;;  %s9622_s30 = sshll.u32 %s9722_s16, 4  ;;  %s9623_s30 = int_to_ptr.vmem [resolvable:$false] %s9622_s30 }
  0x60   : > { %s9624_s10 = scalar_lea.vmem %s9623_s30, 4096  ;;  %p9625_p5 = scmp.lt.s32.totalorder %s12174_s22, %s9623_s30 }
  0x61   : > { %8430 = vmatpush3.bf16.msra.mxu0 %v9375_v10  ;;  %v1047_v10 = vsel %vm9996_vm2, %v7444_v3, %v1046_v55  ;;  %v9398_v3 = vld [vmem:[%s12234_s1 + $0xe0] sm:$0xff]   ;;  %p9621_p2 = pneg %p9620_p0  ;;  %p9626_p6 = scmp.lt.s32.totalorder %s9624_s10, %s9618_s6 }
  0x62   : > { %8451 = vmatprep.subr.bf16.mxu0 %v9378_v13 }
  0x63   : > { %p9627_p7 = por %p9626_p6, %p9625_p5 }
  0x64   : > { %8432 = vmatmul.mubr.bf16.vlgmr.msra.gmra.mrb[0].mxu0 %v7425_v16  ;;  %v308_v16 = vld [vmem:[%s9880_s26 + $0x2c] sm:$0x1] }
  0x65   : > { %8452 = vmatpush3.bf16.msra.mxu0 %v9378_v13  ;;  %8435 = vmatprep.mubr.bf16.mxu0 %v7426_v17  ;;  %v1050_v13 = vsel %vm9996_vm2, %v1048_v2, %v1049_v6  ;;  %v1000_v17 = vld [vmem:[%s9880_s26 + $0x24] sm:$0xe]  ;;  %v1081_v2 = vrot.slane %v9976_v37, 5  ;;  %v1075_v6 = vsel %vm9996_vm2, %v7448_v60, %v1074_v50  ;;  %v391_v60 = vshrl.u32 %v9928_v19, 16  ;;  %p9628_p9 = pnand %p9627_p7, %p9621_p2 }
  0x66   : > { %8453 = vmatprep.subr.bf16.mxu0 %v9379_v18 }
  0x69   : > { %8454 = vmatpush3.bf16.msra.mxu0 %v9379_v18  ;;  %v1060_v18 = vrot.slane %v9940_v23, 5 }
  0x6a   : > { %8455 = vmatprep.subr.bf16.mxu0 %v9382_v21 }
  0x6c   : > { %8436 = vmatmul.mubr.bf16.gmra.mrb[4].mxu0 %v7427_v24  ;;  %v1001_v24 = vld [vmem:[%s9880_s26 + $0x30] sm:$0xe] }
  0x6d   : > { %8456 = vmatpush3.bf16.msra.mxu0 %v9382_v21  ;;  %8439 = vmatprep.mubr.bf16.mxu0 %v7428_v25  ;;  %v309_v21 = vld [vmem:[%s9880_s26 + $0x38] sm:$0x1]  ;;  %v7469_v25 = vcombine.low %v1040_v7, %v1043_v8  ;;  %v312_v8 = vld [vmem:[%s9880_s26 + $0x5c] sm:$0x1] }
  0x6e   : > { %8457 = vmatprep.subr.bf16.mxu0 %v9384_v26  ;;  %v1063_v39 = vrot.slane %v309_v21, 5  ;;  %v1083_v21 = vrot.slane %v1081_v2, 4 }
  0x71   : > { %8458 = vmatpush3.bf16.msra.mxu0 %v9384_v26  ;;  %v7470_v26 = vcombine.low %v1047_v10, %v1050_v13  ;;  %v313_v10 = vld [vmem:[%s9880_s26 + $0x68] sm:$0x1]  ;;  %v1005_v13 = vld [vmem:[%s9880_s26 + $0x60] sm:$0xe] }
  0x72   : > { %8459 = vmatprep.subr.bf16.mxu0 %v9386_v27 }
  0x74   : > { %8440 = vmatmul.mubr.bf16.gmra.mrb[8].mxu0 %v7429_v32  ;;  %v1055_v32 = vrot.slane %v1053_v9, 4 }
  0x75   : > { %8460 = vmatpush3.bf16.msra.mxu0 %v9386_v27  ;;  %8443 = vmatprep.mubr.bf16.mxu0 %v7430_v33  ;;  %v7445_v27 = vrot.slane %v1000_v17, 9  ;;  %v1056_v33 = vrot.slane %v308_v16, 5  ;;  %v7449_v17 = vrot.slane %v1004_v1, 9  ;;  %v10111_v1 = vrot.slane %v322_v53, 5 }
  0x76   : > { %8461 = vmatprep.subr.bf16.mxu0 %v9389_v35 }
  0x77   : > { %v1054_v41 = vsel %vm9996_vm2, %v7445_v27, %v1053_v9  ;;  %v1057_v42 = vsel %vm9996_vm2, %v1055_v32, %v1056_v33  ;;  %v1088_v9 = vrot.slane %v9983_v40, 5  ;;  %v1091_v32 = vrot.slane %v313_v10, 5 }
  0x78   : > { %v1082_v40 = vsel %vm9996_vm2, %v7449_v17, %v1081_v2  ;;  %v442_v17 = vshll.u32 %v9953_v28, 16 }
  0x79   : > { %8462 = vmatpush3.bf16.msra.mxu0 %v9389_v35  ;;  %v7446_v35 = vrot.slane %v1001_v24, 9  ;;  %v1084_v24 = vrot.slane %v312_v8, 5  ;;  %v1090_v27 = vrot.slane %v1088_v9, 4  ;;  %v10124_v8 = vrot.slane %v391_v60, 4  ;;  %v9410_v60 = vld [vmem:[%s12234_s1 + $0x118] sm:$0xff]  }
  0x7a   : > { %8463 = vmatprep.subr.bf16.mxu0 %v9390_v38 }
  0x7b   : > { %v1085_v33 = vsel %vm9996_vm2, %v1083_v21, %v1084_v24  ;;  %12269 = vst [vmem:[#allocation16_spill] sm:$0xff] %v10124_v8  ;;  %v463_v24 = vshrl.u32 %v9959_v30, 16 }
  0x7c   : > { %8444 = vmatmul.mubr.bf16.gmra.mrb[12].mxu0 %v7431_v44  ;;  %v9396_v44 = vld [vmem:[%s12234_s1 + $0xd0] sm:$0xff]   ;;  %v7475_v43 = vcombine.low %v1082_v40, %v1085_v33 }
  0x7d   : > { %8447 = vmatprep.mubr.bf16.mxu0 %v7432_v45  ;;  %8464 = vmatpush3.bf16.msra.mxu0 %v9390_v38  ;;  %v1062_v38 = vrot.slane %v1060_v18, 4  ;;  %v1061_v45 = vsel %vm9996_vm2, %v7446_v35, %v1060_v18  ;;  %v1095_v35 = vrot.slane %v10002_v52, 5  ;;  %v9401_v52 = vld [vmem:[%s12234_s1 + $0xf8] sm:$0xff]   ;;  %v10143_v40 = vld [vmem:[%s9880_s26 + $0x10] sm:$0xf] }
  0x7e   : > { %8465 = vmatprep.subr.bf16.mxu0 %v9393_v46 }
  0x81   : > { %8466 = vmatpush3.bf16.msra.mxu0 %v9393_v46  ;;  %v1064_v46 = vsel %vm9996_vm2, %v1062_v38, %v1063_v39  ;;  %v1092_v39 = vsel %vm9996_vm2, %v1090_v27, %v1091_v32  ;;  %v9403_v27 = vld [vmem:[%s9880_s26 + $0x18] sm:$0xff]   ;;  %v7540_v32 = vld [vmem:[%s9880_s26 + $0xc] sm:$0xf] }
  0x82   : > { %8487 = vmatprep.subr.bf16.mxu0 %v9394_v54  ;;  %v7472_v55 = vcombine.low %v1061_v45, %v1064_v46  ;;  %v1097_v46 = vrot.slane %v1095_v35, 4 }
  0x84   : > { %8448 = vmatmul.mubr.bf16.gmra.mrb[16].mxu0 %v7433_v62  ;;  %v1077_v62 = vrot.slane %v311_v51, 5  ;;  %v319_v51 = vshrl.u32 %v9886_v4, 16 }
  0x85   : > { %8467 = vmatprep.mubr.bf16.mxu0 %v7468_v0  ;;  %v1071_v0 = vsel %vm9996_vm2, %v1069_v57, %v1070_v58  ;;  %v346_v57 = vshll.u32 %v9906_v11, 16  ;;  %v367_v58 = vshrl.u32 %v9915_v14, 16  ;;  %v418_v11 = vshll.u32 %v9937_v22, 16 }
  0x86   : > { %v1078_v7 = vsel %vm9996_vm2, %v1076_v61, %v1077_v62  ;;  %v7473_v16 = vcombine.low %v1068_v63, %v1071_v0  ;;  %v394_v61 = vshll.u32 %v9928_v19, 16  ;;  %v415_v62 = vshrl.u32 %v9937_v22, 16  ;;  %v9402_v63 = vld [vmem:[%s9880_s26 + $0xc] sm:$0xff]   ;;  %v10234_v22 = vld [vmem:[%s9880_s26 + $0x40] sm:$0xf] }
  0x87   : > { %v7474_v18 = vcombine.low %v1075_v6, %v1078_v7  ;;  %v10109_v0 = vrot.slane %v319_v51, 4  ;;  %v10119_v6 = vrot.slane %v367_v58, 4  ;;  %v1757_v2 = vshrl.u32 %v10234_v22, 16 }
  0x88   : > { %v10129_v10 = vrot.slane %v415_v62, 4  ;;  %v10185_v62 = vld [vmem:[%s9880_s26 + $0x20] sm:$0x1] }
  0x8a   : > { %12271 = vst [vmem:[#allocation18_spill] sm:$0xff] %v10129_v10 }
  0x8c   : > { %8468 = vmatmul.mubr.bf16.vlgmr.msra.gmra.mrb[0].mxu0 %v7469_v25  ;;  %v9399_v25 = vld [vmem:[%s12234_s1 + $0xe8] sm:$0xff]  }
  0x8d   : > { %8488 = vmatpush3.bf16.msra.mxu0 %v9394_v54  ;;  %8471 = vmatprep.mubr.bf16.mxu0 %v7470_v26  ;;  %v7471_v54 = vcombine.low %v1054_v41, %v1057_v42  ;;  %v7450_v26 = vrot.slane %v1005_v13, 9  ;;  %v314_v41 = vld [vmem:[%s9880_s26 + $0x74] sm:$0x1]  ;;  %v1006_v42 = vld [vmem:[%s9880_s26 + $0x6c] sm:$0xe]  ;;  %v9419_v13 = vld [vmem:[%s12234_s1 + $0x138] sm:$0xff]  }
  0x8e   : > { %8489 = vmatprep.subr.bf16.mxu0 %v9395_v34  ;;  %v7451_v45 = vrot.slane %v1006_v42, 9  ;;  %v1098_v47 = vrot.slane %v314_v41, 5  ;;  %v1651_v41 = vshll.u32 %v7540_v32, 16  ;;  %v10155_v42 = vrot.slane %v463_v24, 4 }
  0x8f   : > { %v1089_v38 = vsel %vm9996_vm2, %v7450_v26, %v1088_v9  ;;  %v10126_v9 = vrot.slane %v394_v61, 5  ;;  %v487_v26 = vshrl.u32 %v9973_v36, 16 }
  0x90   : > { %v1096_v49 = vsel %vm9996_vm2, %v7451_v45, %v1095_v35  ;;  %v1099_v50 = vsel %vm9996_vm2, %v1097_v46, %v1098_v47  ;;  %v490_v35 = vshll.u32 %v9973_v36, 16  ;;  %12275 = vst [vmem:[#allocation22_spill] sm:$0xff] %v10155_v42  ;;  %v1657_v45 = vshll.u32 %v10143_v40, 16  ;;  %v10164_v36 = vld [vmem:[%s9880_s26 + $0x14] sm:$0x1] }
  0x91   : > { %8490 = vmatpush3.bf16.msra.mxu0 %v9395_v34  ;;  %v9400_v34 = vld [vmem:[%s12234_s1 + $0xf0] sm:$0xff]   ;;  %v7477_v4 = vcombine.low %v1096_v49, %v1099_v50  ;;  %12270 = vst [vmem:[#allocation17_spill] sm:$0xff] %v10126_v9  ;;  %v10161_v46 = vrot.slane %v487_v26, 4  ;;  %v1661_v47 = vshrl.u32 %v10143_v40, 16  ;;  %v1653_v53 = vrot.slane %v1651_v41, 5  ;;  %v9411_v41 = vld [vmem:[%s9880_s26 + $0x48] sm:$0xff]  }
  0x92   : > { %8491 = vmatprep.subr.bf16.mxu0 %v9396_v44  ;;  %v10168_v49 = vrot.slane %v490_v35, 5  ;;  %v9408_v50 = vld [vmem:[%s12234_s1 + $0x110] sm:$0xff]   ;;  %v10175_v58 = vrot.slane %v1657_v45, 5  ;;  %v10193_v26 = vld [vmem:[%s9880_s26 + $0x28] sm:$0xf]  ;;  %v1691_v35 = vshll.u32 %v10185_v62, 16 }
  0x93   : > { %12277 = vst [vmem:[#allocation24_spill] sm:$0xff] %v10161_v46  ;;  %v1663_v61 = vrot.slane %v1661_v47, 4  ;;  %v10375_v9 = vld [vmem:[%s9880_s26 + $0x68] sm:$0x1] }
  0x94   : > { %8472 = vmatmul.mubr.bf16.gmra.mrb[4].mxu0 %v7471_v54  ;;  %v9404_v54 = vld [vmem:[%s12234_s1 + $0x100] sm:$0xff]   ;;  %12278 = vst [vmem:[#allocation25_spill] sm:$0xff] %v10168_v49  ;;  %v10246_v19 = vrot.slane %v1691_v35, 5 }
  0x95   : > { %8492 = vmatpush3.bf16.msra.mxu0 %v9396_v44  ;;  %8475 = vmatprep.mubr.bf16.mxu0 %v7472_v55  ;;  %v7476_v44 = vcombine.low %v1089_v38, %v1092_v39  ;;  %v9406_v38 = vld [vmem:[%s9880_s26 + $0x24] sm:$0xff]   ;;  %v1648_v39 = vshrl.u32 %v7540_v32, 16 }
  0x96   : > { %8493 = vmatprep.subr.bf16.mxu0 %v9397_v59 }
  0x97   : > { %v1650_v51 = vrot.slane %v1648_v39, 4 }
  0x99   : > { %8494 = vmatpush3.bf16.msra.mxu0 %v9397_v59  ;;  %v370_v59 = vshll.u32 %v9915_v14, 16  ;;  %v10117_v14 = vrot.slane %v346_v57, 5  ;;  %v9409_v57 = vld [vmem:[%s9880_s26 + $0x3c] sm:$0xff]  }
  0x9a   : > { %8495 = vmatprep.subr.bf16.mxu0 %v9398_v3 }
  0x9b   : > { %v10122_v7 = vrot.slane %v370_v59, 5  ;;  %v10179_v59 = vld [vmem:[%s9880_s26 + $0x1c] sm:$0xf] }
  0x9c   : > { %8476 = vmatmul.mubr.bf16.gmra.mrb[8].mxu0 %v7473_v16  ;;  %v439_v16 = vshrl.u32 %v9953_v28, 16 }
  0x9d   : > { %8496 = vmatpush3.bf16.msra.mxu0 %v9398_v3  ;;  %8479 = vmatprep.mubr.bf16.mxu0 %v7474_v18  ;;  %v10115_v3 = vrot.slane %v343_v56, 4  ;;  %12268 = vst [vmem:[#allocation15_spill] sm:$0xff] %v10122_v7  ;;  %v10134_v18 = vrot.slane %v418_v11, 5  ;;  %v9407_v56 = vld [vmem:[%s9880_s26 + $0x30] sm:$0xff]  }
  0x9e   : > { %8497 = vmatprep.subr.bf16.mxu0 %v9399_v25  ;;  %v10145_v33 = vrot.slane %v439_v16, 4  ;;  %v1681_v16 = vshll.u32 %v10179_v59, 16 }
  0x9f   : > { %12272 = vst [vmem:[#allocation19_spill] sm:$0xff] %v10134_v18 }
  0xa0   : > { %12273 = vst [vmem:[#allocation20_spill] sm:$0xff] %v10145_v33  ;;  %v10321_v33 = vld [vmem:[%s9880_s26 + $0x64] sm:$0xf] }
  0xa1   : > { %8498 = vmatpush3.bf16.msra.mxu0 %v9399_v25  ;;  %v466_v25 = vshll.u32 %v9959_v30, 16  ;;  %v9405_v30 = vld [vmem:[%s12234_s1 + $0x108] sm:$0xff]  }
  0xa2   : > { %8499 = vmatprep.subr.bf16.mxu0 %v9400_v34 }
  0xa4   : > { %8480 = vmatmul.mubr.bf16.gmra.mrb[12].mxu0 %v7475_v43  ;;  %v10157_v43 = vrot.slane %v466_v25, 5  ;;  %v1685_v25 = vshrl.u32 %v10179_v59, 16 }
  0xa5   : > { %8483 = vmatprep.mubr.bf16.mxu0 %v7476_v44  ;;  %8500 = vmatpush3.bf16.msra.mxu0 %v9400_v34  ;;  %v10147_v34 = vrot.slane %v442_v17, 5  ;;  %v7546_v17 = vld [vmem:[%s9880_s26 + $0x24] sm:$0xf] }
  0xa6   : > { %8501 = vmatprep.subr.bf16.mxu0 %v9401_v52  ;;  %12276 = vst [vmem:[#allocation23_spill] sm:$0xff] %v10157_v43  ;;  %v1699_v39 = vshll.u32 %v7546_v17, 16 }
  0xa7   : > { %12274 = vst [vmem:[#allocation21_spill] sm:$0xff] %v10147_v34 }
  0xa9   : > { %8502 = vmatpush3.bf16.msra.mxu0 %v9401_v52  ;;  %v7543_v52 = vld [vmem:[%s9880_s26 + $0x18] sm:$0xf] }
  0xaa   : > { %8523 = vmatprep.subr.bf16.mxu0 %v9404_v54  ;;  %v1675_v11 = vshll.u32 %v7543_v52, 16 }
  0xac   : > { %8484 = vmatmul.mubr.bf16.gmra.mrb[16].mxu0 %v7477_v4  ;;  %v1672_v4 = vshrl.u32 %v7543_v52, 16  ;;  %v1677_v47 = vrot.slane %v1675_v11, 5  ;;  %v10203_v52 = vrot.slane %v1681_v16, 5  ;;  %v1709_v16 = vshrl.u32 %v10193_v26, 16 }
  0xad   : > { %8503 = vmatprep.mubr.bf16.mxu0 %v9402_v63  ;;  %v1654_v63 = vor.u32 %v1653_v53, %v1650_v51  ;;  %v1705_v51 = vshll.u32 %v10193_v26, 16  ;;  %v9413_v53 = vld [vmem:[%s9880_s26 + $0x54] sm:$0xff]  }
  0xae   : > { %v1674_v32 = vrot.slane %v1672_v4, 4  ;;  %v1711_v28 = vrot.slane %v1709_v16, 4 }
  0xaf   : > { %v10201_v45 = vrot.slane %v1654_v63, 4  ;;  %v1701_v63 = vrot.slane %v1699_v39, 5  ;;  %v10216_v11 = vrot.slane %v1705_v51, 5  ;;  %v9417_v39 = vld [vmem:[%s9880_s26 + $0x6c] sm:$0xff]  }
  0xb0   : > { %v1678_v51 = vor.u32 %v1677_v47, %v1674_v32 }
  0xb1   : > { %v1660_v55 = vsel %vm10238_vm5, %v10201_v45, %v10175_v58  ;;  %v9418_v45 = vld [vmem:[%s9880_s26 + $0x78] sm:$0xff]  }
  0xb4   : > { %8504 = vmatmul.mubr.bf16.vlgmr.msra.gmra.mrb[0].mxu0 %v9403_v27  ;;  %v9412_v27 = vld [vmem:[%s12234_s1 + $0x120] sm:$0xff]  }
  0xb5   : > { %8524 = vmatpush3.bf16.msra.mxu0 %v9404_v54  ;;  %8507 = vmatprep.mubr.bf16.mxu0 %v9406_v38  ;;  %v1667_v54 = vshll.u32 %v10164_v36, 16  ;;  %v1696_v38 = vshrl.u32 %v7546_v17, 16 }
  0xb6   : > { %8525 = vmatprep.subr.bf16.mxu0 %v9405_v30 }
  0xb7   : > { %v10189_v24 = vrot.slane %v1667_v54, 5  ;;  %v1698_v4 = vrot.slane %v1696_v38, 4  ;;  %v9414_v38 = vld [vmem:[%s9880_s26 + $0x60] sm:$0xff]  }
  0xb9   : > { %8526 = vmatpush3.bf16.msra.mxu0 %v9405_v30  ;;  %v1664_v30 = vor.u32 %v1663_v61, %v10175_v58  ;;  %v1687_v61 = vrot.slane %v1685_v25, 4  ;;  %v7552_v25 = vld [vmem:[%s9880_s26 + $0x3c] sm:$0xf]  ;;  %v10267_v58 = vld [vmem:[%s9880_s26 + $0x44] sm:$0x1] }
  0xba   : > { %8527 = vmatprep.subr.bf16.mxu0 %v9408_v50  ;;  %v1747_v16 = vshll.u32 %v7552_v25, 16  ;;  %v1763_v42 = vshll.u32 %v10267_v58, 16 }
  0xbb   : > { %v10214_v54 = vrot.slane %v1664_v30, 4  ;;  %v10224_v30 = vld [vmem:[%s9880_s26 + $0x34] sm:$0xf] }
  0xbc   : > { %8508 = vmatmul.mubr.bf16.gmra.mrb[4].mxu0 %v9407_v56  ;;  %v9415_v56 = vld [vmem:[%s12234_s1 + $0x128] sm:$0xff]   ;;  %v1729_v32 = vshll.u32 %v10224_v30, 16  ;;  %v1733_v47 = vshrl.u32 %v10224_v30, 16 }
  0xbd   : > { %8528 = vmatpush3.bf16.msra.mxu0 %v9408_v50  ;;  %8511 = vmatprep.mubr.bf16.mxu0 %v9409_v57  ;;  %v10208_v50 = vld [vmem:[%s9880_s26 + $0x2c] sm:$0x1]  ;;  %v7549_v57 = vld [vmem:[%s9880_s26 + $0x30] sm:$0xf] }
  0xbe   : > { %8529 = vmatprep.subr.bf16.mxu0 %v9410_v60  ;;  %v1715_v17 = vshll.u32 %v10208_v50, 16  ;;  %v1720_v44 = vshrl.u32 %v7549_v57, 16  ;;  %v1723_v21 = vshll.u32 %v7549_v57, 16  ;;  %v1744_v57 = vshrl.u32 %v7552_v25, 16  ;;  %v10261_v25 = vld [vmem:[%s9880_s26 + $0x38] sm:$0x1] }
  0xbf   : > { %v10264_v49 = vrot.slane %v1729_v32, 5  ;;  %v1735_v46 = vrot.slane %v1733_v47, 4  ;;  %v1739_v43 = vshll.u32 %v10261_v25, 16 }
  0xc0   : > { %v10258_v35 = vrot.slane %v1715_v17, 5  ;;  %v1725_v37 = vrot.slane %v1723_v21, 5  ;;  %v1712_v17 = vor.u32 %v1711_v28, %v10216_v11  ;;  %v10277_v21 = vld [vmem:[%s9880_s26 + $0x4c] sm:$0xf] }
  0xc1   : > { %8530 = vmatpush3.bf16.msra.mxu0 %v9410_v60  ;;  %v9416_v60 = vld [vmem:[%s12234_s1 + $0x130] sm:$0xff]  }
  0xc2   : > { %8531 = vmatprep.subr.bf16.mxu0 %v9412_v27 }
  0xc4   : > { %8512 = vmatmul.mubr.bf16.gmra.mrb[8].mxu0 %v9411_v41  ;;  %v1688_v41 = vor.u32 %v1687_v61, %v10203_v52  ;;  %v10244_v61 = vrot.slane %v1678_v51, 4  ;;  %v7555_v51 = vld [vmem:[%s9880_s26 + $0x48] sm:$0xf] }
  0xc5   : > { %8532 = vmatpush3.bf16.msra.mxu0 %v9412_v27  ;;  %8515 = vmatprep.mubr.bf16.mxu0 %v9413_v53  ;;  %v1702_v53 = vor.u32 %v1701_v63, %v1698_v4  ;;  %v1670_v4 = vsel %vm10238_vm5, %v10214_v54, %v10189_v24  ;;  %v10273_v24 = vld [vmem:[%s12234_s1 + $0x140] sm:$0xff]   ;;  %v1768_v32 = vshrl.u32 %v7555_v51, 16  ;;  %v1771_v47 = vshll.u32 %v7555_v51, 16 }
  0xc6   : > { %8533 = vmatprep.subr.bf16.mxu0 %v9415_v56  ;;  %v1689_v63 = vrot.slane %v1688_v41, 4  ;;  %v1759_v41 = vrot.slane %v1757_v2, 4  ;;  %v7586_v31 = vcombine.low %v1660_v55, %v1670_v4  ;;  %v1684_v28 = vsel %vm10238_vm5, %v10244_v61, %v10203_v52  ;;  %v10293_v55 = vld [vmem:[%s9880_s26 + $0x58] sm:$0xf] }
  0xc7   : > { %v1703_v54 = vrot.slane %v1702_v53, 4  ;;  %v1781_v4 = vshrl.u32 %v10277_v21, 16  ;;  %v1795_v51 = vshll.u32 %v7558_v29, 16 }
  0xc8   : > { %v1694_v53 = vsel %vm10238_vm5, %v1689_v63, %v10246_v19  ;;  %v1770_v19 = vrot.slane %v1768_v32, 4  ;;  %v1792_v63 = vshrl.u32 %v7558_v29, 16  ;;  %v10313_v29 = vld [vmem:[%s9880_s26 + $0x5c] sm:$0x1] }
  0xc9   : > { %8534 = vmatpush3.bf16.msra.mxu0 %v9415_v56  ;;  %v1753_v56 = vshll.u32 %v10234_v22, 16  ;;  %v1708_v52 = vsel %vm10238_vm5, %v1703_v54, %v10216_v11  ;;  %v1741_v11 = vrot.slane %v1739_v43, 5  ;;  %v1765_v54 = vrot.slane %v1763_v42, 5  ;;  %v7561_v43 = vld [vmem:[%s9880_s26 + $0x60] sm:$0xf] }
  0xca   : > { %8535 = vmatprep.subr.bf16.mxu0 %v9416_v60  ;;  %v7587_v34 = vcombine.low %v1684_v28, %v1694_v53  ;;  %v7564_v28 = vld [vmem:[%s9880_s26 + $0x6c] sm:$0xf] }
  0xcb   : > { %v9421_v53 = vld [vmem:[%s12234_s1 + $0x148] sm:$0xff]  }
  0xcc   : > { %8516 = vmatmul.mubr.bf16.gmra.mrb[12].mxu0 %v9414_v38  ;;  %v1722_v38 = vrot.slane %v1720_v44, 4  ;;  %v1749_v44 = vrot.slane %v1747_v16, 5  ;;  %v1713_v16 = vrot.slane %v1712_v17, 4  ;;  %v1805_v17 = vshrl.u32 %v10293_v55, 16 }
  0xcd   : > { %8519 = vmatprep.mubr.bf16.mxu0 %v9417_v39  ;;  %8536 = vmatpush3.bf16.msra.mxu0 %v9416_v60  ;;  %v1746_v39 = vrot.slane %v1744_v57, 4  ;;  %v10279_v60 = vrot.slane %v1753_v56, 5  ;;  %v1736_v57 = vor.u32 %v1735_v46, %v10264_v49  ;;  %v10303_v46 = vld [vmem:[%s9880_s26 + $0x50] sm:$0x1] }
  0xce   : > { %8537 = vmatprep.subr.bf16.mxu0 %v9419_v13  ;;  %v1726_v2 = vor.u32 %v1725_v37, %v1722_v38  ;;  %v1773_v37 = vrot.slane %v1771_v47, 5  ;;  %v1801_v38 = vshll.u32 %v10293_v55, 16  ;;  %v1783_v47 = vrot.slane %v1781_v4, 4 }
  0xcf   : > { %v1750_v56 = vor.u32 %v1749_v44, %v1746_v39  ;;  %v1760_v61 = vor.u32 %v1759_v41, %v10279_v60  ;;  %v1737_v44 = vrot.slane %v1736_v57, 4  ;;  %v1718_v41 = vsel %vm10238_vm5, %v1713_v16, %v10258_v35 }
  0xd0   : > { %v1727_v39 = vrot.slane %v1726_v2, 4  ;;  %v1774_v57 = vor.u32 %v1773_v37, %v1770_v19  ;;  %v1787_v42 = vshll.u32 %v10303_v46, 16  ;;  %v1794_v35 = vrot.slane %v1792_v63, 4  ;;  %v10340_v63 = vld [vmem:[%s9880_s26 + $0x70] sm:$0xf] }
  0xd1   : > { %8538 = vmatpush3.bf16.msra.mxu0 %v9419_v13  ;;  %v1777_v13 = vshll.u32 %v10277_v21, 16  ;;  %v1761_v2 = vrot.slane %v1760_v61, 4  ;;  %v1797_v16 = vrot.slane %v1795_v51, 5  ;;  %v7588_v4 = vcombine.low %v1708_v52, %v1718_v41 }
  0xd2   : > { %8559 = vmatprep.subr.bf16.mxu0 %v10273_v24  ;;  %v1732_v23 = vsel %vm10238_vm5, %v1727_v39, %v10264_v49  ;;  %v1742_v61 = vsel %vm10238_vm5, %v1737_v44, %v1741_v11  ;;  %v1811_v52 = vshll.u32 %v10313_v29, 16  ;;  %v10344_v51 = vrot.slane %v1787_v42, 5  ;;  %v9457_v39 = vld [vmem:[%s12234_s1 + $0x48] sm:$0xff]  }
  0xd3   : > { %v10310_v32 = vrot.slane %v1777_v13, 5  ;;  %v1807_v13 = vrot.slane %v1805_v17, 4  ;;  %v1766_v49 = vsel %vm10238_vm5, %v1761_v2, %v1765_v54  ;;  %v1819_v17 = vshll.u32 %v7561_v43, 16  ;;  %v9459_v2 = vld [vmem:[%s12234_s1 + $0x50] sm:$0xff]  }
  0xd4   : > { %8520 = vmatmul.mubr.bf16.gmra.mrb[16].mxu0 %v9418_v45  ;;  %v1751_v45 = vrot.slane %v1750_v56, 4  ;;  %v10323_v56 = vrot.slane %v1801_v38, 5  ;;  %v1816_v38 = vshrl.u32 %v7561_v43, 16  ;;  %v10352_v44 = vrot.slane %v1774_v57, 4 }
  0xd5   : > { %8539 = vmatprep.mubr.bf16.mxu0 %v7586_v31  ;;  %v9456_v31 = vld [vmem:[%s12234_s1 + $0x40] sm:$0xff]   ;;  %v1784_v37 = vor.u32 %v1783_v47, %v10310_v32  ;;  %v1798_v11 = vor.u32 %v1797_v16, %v1794_v35  ;;  %v1825_v54 = vshll.u32 %v10321_v33, 16  ;;  %v1840_v47 = vshrl.u32 %v7564_v28, 16 }
  0xd6   : > { %8379 = vmatprep.subr.bf16.mxu1 %v9456_v31  ;;  %v1756_v19 = vsel %vm10238_vm5, %v1751_v45, %v10279_v60  ;;  %v9422_v60 = vld [vmem:[%s12234_s1 + $0x150] sm:$0xff]   ;;  %v1808_v41 = vor.u32 %v1807_v13, %v10323_v56  ;;  %v1829_v45 = vshrl.u32 %v10321_v33, 16  ;;  %v10364_v42 = vrot.slane %v1811_v52, 5 }
  0xd7   : > { %8380 = vmatpush3.bf16.msra.mxu1 %v9456_v31  ;;  %v1843_v31 = vshll.u32 %v7564_v28, 16  ;;  %v10362_v57 = vrot.slane %v1784_v37, 4  ;;  %v1849_v43 = vshll.u32 %v10340_v63, 16  ;;  %v7589_v35 = vcombine.low %v1732_v23, %v1742_v61  ;;  %v10369_v28 = vld [vmem:[%s9880_s26 + $0x7c] sm:$0xf] }
  0xd8   : > { %8381 = vmatprep.subr.bf16.mxu1 %v9457_v39  ;;  %v7590_v16 = vcombine.low %v1756_v19, %v1766_v49  ;;  %v1818_v13 = vrot.slane %v1816_v38, 4  ;;  %v9423_v37 = vld [vmem:[%s12234_s1 + $0x158] sm:$0xff]   ;;  %v1799_v52 = vrot.slane %v1798_v11, 4  ;;  %v1809_v18 = vrot.slane %v1808_v41, 4  ;;  %v10380_v38 = vld [vmem:[%s9880_s26 + $0x74] sm:$0x1] }
  0xd9   : > { %v10377_v23 = vrot.slane %v1825_v54, 5  ;;  %v1831_v61 = vrot.slane %v1829_v45, 4  ;;  %v1842_v19 = vrot.slane %v1840_v47, 4  ;;  %v1845_v49 = vrot.slane %v1843_v31, 5  ;;  %v9461_v31 = vld [vmem:[%s12234_s1 + $0x58] sm:$0xff]  }
  0xda   : > { %v1873_v11 = vshll.u32 %v10369_v28, 16  ;;  %v1877_v41 = vshrl.u32 %v10369_v28, 16  ;;  %v1780_v54 = vsel %vm10238_vm5, %v10352_v44, %v10310_v32  ;;  %v1790_v45 = vsel %vm10238_vm5, %v10362_v57, %v10344_v51  ;;  %v9424_v51 = vld [vmem:[%s12234_s1 + $0x160] sm:$0xff]  }
  0xdb   : > { %8382 = vmatpush3.bf16.msra.mxu1 %v9457_v39  ;;  %v1814_v44 = vsel %vm10238_vm5, %v1809_v18, %v10364_v42  ;;  %v1859_v57 = vshll.u32 %v10380_v38, 16  ;;  %v10421_v18 = vld [vmem:[%s9880_s26 + $0x64] sm:$0xf]  ;;  %v7604_v42 = vld [vmem:[%s9880_s26 + $0xc] sm:$0xe] }
  0xdc   : > { %8540 = vmatmul.mubr.bf16.vlgmr.msra.gmra.mrb[0].mxu0 %v7587_v34  ;;  %v7567_v34 = vld [vmem:[%s9880_s26 + $0x78] sm:$0xf]  ;;  %8383 = vmatprep.subr.bf16.mxu1 %v9459_v2  ;;  %12281 = vst [vmem:[#allocation26_spill] sm:$0xff] %v10421_v18  ;;  %v2167_v18 = vrot.slane %v10143_v40, 5  ;;  %v9426_v40 = vld [vmem:[%s12234_s1 + $0x170] sm:$0xff]  }
  0xdd   : > { %8560 = vmatpush3.bf16.msra.mxu0 %v10273_v24  ;;  %8543 = vmatprep.mubr.bf16.mxu0 %v7588_v4  ;;  %v1853_v24 = vshrl.u32 %v10340_v63, 16  ;;  %v1821_v4 = vrot.slane %v1819_v17, 5  ;;  %v1864_v10 = vshrl.u32 %v7567_v34, 16  ;;  %v1867_v20 = vshll.u32 %v7567_v34, 16  ;;  %v10387_v34 = vld [vmem:[%s9880_s26 + $0x60] sm:$0xf] }
  0xde   : > { %8561 = vmatprep.subr.bf16.mxu0 %v9421_v53  ;;  %v10382_v17 = vrot.slane %v1849_v43, 5  ;;  %v1804_v43 = vsel %vm10238_vm5, %v1799_v52, %v10323_v56  ;;  %v1846_v56 = vor.u32 %v1845_v49, %v1842_v19  ;;  %v7591_v19 = vcombine.low %v1780_v54, %v1790_v45  ;;  %v9425_v52 = vld [vmem:[%s12234_s1 + $0x168] sm:$0xff]  }
  0xdf   : > { %v1855_v39 = vrot.slane %v1853_v24, 4  ;;  %v1822_v47 = vor.u32 %v1821_v4, %v1818_v13  ;;  %8384 = vmatpush3.bf16.msra.mxu1 %v9459_v2  ;;  %v1835_v24 = vshll.u32 %v10375_v9, 16  ;;  %v1866_v8 = vrot.slane %v1864_v10, 4  ;;  %v10425_v13 = vld [vmem:[%s9880_s26 + $0x6c] sm:$0xf] }
  0xe0   : > { %v1869_v32 = vrot.slane %v1867_v20, 5  ;;  %v1832_v2 = vor.u32 %v1831_v61, %v10377_v23  ;;  %v9463_v20 = vld [vmem:[%s12234_s1 + $0x60] sm:$0xff]   ;;  %8385 = vmatprep.subr.bf16.mxu1 %v9461_v31  ;;  %v535_v4 = vshrl.u32 %v10425_v13, 16  ;;  %v7592_v49 = vcombine.low %v1804_v43, %v1814_v44 }
  0xe1   : > { %8562 = vmatpush3.bf16.msra.mxu0 %v9421_v53  ;;  %v511_v53 = vshrl.u32 %v10387_v34, 16  ;;  %v1856_v10 = vor.u32 %v1855_v39, %v10382_v17  ;;  %v10430_v61 = vld [vmem:[%s9880_s26 + $0x80] sm:$0x1]  ;;  %v1823_v39 = vrot.slane %v1822_v47, 4  ;;  %v1847_v15 = vrot.slane %v1846_v56, 4 }
  0xe2   : > { %8563 = vmatprep.subr.bf16.mxu0 %v9422_v60  ;;  %v1883_v45 = vshll.u32 %v10430_v61, 16  ;;  %v2174_v47 = vrot.slane %v10179_v59, 5  ;;  %v7606_v56 = vld [vmem:[%s9880_s26 + $0x24] sm:$0xe] }
  0xe3   : > { %8386 = vmatpush3.bf16.msra.mxu1 %v9461_v31  ;;  %v1857_v7 = vrot.slane %v1856_v10, 4  ;;  %v1861_v31 = vrot.slane %v1859_v57, 5  ;;  %v1852_v59 = vsel %vm10238_vm5, %v1847_v15, %v10382_v17  ;;  %v9466_v10 = vld [vmem:[%s12234_s1 + $0x70] sm:$0xff]  }
  0xe4   : > { %8544 = vmatmul.mubr.bf16.gmra.mrb[4].mxu0 %v7589_v35  ;;  %v1879_v35 = vrot.slane %v1877_v41, 4  ;;  %8387 = vmatprep.subr.bf16.mxu1 %v9463_v20  ;;  %v1833_v41 = vrot.slane %v1832_v2, 4  ;;  %v2169_v2 = vrot.slane %v2167_v18, 4  ;;  %v1885_v57 = vrot.slane %v1883_v45, 5 }
  0xe5   : > { %8564 = vmatpush3.bf16.msra.mxu0 %v9422_v60  ;;  %8547 = vmatprep.mubr.bf16.mxu0 %v7590_v16  ;;  %v10417_v60 = vrot.slane %v1873_v11, 5  ;;  %v514_v16 = vshll.u32 %v10387_v34, 16  ;;  %v1870_v11 = vor.u32 %v1869_v32, %v1866_v8  ;;  %v1837_v34 = vrot.slane %v1835_v24, 5 }
  0xe6   : > { %8565 = vmatprep.subr.bf16.mxu0 %v9423_v37  ;;  %v10439_v8 = vrot.slane %v511_v53, 4  ;;  %v7614_v24 = vrot.slane %v7604_v42, 9  ;;  %v2170_v32 = vrot.slane %v10164_v36, 5  ;;  %v1828_v53 = vsel %vm10238_vm5, %v1823_v39, %v10377_v23  ;;  %v9465_v36 = vld [vmem:[%s12234_s1 + $0x68] sm:$0xff]  }
  0xe7   : > { %v1880_v54 = vor.u32 %v1879_v35, %v10417_v60  ;;  %8388 = vmatpush3.bf16.msra.mxu1 %v9463_v20  ;;  %v1871_v43 = vrot.slane %v1870_v11, 4  ;;  %v1838_v44 = vsel %vm10238_vm5, %v1833_v41, %v1837_v34  ;;  %v2181_v20 = vrot.slane %v10193_v26, 5  ;;  %v7607_v26 = vld [vmem:[%s9880_s26 + $0x30] sm:$0xe] }
  0xe8   : > { %v10465_v15 = vrot.slane %v514_v16, 5  ;;  %v2176_v35 = vrot.slane %v2174_v47, 4  ;;  %v2177_v42 = vrot.slane %v10185_v62, 5  ;;  %8389 = vmatprep.subr.bf16.mxu1 %v9465_v36  ;;  %v10474_v39 = vsel %vm9996_vm2, %v7614_v24, %v2167_v18 }
  0xe9   : > { %8566 = vmatpush3.bf16.msra.mxu0 %v9423_v37  ;;  %v7605_v37 = vld [vmem:[%s9880_s26 + $0x18] sm:$0xe]  ;;  %v1881_v23 = vrot.slane %v1880_v54, 4  ;;  %v2188_v11 = vrot.slane %v10224_v30, 5  ;;  %v10478_v16 = vrot.slane %v535_v4, 4  ;;  %v1876_v62 = vsel %vm10238_vm5, %v1871_v43, %v10417_v60 }
  0xea   : > { %8567 = vmatprep.subr.bf16.mxu0 %v9424_v51  ;;  %v7615_v17 = vrot.slane %v7605_v37, 9  ;;  %v10485_v34 = vsel %vm9996_vm2, %v2169_v2, %v2170_v32  ;;  %v9427_v30 = vld [vmem:[%s12234_s1 + $0x178] sm:$0xff]   ;;  %v7616_v4 = vrot.slane %v7606_v56, 9  ;;  %v10500_v45 = vsel %vm9996_vm2, %v2176_v35, %v2177_v42  ;;  %v7609_v56 = vld [vmem:[%s9880_s26 + $0x48] sm:$0xe] }
  0xeb   : > { %8390 = vmatpush3.bf16.msra.mxu1 %v9465_v36  ;;  %v1886_v18 = vsel %vm10238_vm5, %v1881_v23, %v1885_v57  ;;  %v7608_v54 = vld [vmem:[%s9880_s26 + $0x3c] sm:$0xe]  ;;  %v7617_v37 = vrot.slane %v7607_v26, 9  ;;  %v2195_v43 = vrot.slane %v10234_v22, 5  ;;  %v12282_v24 = vshll.u32 %v10425_v13, 16  ;;  %v10517_v13 = vld [vmem:[%s12234_s1 + $0x180] sm:$0xff]  }
  0xec   : > { %8548 = vmatmul.mubr.bf16.gmra.mrb[8].mxu0 %v7591_v19  ;;  %v10469_v19 = vld [vmem:[%s9880_s26 + $0x70] sm:$0xf]  ;;  %8391 = vmatprep.subr.bf16.mxu1 %v9466_v10  ;;  %v10496_v60 = vsel %vm9996_vm2, %v7615_v17, %v2174_v47  ;;  %v9468_v47 = vld [vmem:[%s12234_s1 + $0x78] sm:$0xff]   ;;  %v7595_v2 = vcombine.low %v1876_v62, %v1886_v18  ;;  %v7640_v22 = vcombine.low %v10474_v39, %v10485_v34  ;;  %v7610_v23 = vld [vmem:[%s9880_s26 + $0x54] sm:$0xe]  ;;  %v2198_v17 = vrot.slane %v10267_v58, 5 }
  0xed   : > { %8568 = vmatpush3.bf16.msra.mxu0 %v9424_v51  ;;  %8551 = vmatprep.mubr.bf16.mxu0 %v7592_v49  ;;  %v1862_v51 = vsel %vm10238_vm5, %v1857_v7, %v1861_v31  ;;  %v7593_v7 = vcombine.low %v1828_v53, %v1838_v44  ;;  %v2184_v31 = vrot.slane %v10208_v50, 5  ;;  %v10505_v32 = vrot.slane %v12282_v24, 5  ;;  %v9570_v44 = vld [vmem:[%s9880_s26 + $0x4] sm:$0xf]  ;;  %v10556_v62 = vld [vmem:[%s9880_s26 + $0x6c] sm:$0xe] }
  0xee   : > { %8569 = vmatprep.subr.bf16.mxu0 %v9425_v52  ;;  %v7594_v41 = vcombine.low %v1852_v59, %v1862_v51  ;;  %v2190_v53 = vrot.slane %v2188_v11, 4  ;;  %v2191_v50 = vrot.slane %v10261_v25, 5  ;;  %v328_v59 = vshll.u32 %v9570_v44, 16  ;;  %v9571_v18 = vld [vmem:[%s9880_s26 + $0x8] sm:$0x1]  ;;  %v9431_v49 = vld [vmem:[%s12234_s1 + $0x198] sm:$0xff]  }
  0xef   : > { %8392 = vmatpush3.bf16.msra.mxu1 %v9466_v10  ;;  %v7618_v25 = vrot.slane %v7608_v54, 9  ;;  %v7641_v36 = vcombine.low %v10496_v60, %v10500_v45  ;;  %v10524_v51 = vsel %vm9996_vm2, %v7616_v4, %v2181_v20  ;;  %v10533_v57 = vsel %vm9996_vm2, %v7617_v37, %v2188_v11  ;;  %v9572_v44 = vld [vmem:[%s9880_s26 + $0x10] sm:$0xf]  ;;  %v10641_v45 = vld [vmem:[%s9880_s26 + $0x1c] sm:$0xf] }
  0xf0   : > { %8393 = vmatprep.subr.bf16.mxu1 %v9468_v47  ;;  %v2197_v10 = vrot.slane %v2195_v43, 4  ;;  %v2202_v35 = vrot.slane %v10277_v21, 5  ;;  %v2209_v42 = vrot.slane %v10293_v55, 5  ;;  %v330_v39 = vrot.slane %v328_v59, 5 }
  0xf1   : > { %8570 = vmatpush3.bf16.msra.mxu0 %v9425_v52  ;;  %v2183_v52 = vrot.slane %v2181_v20, 4  ;;  %v10539_v20 = vsel %vm9996_vm2, %v2190_v53, %v2191_v50  ;;  %v10548_v58 = vsel %vm9996_vm2, %v7618_v25, %v2195_v43  ;;  %v7619_v21 = vrot.slane %v7609_v56, 9 }
  0xf2   : > { %8571 = vmatprep.subr.bf16.mxu0 %v9426_v40  ;;  %v2205_v11 = vrot.slane %v10303_v46, 5  ;;  %v7620_v55 = vrot.slane %v7610_v23, 9  ;;  %v7643_v4 = vcombine.low %v10533_v57, %v10539_v20  ;;  %v349_v54 = vor.u32 %v10117_v14, %v10115_v3  ;;  %v9432_v57 = vld [vmem:[%s12234_s1 + $0x1a0] sm:$0xff]  }
  0xf3   : > { %8394 = vmatpush3.bf16.msra.mxu1 %v9468_v47  ;;  %v2211_v37 = vrot.slane %v2209_v42, 4  ;;  %v2216_v50 = vrot.slane %v10321_v33, 5  ;;  %v352_v59 = vshll.u32 %v9572_v44, 16  ;;  %v12284_v3 = vshrl.u32 %v9909_v12, 16  ;;  %v7712_v44 = vld [vmem:[%s9880_s26 + $0x18] sm:$0xf] }
  0xf4   : > { %8552 = vmatmul.mubr.bf16.gmra.mrb[12].mxu0 %v7593_v7  ;;  %v325_v7 = vor.u32 %v10111_v1, %v10109_v0  ;;  %v12283_v1 = vshrl.u32 %v9889_v5, 16  ;;  %v2212_v5 = vrot.slane %v10313_v29, 5  ;;  %v350_v56 = vrot.slane %v349_v54, 4  ;;  %v10691_v33 = vld [vmem:[%s9880_s26 + $0x28] sm:$0xf] }
  0xf5   : > { %8555 = vmatprep.mubr.bf16.mxu0 %v7594_v41  ;;  %8572 = vmatpush3.bf16.msra.mxu0 %v9426_v40  ;;  %v10528_v40 = vsel %vm9996_vm2, %v2183_v52, %v2184_v31  ;;  %v10552_v41 = vld [vmem:[%s9880_s26 + $0x60] sm:$0xe]  ;;  %v10565_v52 = vsel %vm9996_vm2, %v2197_v10, %v2198_v17  ;;  %v2204_v31 = vrot.slane %v2202_v35, 4  ;;  %v358_v14 = vrot.slane %v12284_v3, 4  ;;  %v10582_v17 = vld [vmem:[%s9880_s26 + $0x78] sm:$0xe] }
  0xf6   : > { %8573 = vmatprep.subr.bf16.mxu0 %v9427_v30  ;;  %v7642_v26 = vcombine.low %v10524_v51, %v10528_v40  ;;  %v326_v0 = vrot.slane %v325_v7, 4  ;;  %v334_v34 = vrot.slane %v12283_v1, 4  ;;  %v7621_v53 = vrot.slane %v10552_v41, 9  ;;  %v12288_v40 = vld [vmem:[#allocation16_spill] sm:$0xff] }
  0xf7   : > { %v2219_v23 = vrot.slane %v10375_v9, 5  ;;  %v2223_v10 = vrot.slane %v10340_v63, 5  ;;  %v354_v7 = vrot.slane %v352_v59, 5  ;;  %v10589_v12 = vsel %vm9996_vm2, %v7619_v21, %v2202_v35  ;;  %v12285_v59 = vld [vmem:[#allocation15_spill] sm:$0xff] }
  0xf8   : > { %v335_v43 = vor.u32 %v334_v34, %v330_v39  ;;  %v331_v47 = vsel %vm10238_vm5, %v326_v0, %v330_v39  ;;  %v9429_v39 = vld [vmem:[%s12234_s1 + $0x188] sm:$0xff]   ;;  %v2230_v0 = vrot.slane %v10369_v28, 5  ;;  %v10602_v35 = vrot.slane %v2216_v50, 4 }
  0xf9   : > { %8574 = vmatpush3.bf16.msra.mxu0 %v9427_v30  ;;  %v338_v30 = vshll.u32 %v9571_v18, 16  ;;  %v7644_v18 = vcombine.low %v10548_v58, %v10565_v52  ;;  %v2226_v21 = vrot.slane %v10380_v38, 5  ;;  %v10638_v60 = vsel %vm9996_vm2, %v2204_v31, %v2205_v11 }
  0xfa   : > { %8595 = vmatprep.subr.bf16.mxu0 %v10517_v13  ;;  %v336_v25 = vrot.slane %v335_v43, 4  ;;  %v359_v43 = vor.u32 %v358_v14, %v354_v7  ;;  %v10653_v31 = vsel %vm9996_vm2, %v2211_v37, %v2212_v5  ;;  %v7645_v37 = vcombine.low %v10589_v12, %v10638_v60 }
  0xfb   : > { %v340_v24 = vrot.slane %v338_v30, 5  ;;  %v10598_v30 = vsel %vm9996_vm2, %v7620_v55, %v2209_v42  ;;  %v9574_v42 = vld [vmem:[%s9880_s26 + $0x1c] sm:$0xf]  ;;  %v2792_v5 = vshll.u32 %v10641_v45, 16  ;;  %v10678_v12 = vsel %vm9996_vm2, %v7621_v53, %v2216_v50 }
  0xfc   : > { %8556 = vmatmul.mubr.bf16.gmra.mrb[16].mxu0 %v7595_v2  ;;  %v9573_v2 = vld [vmem:[%s9880_s26 + $0x14] sm:$0x1]  ;;  %v360_v3 = vrot.slane %v359_v43, 4  ;;  %v376_v55 = vshll.u32 %v9574_v42, 16  ;;  %v10724_v63 = vsel %vm9996_vm2, %v10602_v35, %v2219_v23 }
  0xfd   : > { %8575 = vmatprep.mubr.bf16.mxu0 %v7640_v22  ;;  %v362_v29 = vshll.u32 %v9573_v2, 16  ;;  %v7622_v22 = vrot.slane %v10556_v62, 9  ;;  %v341_v1 = vsel %vm10238_vm5, %v336_v25, %v340_v24  ;;  %v355_v24 = vsel %vm10238_vm5, %v350_v56, %v354_v7  ;;  %v9430_v56 = vld [vmem:[%s12234_s1 + $0x190] sm:$0xff]  }
  0xfe   : > { %v7406_v54 = vcombine.low %v331_v47, %v341_v1  ;;  %v373_v25 = vor.u32 %v12285_v59, %v10119_v6  ;;  %v12286_v47 = vld [vmem:[#allocation9_spill] sm:$0xff]  ;;  %v10622_v6 = vrot.slane %v2223_v10, 4  ;;  %v7623_v7 = vrot.slane %v10582_v17, 9  ;;  %v10815_v17 = vld [vmem:[%s9880_s26 + $0x34] sm:$0xf] }
  0xff   : > { %v364_v34 = vrot.slane %v362_v29, 5  ;;  %v12287_v14 = vshrl.u32 %v12286_v47, 16  ;;  %v9575_v29 = vld [vmem:[%s9880_s26 + $0x20] sm:$0x1]  ;;  %v378_v42 = vrot.slane %v376_v55, 5  ;;  %v2783_v47 = vshrl.u32 %v7712_v44, 16 }
 0x100   : > { %8395 = vmatprep.mubr.bf16.mxu1 %v7406_v54  ;;  %v386_v1 = vshll.u32 %v9575_v29, 16  ;;  %v10627_v54 = vrot.slane %v2230_v0, 4  ;;  %v374_v59 = vrot.slane %v373_v25, 4  ;;  %v12290_v25 = vld [vmem:[#allocation10_spill] sm:$0xff]  ;;  %v10713_v58 = vsel %vm9996_vm2, %v7622_v22, %v2223_v10  ;;  %v9433_v10 = vld [vmem:[%s12234_s1 + $0x1a8] sm:$0xff]  }
 0x101   : > { %v382_v2 = vrot.slane %v12287_v14, 4  ;;  %v9576_v14 = vld [vmem:[%s9880_s26 + $0x28] sm:$0xf]  ;;  %v10680_v60 = vrot.slane %v2783_v47, 4 }
 0x102   : > { %v400_v11 = vshll.u32 %v9576_v14, 16 }
 0x103   : > { %v383_v29 = vor.u32 %v382_v2, %v378_v42  ;;  %v10665_v2 = vld [vmem:[%s9880_s26 + $0x24] sm:$0xf] }
 0x104   : > { %8576 = vmatmul.mubr.bf16.vlgmr.msra.gmra.mrb[0].mxu0 %v7641_v36  ;;  %v365_v36 = vsel %vm10238_vm5, %v360_v3, %v364_v34  ;;  %v388_v34 = vrot.slane %v386_v1, 5  ;;  %v12291_v3 = vshrl.u32 %v12290_v25, 16  ;;  %v379_v1 = vsel %vm10238_vm5, %v374_v59, %v378_v42 }
 0x105   : > { %8596 = vmatpush3.bf16.msra.mxu0 %v10517_v13  ;;  %8579 = vmatprep.mubr.bf16.mxu0 %v7642_v26  ;;  %v10646_v13 = vld [vmem:[%s9880_s26 + $0x20] sm:$0x1]  ;;  %v7407_v51 = vcombine.low %v355_v24, %v365_v36  ;;  %v12289_v26 = vld [vmem:[#allocation17_spill] sm:$0xff]  ;;  %v2786_v24 = vshll.u32 %v7712_v44, 16  ;;  %v384_v14 = vrot.slane %v383_v29, 4  ;;  %v7646_v44 = vcombine.low %v10598_v30, %v10653_v31 }
 0x106   : > { %8597 = vmatprep.subr.bf16.mxu0 %v9429_v39  ;;  %v397_v46 = vor.u32 %v12289_v26, %v12288_v40  ;;  %v406_v55 = vrot.slane %v12291_v3, 4  ;;  %v402_v40 = vrot.slane %v400_v11, 5  ;;  %v9577_v26 = vld [vmem:[%s9880_s26 + $0x2c] sm:$0x1]  ;;  %v2802_v59 = vshll.u32 %v10646_v13, 16 }
 0x107   : > { %8396 = vmatmul.mubr.bf16.vlgmr.msra.gmra.mrb[0].mxu1 %v7407_v51  ;;  %v410_v43 = vshll.u32 %v9577_v26, 16  ;;  %v2796_v51 = vshrl.u32 %v10641_v45, 16  ;;  %v389_v30 = vsel %vm10238_vm5, %v384_v14, %v388_v34  ;;  %v2807_v20 = vshrl.u32 %v10665_v2, 16  ;;  %v12293_v45 = vld [vmem:[#allocation19_spill] sm:$0xff]  ;;  %v9578_v13 = vld [vmem:[%s9880_s26 + $0x34] sm:$0xf] }
 0x108   : > { %v398_v36 = vrot.slane %v397_v46, 4  ;;  %v407_v46 = vor.u32 %v406_v55, %v402_v40  ;;  %v7408_v41 = vcombine.low %v379_v1, %v389_v30  ;;  %v424_v47 = vshll.u32 %v9578_v13, 16  ;;  %v12294_v11 = vld [vmem:[#allocation11_spill] sm:$0xff] }
 0x109   : > { %8598 = vmatpush3.bf16.msra.mxu0 %v9429_v39  ;;  %v412_v39 = vrot.slane %v410_v43, 5  ;;  %v10688_v43 = vrot.slane %v2786_v24, 5  ;;  %v12295_v31 = vshrl.u32 %v12294_v11, 16  ;;  %v2810_v52 = vshll.u32 %v10665_v2, 16  ;;  %v10730_v3 = vld [vmem:[%s9880_s26 + $0x2c] sm:$0x1] }
 0x10a   : > { %8599 = vmatprep.subr.bf16.mxu0 %v9430_v56  ;;  %v403_v53 = vsel %vm10238_vm5, %v398_v36, %v402_v40  ;;  %v408_v50 = vrot.slane %v407_v46, 4  ;;  %8399 = vmatprep.mubr.bf16.mxu1 %v7408_v41  ;;  %v426_v22 = vrot.slane %v424_v47, 5  ;;  %v2816_v55 = vshll.u32 %v10691_v33, 16  ;;  %v12296_v24 = vld [vmem:[#allocation20_spill] sm:$0xff]  ;;  %v12297_v36 = vld [vmem:[#allocation21_spill] sm:$0xff]  ;;  %v12301_v11 = vld [vmem:[#allocation23_spill] sm:$0xff] }
 0x10b   : > { %v430_v29 = vrot.slane %v12295_v31, 4  ;;  %v445_v9 = vor.u32 %v12297_v36, %v12296_v24  ;;  %v9580_v40 = vld [vmem:[%s9880_s26 + $0x40] sm:$0xf]  ;;  %v12298_v2 = vld [vmem:[#allocation12_spill] sm:$0xff]  ;;  %v10743_v1 = vsel %vm9996_vm2, %v10622_v6, %v2226_v21  ;;  %v10746_v41 = vrot.slane %v2792_v5, 5 }
 0x10c   : > { %8580 = vmatmul.mubr.bf16.gmra.mrb[4].mxu0 %v7643_v4  ;;  %v12292_v4 = vld [vmem:[#allocation18_spill] sm:$0xff]  ;;  %v448_v26 = vshll.u32 %v9580_v40, 16  ;;  %v12299_v23 = vshrl.u32 %v12298_v2, 16  ;;  %v10750_v38 = vrot.slane %v2802_v59, 5  ;;  %v10759_v47 = vrot.slane %v2816_v55, 5  ;;  %v12305_v2 = vld [vmem:[#allocation25_spill] sm:$0xff] }
 0x10d   : > { %8600 = vmatpush3.bf16.msra.mxu0 %v9430_v56  ;;  %8583 = vmatprep.mubr.bf16.mxu0 %v7644_v18  ;;  %v421_v42 = vor.u32 %v12293_v45, %v12292_v4  ;;  %v413_v18 = vsel %vm10238_vm5, %v408_v50, %v412_v39  ;;  %v9579_v56 = vld [vmem:[%s9880_s26 + $0x38] sm:$0x1]  ;;  %v431_v14 = vor.u32 %v430_v29, %v426_v22  ;;  %v9581_v39 = vld [vmem:[%s9880_s26 + $0x44] sm:$0x1]  ;;  %v446_v50 = vrot.slane %v445_v9, 4 }
 0x10e   : > { %8601 = vmatprep.subr.bf16.mxu0 %v9431_v49  ;;  %v434_v34 = vshll.u32 %v9579_v56, 16  ;;  %v7409_v62 = vcombine.low %v403_v53, %v413_v18  ;;  %v454_v35 = vrot.slane %v12299_v23, 4  ;;  %v458_v30 = vshll.u32 %v9581_v39, 16  ;;  %v9582_v18 = vld [vmem:[%s9880_s26 + $0x4c] sm:$0xf]  ;;  %v12306_v39 = vld [vmem:[#allocation14_spill] sm:$0xff] }
 0x10f   : > { %v422_v25 = vrot.slane %v421_v42, 4  ;;  %v2798_v53 = vrot.slane %v2796_v51, 4  ;;  %v450_v4 = vrot.slane %v448_v26, 5  ;;  %v432_v6 = vrot.slane %v431_v14, 4  ;;  %v9583_v24 = vld [vmem:[%s9880_s26 + $0x50] sm:$0x1] }
 0x110   : > { %8400 = vmatmul.mubr.bf16.gmra.mrb[4].mxu1 %v7409_v62  ;;  %v436_v46 = vrot.slane %v434_v34, 5  ;;  %v10754_v45 = vrot.slane %v2807_v20, 4  ;;  %v2820_v42 = vshrl.u32 %v10691_v33, 16  ;;  %v460_v5 = vrot.slane %v458_v30, 5  ;;  %v12300_v20 = vld [vmem:[#allocation22_spill] sm:$0xff]  ;;  %v12302_v34 = vld [vmem:[#allocation13_spill] sm:$0xff] }
 0x111   : > { %8602 = vmatpush3.bf16.msra.mxu0 %v9431_v49  ;;  %v2789_v49 = vor.u32 %v10688_v43, %v10680_v60  ;;  %v427_v21 = vsel %vm10238_vm5, %v422_v25, %v426_v22  ;;  %v455_v13 = vor.u32 %v454_v35, %v450_v4  ;;  %v10757_v51 = vrot.slane %v2810_v52, 5  ;;  %v9435_v22 = vld [vmem:[%s12234_s1 + $0x1b8] sm:$0xff]   ;;  %v7718_v36 = vld [vmem:[%s9880_s26 + $0x30] sm:$0xf] }
 0x112   : > { %8603 = vmatprep.subr.bf16.mxu0 %v9432_v57  ;;  %v2826_v60 = vshll.u32 %v10730_v3, 16  ;;  %v437_v59 = vsel %vm10238_vm5, %v432_v6, %v436_v46  ;;  %v469_v31 = vor.u32 %v12301_v11, %v12300_v20  ;;  %v7647_v29 = vcombine.low %v10678_v12, %v10724_v63  ;;  %v12304_v26 = vld [vmem:[#allocation24_spill] sm:$0xff]  ;;  %v9584_v35 = vld [vmem:[%s9880_s26 + $0x58] sm:$0xf] }
 0x113   : > { %v7410_v43 = vcombine.low %v427_v21, %v437_v59  ;;  %v7648_v52 = vcombine.low %v10713_v58, %v10743_v1  ;;  %v472_v56 = vshll.u32 %v9582_v18, 16  ;;  %v12303_v62 = vshrl.u32 %v12302_v34, 16  ;;  %v10808_v59 = vld [vmem:[%s12234_s1 + $0x1c0] sm:$0xff]   ;;  %v10828_v18 = vld [vmem:[%s9880_s26 + $0x38] sm:$0x1] }
 0x114   : > { %8584 = vmatmul.mubr.bf16.gmra.mrb[8].mxu0 %v7645_v37  ;;  %v9434_v37 = vld [vmem:[%s12234_s1 + $0x1b0] sm:$0xff]   ;;  %v2799_v55 = vor.u32 %v2798_v53, %v10746_v41  ;;  %v470_v63 = vrot.slane %v469_v31, 4  ;;  %v482_v58 = vshll.u32 %v9583_v24, 16  ;;  %v493_v23 = vor.u32 %v12305_v2, %v12304_v26 }
 0x115   : > { %8604 = vmatpush3.bf16.msra.mxu0 %v9432_v57  ;;  %8587 = vmatprep.mubr.bf16.mxu0 %v7646_v44  ;;  %v451_v57 = vsel %vm10238_vm5, %v446_v50, %v450_v4  ;;  %v456_v44 = vrot.slane %v455_v13, 4  ;;  %v478_v25 = vrot.slane %v12303_v62, 4  ;;  %v474_v40 = vrot.slane %v472_v56, 5  ;;  %v9585_v50 = vld [vmem:[%s9880_s26 + $0x5c] sm:$0x1]  ;;  %v12309_v62 = vld [vmem:[#allocation26_spill] sm:$0xff] }
 0x116   : > { %8605 = vmatprep.subr.bf16.mxu0 %v9433_v10  ;;  %8403 = vmatprep.mubr.bf16.mxu1 %v7410_v43  ;;  %v496_v1 = vshll.u32 %v9584_v35, 16  ;;  %v10789_v14 = vrot.slane %v2789_v49, 4  ;;  %v484_v46 = vrot.slane %v482_v58, 5  ;;  %v12307_v30 = vshrl.u32 %v12306_v39, 16 }
 0x117   : > { %v461_v12 = vsel %vm10238_vm5, %v456_v44, %v460_v5  ;;  %v506_v4 = vshll.u32 %v9585_v50, 16  ;;  %v494_v21 = vrot.slane %v493_v23, 4  ;;  %v2231_v13 = vsel %vm9996_vm2, %v7623_v7, %v2230_v0  ;;  %v10850_v23 = vld [vmem:[%s9880_s26 + $0x40] sm:$0xf]  ;;  %v9437_v50 = vld [vmem:[%s9880_s26 + $0x24] sm:$0xff]  }
 0x118   : > { %v7411_v9 = vcombine.low %v451_v57, %v461_v12  ;;  %v502_v53 = vrot.slane %v12307_v30, 4  ;;  %v498_v6 = vrot.slane %v496_v1, 5  ;;  %v12308_v49 = vrot.slane %v10430_v61, 5 }
 0x119   : > { %8606 = vmatpush3.bf16.msra.mxu0 %v9433_v10  ;;  %v479_v10 = vor.u32 %v478_v25, %v474_v40  ;;  %v10810_v43 = vrot.slane %v2799_v55, 4  ;;  %v10812_v28 = vrot.slane %v2820_v42, 4  ;;  %v475_v61 = vsel %vm10238_vm5, %v470_v63, %v474_v40  ;;  %v9436_v42 = vld [vmem:[%s9880_s26 + $0x18] sm:$0xff]  }
 0x11a   : > { %8607 = vmatprep.subr.bf16.mxu0 %v9434_v37  ;;  %8404 = vmatmul.mubr.bf16.gmra.mrb[8].mxu1 %v7411_v9  ;;  %v2234_v5 = vsel %vm9996_vm2, %v10627_v54, %v12308_v49  ;;  %v503_v7 = vor.u32 %v502_v53, %v498_v6  ;;  %v508_v54 = vrot.slane %v506_v4, 5  ;;  %v2831_v57 = vshrl.u32 %v7718_v36, 16  ;;  %v10838_v63 = vld [vmem:[%s9880_s26 + $0x3c] sm:$0xf]  ;;  %v9440_v49 = vld [vmem:[%s9880_s26 + $0x30] sm:$0xff]  }
 0x11b   : > { %v480_v0 = vrot.slane %v479_v10, 4  ;;  %v2834_v44 = vshll.u32 %v7718_v36, 16  ;;  %v517_v20 = vor.u32 %v10465_v15, %v10439_v8  ;;  %v2840_v11 = vshll.u32 %v10815_v17, 16  ;;  %v9586_v36 = vld [vmem:[%s9880_s26 + $0x68] sm:$0x1] }
 0x11c   : > { %8588 = vmatmul.mubr.bf16.gmra.mrb[12].mxu0 %v7647_v29  ;;  %v504_v29 = vrot.slane %v503_v7, 4  ;;  %v2844_v56 = vshrl.u32 %v10815_v17, 16  ;;  %v520_v8 = vshll.u32 %v12309_v62, 16  ;;  %v12310_v55 = vshrl.u32 %v12309_v62, 16  ;;  %v9445_v62 = vld [vmem:[%s9880_s26 + $0x54] sm:$0xff]  }
 0x11d   : > { %8591 = vmatprep.mubr.bf16.mxu0 %v7648_v52  ;;  %8608 = vmatpush3.bf16.msra.mxu0 %v9434_v37  ;;  %v485_v31 = vsel %vm10238_vm5, %v480_v0, %v484_v46  ;;  %v499_v37 = vsel %vm10238_vm5, %v494_v21, %v498_v6  ;;  %v7649_v52 = vcombine.low %v2231_v13, %v2234_v5  ;;  %v518_v25 = vrot.slane %v517_v20, 4  ;;  %v9587_v6 = vld [vmem:[%s9880_s26 + $0x74] sm:$0x1]  ;;  %v9439_v0 = vld [vmem:[%s12234_s1 + $0x1c8] sm:$0xff]  }
 0x11e   : > { %8609 = vmatprep.subr.bf16.mxu0 %v9435_v22  ;;  %v7412_v34 = vcombine.low %v475_v61, %v485_v31  ;;  %v509_v15 = vsel %vm10238_vm5, %v504_v29, %v508_v54  ;;  %v526_v12 = vrot.slane %v12310_v55, 4  ;;  %v522_v58 = vrot.slane %v520_v8, 5  ;;  %v9442_v31 = vld [vmem:[%s12234_s1 + $0x1d0] sm:$0xff]   ;;  %v9447_v8 = vld [vmem:[%s9880_s26 + $0x60] sm:$0xff]  }
 0x11f   : > { %v7413_v24 = vcombine.low %v499_v37, %v509_v15  ;;  %v530_v9 = vshll.u32 %v9586_v36, 16  ;;  %v10841_v40 = vrot.slane %v2831_v57, 4  ;;  %v10845_v26 = vrot.slane %v2840_v11, 5  ;;  %v9449_v15 = vld [vmem:[%s12234_s1 + $0x1e8] sm:$0xff]  }
 0x120   : > { %8407 = vmatprep.mubr.bf16.mxu1 %v7412_v34  ;;  %v541_v2 = vor.u32 %v10505_v32, %v10478_v16  ;;  %v527_v35 = vor.u32 %v526_v12, %v522_v58  ;;  %v544_v46 = vshll.u32 %v10469_v19, 16  ;;  %v10853_v39 = vrot.slane %v2844_v56, 4  ;;  %v9443_v56 = vld [vmem:[%s9880_s26 + $0x48] sm:$0xff]   ;;  %v9444_v34 = vld [vmem:[%s12234_s1 + $0x1d8] sm:$0xff]  }
 0x121   : > { %8610 = vmatpush3.bf16.msra.mxu0 %v9435_v22  ;;  %v10843_v22 = vrot.slane %v2834_v44, 5  ;;  %v532_v1 = vrot.slane %v530_v9, 5  ;;  %v2850_v30 = vshll.u32 %v10828_v18, 16  ;;  %v523_v53 = vsel %vm10238_vm5, %v518_v25, %v522_v58  ;;  %v9450_v25 = vld [vmem:[%s12234_s1 + $0x1f0] sm:$0xff]   ;;  %v9451_v12 = vld [vmem:[%s9880_s26 + $0x78] sm:$0xff]  }
 0x122   : > { %8631 = vmatprep.subr.bf16.mxu0 %v10808_v59  ;;  %8408 = vmatmul.mubr.bf16.gmra.mrb[12].mxu1 %v7413_v24  ;;  %v12311_v16 = vshrl.u32 %v10469_v19, 16  ;;  %v528_v4 = vrot.slane %v527_v35, 4  ;;  %v542_v10 = vrot.slane %v541_v2, 4  ;;  %v546_v21 = vrot.slane %v544_v46, 5  ;;  %v9448_v55 = vld [vmem:[%s9880_s26 + $0x6c] sm:$0xff]   ;;  %v9453_v9 = vld [vmem:[%s12234_s1 + $0x1f8] sm:$0xff]  }
 0x123   : > { %v554_v13 = vshll.u32 %v9587_v6, 16  ;;  %v2855_v5 = vshrl.u32 %v10838_v63, 16  ;;  %v2858_v61 = vshll.u32 %v10838_v63, 16  ;;  %v2864_v54 = vshll.u32 %v10850_v23, 16  ;;  %v7724_v63 = vld [vmem:[%s9880_s26 + $0x48] sm:$0xf] }
 0x124   : > { %8592 = vmatmul.mubr.bf16.gmra.mrb[16].mxu0 %v7649_v52  ;;  %v550_v32 = vrot.slane %v12311_v16, 4  ;;  %v533_v7 = vsel %vm10238_vm5, %v528_v4, %v532_v1  ;;  %v2868_v20 = vshrl.u32 %v10850_v23, 16  ;;  %v9441_v52 = vld [vmem:[%s9880_s26 + $0x3c] sm:$0xff]   ;;  %v2813_v24 = vor.u32 %v10757_v51, %v10754_v45  ;;  %v10904_v36 = vld [vmem:[%s9880_s26 + $0x4c] sm:$0xf] }
 0x125   : > { %8611 = vmatprep.mubr.bf16.mxu0 %v9436_v42  ;;  %v7414_v57 = vcombine.low %v523_v53, %v533_v7  ;;  %v556_v44 = vrot.slane %v554_v13, 5  ;;  %v547_v42 = vsel %vm10238_vm5, %v542_v10, %v546_v21  ;;  %v2823_v58 = vor.u32 %v10812_v28, %v10759_v47  ;;  %v10922_v28 = vld [vmem:[%s9880_s26 + $0x44] sm:$0x1]  ;;  %v7727_v13 = vld [vmem:[%s9880_s26 + $0x54] sm:$0xf] }
 0x126   : > { %v551_v19 = vor.u32 %v550_v32, %v546_v21  ;;  %v2837_v2 = vor.u32 %v10843_v22, %v10841_v40  ;;  %v2847_v35 = vor.u32 %v10853_v39, %v10845_v26  ;;  %v2857_v1 = vrot.slane %v2855_v5, 4 }
 0x127   : > { %8411 = vmatprep.mubr.bf16.mxu1 %v7414_v57  ;;  %v2860_v46 = vrot.slane %v2858_v61, 5  ;;  %v2795_v45 = vsel %vm10238_vm5, %v10789_v14, %v10746_v41  ;;  %v2805_v51 = vsel %vm10238_vm5, %v10810_v43, %v10750_v38  ;;  %v10924_v53 = vrot.slane %v2864_v54, 5  ;;  %v10947_v54 = vld [vmem:[%s9880_s26 + $0x58] sm:$0xf] }
 0x128   : > { %v552_v11 = vrot.slane %v551_v19, 4  ;;  %v2870_v40 = vrot.slane %v2868_v20, 4  ;;  %v2879_v22 = vshrl.u32 %v7724_v63, 16  ;;  %v2882_v39 = vshll.u32 %v7724_v63, 16 }
 0x129   : > { %v2888_v16 = vshll.u32 %v10904_v36, 16  ;;  %v2892_v32 = vshrl.u32 %v10904_v36, 16  ;;  %v2814_v41 = vrot.slane %v2813_v24, 4  ;;  %v2824_v14 = vrot.slane %v2823_v58, 4 }
 0x12a   : > { %v557_v37 = vsel %vm10238_vm5, %v552_v11, %v556_v44  ;;  %v2828_v38 = vrot.slane %v2826_v60, 5  ;;  %v2852_v43 = vrot.slane %v2850_v30, 5  ;;  %v2838_v4 = vrot.slane %v2837_v2, 4  ;;  %v10942_v30 = vld [vmem:[%s9880_s26 + $0x50] sm:$0x1] }
 0x12b   : > { %v7415_v29 = vcombine.low %v547_v42, %v557_v37  ;;  %v2848_v10 = vrot.slane %v2847_v35, 4  ;;  %v2861_v21 = vor.u32 %v2860_v46, %v2857_v1  ;;  %v2874_v6 = vshll.u32 %v10922_v28, 16  ;;  %v7730_v11 = vld [vmem:[%s9880_s26 + $0x60] sm:$0xf]  ;;  %v10974_v35 = vld [vmem:[%s9880_s26 + $0x5c] sm:$0x1] }
 0x12c   : > { %8612 = vmatmul.mubr.bf16.vlgmr.msra.gmra.mrb[0].mxu0 %v9437_v50  ;;  %v10935_v50 = vld [vmem:[%s12234_s1 + $0x200] sm:$0xff]   ;;  %v7758_v60 = vcombine.low %v2795_v45, %v2805_v51  ;;  %v2871_v5 = vor.u32 %v2870_v40, %v10924_v53  ;;  %v2881_v61 = vrot.slane %v2879_v22, 4  ;;  %v10944_v7 = vrot.slane %v2888_v16, 5  ;;  %v10981_v40 = vld [vmem:[%s9880_s26 + $0x68] sm:$0x1] }
 0x12d   : > { %8632 = vmatpush3.bf16.msra.mxu0 %v10808_v59  ;;  %8615 = vmatprep.mubr.bf16.mxu0 %v9440_v49  ;;  %v9446_v59 = vld [vmem:[%s12234_s1 + $0x1e0] sm:$0xff]   ;;  %v2894_v19 = vrot.slane %v2892_v32, 4  ;;  %v2819_v57 = vsel %vm10238_vm5, %v2814_v41, %v10759_v47  ;;  %v2829_v44 = vsel %vm10238_vm5, %v2824_v14, %v2828_v38  ;;  %v2903_v20 = vshrl.u32 %v7727_v13, 16 }
 0x12e   : > { %8633 = vmatprep.subr.bf16.mxu0 %v9439_v0  ;;  %8412 = vmatmul.mubr.bf16.gmra.mrb[16].mxu1 %v7415_v29  ;;  %v9452_v49 = vld [vmem:[%s9880_s26 + $0x84] sm:$0xff]   ;;  %v2906_v42 = vshll.u32 %v7727_v13, 16  ;;  %v2843_v37 = vsel %vm10238_vm5, %v2838_v4, %v10845_v26  ;;  %v2853_v29 = vsel %vm10238_vm5, %v2848_v10, %v2852_v43  ;;  %v2872_v47 = vrot.slane %v2871_v5, 4  ;;  %v10988_v4 = vld [vmem:[%s9880_s26 + $0x70] sm:$0xf] }
 0x12f   : > { %v2905_v63 = vrot.slane %v2903_v20, 4  ;;  %v7759_v58 = vcombine.low %v2819_v57, %v2829_v44  ;;  %v2922_v43 = vshll.u32 %v10974_v35, 16  ;;  %v9455_v10 = vld [vmem:[%s12234_s1 + $0x208] sm:$0xff]   ;;  %v7736_v5 = vld [vmem:[%s9880_s26 + $0x78] sm:$0xf]  ;;  %v2960_v57 = vshll.u32 %v10988_v4, 16 }
 0x130   : > { %v2908_v24 = vrot.slane %v2906_v42, 5  ;;  %v2964_v44 = vshrl.u32 %v10988_v4, 16 }
 0x131   : > { %8634 = vmatpush3.bf16.msra.mxu0 %v9439_v0  ;;  %v2884_v0 = vrot.slane %v2882_v39, 5 }
 0x132   : > { %8635 = vmatprep.subr.bf16.mxu0 %v9442_v31  ;;  %v2909_v38 = vor.u32 %v2908_v24, %v2905_v63  ;;  %v9460_v63 = vld [vmem:[%s12234_s1 + $0x218] sm:$0xff]   ;;  %v7739_v24 = vld [vmem:[%s9880_s26 + $0x84] sm:$0xf] }
 0x134   : > { %8616 = vmatmul.mubr.bf16.gmra.mrb[4].mxu0 %v9441_v52  ;;  %v2862_v52 = vrot.slane %v2861_v21, 4  ;;  %v2946_v21 = vshll.u32 %v10981_v40, 16 }
 0x135   : > { %8636 = vmatpush3.bf16.msra.mxu0 %v9442_v31  ;;  %8619 = vmatprep.mubr.bf16.mxu0 %v9443_v56  ;;  %v10956_v31 = vld [vmem:[%s9880_s26 + $0x64] sm:$0xf]  ;;  %v2876_v56 = vrot.slane %v2874_v6, 5 }
 0x136   : > { %8637 = vmatprep.subr.bf16.mxu0 %v9444_v34  ;;  %v2940_v26 = vshrl.u32 %v10956_v31, 16  ;;  %v2867_v2 = vsel %vm10238_vm5, %v2862_v52, %v10924_v53  ;;  %v7733_v53 = vld [vmem:[%s9880_s26 + $0x6c] sm:$0xf]  ;;  %v2975_v52 = vshrl.u32 %v7736_v5, 16 }
 0x137   : > { %v2877_v1 = vsel %vm10238_vm5, %v2872_v47, %v2876_v56  ;;  %v2978_v56 = vshll.u32 %v7736_v5, 16 }
 0x138   : > { %v2942_v32 = vrot.slane %v2940_v26, 4  ;;  %v7761_v6 = vcombine.low %v2867_v2, %v2877_v1  ;;  %v11016_v26 = vrot.slane %v2960_v57, 5 }
 0x139   : > { %8638 = vmatpush3.bf16.msra.mxu0 %v9444_v34  ;;  %v2898_v34 = vshll.u32 %v10942_v30, 16 }
 0x13a   : > { %8639 = vmatprep.subr.bf16.mxu0 %v9446_v59 }
 0x13b   : > { %v2900_v46 = vrot.slane %v2898_v34, 5 }
 0x13c   : > { %8620 = vmatmul.mubr.bf16.gmra.mrb[8].mxu0 %v9445_v62  ;;  %v2916_v62 = vshrl.u32 %v10947_v54, 16 }
 0x13d   : > { %8640 = vmatpush3.bf16.msra.mxu0 %v9446_v59  ;;  %8623 = vmatprep.mubr.bf16.mxu0 %v9447_v8  ;;  %v2912_v59 = vshll.u32 %v10947_v54, 16  ;;  %v2927_v8 = vshrl.u32 %v7730_v11, 16 }
 0x13e   : > { %8641 = vmatprep.subr.bf16.mxu0 %v9449_v15  ;;  %v2918_v51 = vrot.slane %v2916_v62, 4 }
 0x13f   : > { %v10978_v45 = vrot.slane %v2912_v59, 5  ;;  %v2929_v22 = vrot.slane %v2927_v8, 4 }
 0x141   : > { %8642 = vmatpush3.bf16.msra.mxu0 %v9449_v15  ;;  %v2930_v15 = vshll.u32 %v7730_v11, 16  ;;  %v2919_v13 = vor.u32 %v2918_v51, %v10978_v45  ;;  %v2910_v11 = vrot.slane %v2909_v38, 4 }
 0x142   : > { %8643 = vmatprep.subr.bf16.mxu0 %v9450_v25 }
 0x143   : > { %v2932_v39 = vrot.slane %v2930_v15, 5  ;;  %v2920_v34 = vrot.slane %v2919_v13, 4  ;;  %v2915_v51 = vsel %vm10238_vm5, %v2910_v11, %v10978_v45  ;;  %v2999_v45 = vshrl.u32 %v7739_v24, 16 }
 0x144   : > { %8624 = vmatmul.mubr.bf16.gmra.mrb[12].mxu0 %v9448_v55  ;;  %v2885_v55 = vor.u32 %v2884_v0, %v2881_v61  ;;  %v10997_v61 = vld [vmem:[%s9880_s26 + $0x7c] sm:$0xf] }
 0x145   : > { %8627 = vmatprep.mubr.bf16.mxu0 %v9451_v12  ;;  %8644 = vmatpush3.bf16.msra.mxu0 %v9450_v25  ;;  %v2936_v25 = vshll.u32 %v10956_v31, 16  ;;  %v2895_v12 = vor.u32 %v2894_v19, %v10944_v7  ;;  %v2933_v0 = vor.u32 %v2932_v39, %v2929_v22  ;;  %v2988_v47 = vshrl.u32 %v10997_v61, 16 }
 0x146   : > { %8645 = vmatprep.subr.bf16.mxu0 %v9453_v9  ;;  %v2886_v41 = vrot.slane %v2885_v55, 4  ;;  %v2966_v55 = vrot.slane %v2964_v44, 4  ;;  %v3001_v44 = vrot.slane %v2999_v45, 4  ;;  %v3309_v45 = vrot.slane %v10691_v33, 5 }
 0x147   : > { %v10983_v16 = vrot.slane %v2936_v25, 5  ;;  %v2896_v14 = vrot.slane %v2895_v12, 4  ;;  %v2934_v8 = vrot.slane %v2933_v0, 4  ;;  %v11014_v25 = vld [vmem:[%s9880_s26 + $0x74] sm:$0x1]  ;;  %v2990_v1 = vrot.slane %v2988_v47, 4 }
 0x148   : > { %v2891_v20 = vsel %vm10238_vm5, %v2886_v41, %v10944_v7  ;;  %v2948_v7 = vrot.slane %v2946_v21, 5  ;;  %v2970_v39 = vshll.u32 %v11014_v25, 16  ;;  %v2967_v38 = vor.u32 %v2966_v55, %v11016_v26  ;;  %v9588_v55 = vld [vmem:[%s9880_s26 + $0x1c] sm:$0xf] }
 0x149   : > { %8646 = vmatpush3.bf16.msra.mxu0 %v9453_v9  ;;  %v7760_v9 = vcombine.low %v2843_v37, %v2853_v29  ;;  %v2943_v19 = vor.u32 %v2942_v32, %v10983_v16  ;;  %v2901_v42 = vsel %vm10238_vm5, %v2896_v14, %v2900_v46  ;;  %v2924_v37 = vrot.slane %v2922_v43, 5  ;;  %v9458_v29 = vld [vmem:[%s12234_s1 + $0x210] sm:$0xff]   ;;  %v11023_v46 = vld [vmem:[%s9880_s26 + $0x88] sm:$0xf]  ;;  %v11032_v32 = vld [vmem:[%s9880_s26 + $0x80] sm:$0x1] }
 0x14a   : > { %8667 = vmatprep.subr.bf16.mxu0 %v10935_v50  ;;  %v7762_v12 = vcombine.low %v2891_v20, %v2901_v42  ;;  %v3002_v43 = vshll.u32 %v7739_v24, 16  ;;  %v3012_v21 = vshrl.u32 %v11023_v46, 16  ;;  %v2972_v57 = vrot.slane %v2970_v39, 5 }
 0x14b   : > { %v2944_v15 = vrot.slane %v2943_v19, 4  ;;  %v2925_v22 = vsel %vm10238_vm5, %v2920_v34, %v2924_v37  ;;  %v2968_v19 = vrot.slane %v2967_v38, 4  ;;  %v9464_v37 = vld [vmem:[%s12234_s1 + $0x228] sm:$0xff]   ;;  %v3312_v33 = vrot.slane %v10730_v3, 5 }
 0x14c   : > { %8628 = vmatmul.mubr.bf16.gmra.mrb[16].mxu0 %v9452_v49  ;;  %v2951_v49 = vshrl.u32 %v7733_v53, 16  ;;  %v3004_v20 = vrot.slane %v3002_v43, 5  ;;  %v3014_v11 = vrot.slane %v3012_v21, 4  ;;  %v7777_v21 = vld [vmem:[%s9880_s26 + $0x24] sm:$0xe] }
 0x14d   : > { %8647 = vmatprep.mubr.bf16.mxu0 %v7758_v60  ;;  %v2954_v60 = vshll.u32 %v7733_v53, 16  ;;  %v2939_v53 = vsel %vm10238_vm5, %v2934_v8, %v10983_v16  ;;  %v2949_v41 = vsel %vm10238_vm5, %v2944_v15, %v2948_v7  ;;  %v2973_v34 = vsel %vm10238_vm5, %v2968_v19, %v2972_v57  ;;  %v9467_v8 = vld [vmem:[%s12234_s1 + $0x230] sm:$0xff]  }
 0x14e   : > { %v2953_v59 = vrot.slane %v2951_v49, 4  ;;  %v2994_v49 = vshll.u32 %v11032_v32, 16  ;;  %v7764_v5 = vcombine.low %v2939_v53, %v2949_v41  ;;  %v3005_v7 = vor.u32 %v3004_v20, %v3001_v44  ;;  %v9589_v53 = vld [vmem:[%s9880_s26 + $0x20] sm:$0x1] }
 0x14f   : > { %v2956_v62 = vrot.slane %v2954_v60, 5  ;;  %v7763_v60 = vcombine.low %v2915_v51, %v2925_v22  ;;  %v9469_v22 = vld [vmem:[%s12234_s1 + $0x238] sm:$0xff]   ;;  %v3305_v41 = vrot.slane %v9589_v53, 5  ;;  %v3319_v57 = vrot.slane %v10828_v18, 5  ;;  %v7780_v18 = vld [vmem:[%s9880_s26 + $0x48] sm:$0xe] }
 0x150   : > { %v3323_v20 = vrot.slane %v10850_v23, 5  ;;  %v7783_v53 = vld [vmem:[%s9880_s26 + $0x6c] sm:$0xe] }
 0x151   : > { %v2957_v14 = vor.u32 %v2956_v62, %v2953_v59 }
 0x153   : > { %v2958_v0 = vrot.slane %v2957_v14, 4 }
 0x154   : > { %8648 = vmatmul.mubr.bf16.vlgmr.msra.gmra.mrb[0].mxu0 %v7759_v58  ;;  %v2977_v58 = vrot.slane %v2975_v52, 4 }
 0x155   : > { %8668 = vmatpush3.bf16.msra.mxu0 %v10935_v50  ;;  %8651 = vmatprep.mubr.bf16.mxu0 %v7760_v9  ;;  %v2984_v50 = vshll.u32 %v10997_v61, 16  ;;  %v2980_v9 = vrot.slane %v2978_v56, 5  ;;  %v2996_v56 = vrot.slane %v2994_v49, 5  ;;  %v2963_v47 = vsel %vm10238_vm5, %v2958_v0, %v11016_v26 }
 0x156   : > { %8669 = vmatprep.subr.bf16.mxu0 %v9455_v10  ;;  %v7765_v24 = vcombine.low %v2963_v47, %v2973_v34  ;;  %v3325_v47 = vrot.slane %v3323_v20, 4  ;;  %v3326_v34 = vrot.slane %v10922_v28, 5 }
 0x157   : > { %v2986_v2 = vrot.slane %v2984_v50, 5  ;;  %v2981_v16 = vor.u32 %v2980_v9, %v2977_v58  ;;  %v11050_v50 = vld [vmem:[%s9880_s26 + $0x8c] sm:$0x1]  ;;  %v3006_v9 = vrot.slane %v3005_v7, 4  ;;  %v7790_v7 = vrot.slane %v7780_v18, 9 }
 0x158   : > { %v3018_v62 = vshll.u32 %v11050_v50, 16 }
 0x159   : > { %8670 = vmatpush3.bf16.msra.mxu0 %v9455_v10  ;;  %v3008_v10 = vshll.u32 %v11023_v46, 16  ;;  %v2991_v13 = vor.u32 %v2990_v1, %v2986_v2 }
 0x15a   : > { %8671 = vmatprep.subr.bf16.mxu0 %v9458_v29  ;;  %v3020_v51 = vrot.slane %v3018_v62, 5 }
 0x15b   : > { %v3010_v42 = vrot.slane %v3008_v10, 5  ;;  %v2992_v52 = vrot.slane %v2991_v13, 4 }
 0x15c   : > { %8652 = vmatmul.mubr.bf16.gmra.mrb[4].mxu0 %v7761_v6  ;;  %v9462_v6 = vld [vmem:[%s12234_s1 + $0x220] sm:$0xff]  }
 0x15d   : > { %8672 = vmatpush3.bf16.msra.mxu0 %v9458_v29  ;;  %8655 = vmatprep.mubr.bf16.mxu0 %v7762_v12  ;;  %v2982_v29 = vrot.slane %v2981_v16, 4  ;;  %v3015_v59 = vor.u32 %v3014_v11, %v3010_v42  ;;  %v2997_v26 = vsel %vm10238_vm5, %v2992_v52, %v2996_v56  ;;  %v3302_v12 = vrot.slane %v9588_v55, 5  ;;  %v7778_v16 = vld [vmem:[%s9880_s26 + $0x30] sm:$0xe]  ;;  %v7779_v11 = vld [vmem:[%s9880_s26 + $0x3c] sm:$0xe] }
 0x15e   : > { %8673 = vmatprep.subr.bf16.mxu0 %v9460_v63  ;;  %v3011_v14 = vsel %vm10238_vm5, %v3006_v9, %v3010_v42  ;;  %v7788_v0 = vrot.slane %v7778_v16, 9  ;;  %v7789_v56 = vrot.slane %v7779_v11, 9  ;;  %v3344_v55 = vrot.slane %v10956_v31, 5 }
 0x15f   : > { %v2987_v15 = vsel %vm10238_vm5, %v2982_v29, %v2986_v2  ;;  %v3016_v1 = vrot.slane %v3015_v59, 4  ;;  %v3304_v39 = vrot.slane %v3302_v12, 4  ;;  %v3333_v59 = vrot.slane %v10942_v30, 5  ;;  %v7782_v30 = vld [vmem:[%s9880_s26 + $0x60] sm:$0xe] }
 0x160   : > { %v7766_v58 = vcombine.low %v2987_v15, %v2997_v26  ;;  %v3324_v62 = vsel %vm9996_vm2, %v7789_v56, %v3323_v20  ;;  %v7781_v26 = vld [vmem:[%s9880_s26 + $0x54] sm:$0xe]  ;;  %v3340_v9 = vrot.slane %v10974_v35, 5  ;;  %v9721_v20 = vmov 0  }
 0x161   : > { %8674 = vmatpush3.bf16.msra.mxu0 %v9460_v63  ;;  %v7776_v63 = vld [vmem:[%s9880_s26 + $0x18] sm:$0xe]  ;;  %v3021_v38 = vsel %vm10238_vm5, %v3016_v1, %v3020_v51  ;;  %v3306_v10 = vsel %vm9996_vm2, %v3304_v39, %v3305_v41  ;;  %v7792_v1 = vrot.slane %v7782_v30, 9  ;;  %v3347_v51 = vrot.slane %v10981_v40, 5  ;;  %3739 = vst [vmem:[#allocation2 + $0xc] sm:$0xf] %v9721_v20 }
 0x162   : > { %8675 = vmatprep.subr.bf16.mxu0 %v9462_v6  ;;  %v7786_v2 = vrot.slane %v7776_v63, 9  ;;  %v7767_v13 = vcombine.low %v3011_v14, %v3021_v38  ;;  %v3358_v41 = vrot.slane %v10997_v61, 5  ;;  %v7784_v40 = vld [vmem:[%s9880_s26 + $0x78] sm:$0xe]  ;;  %3736 = vst [vmem:[#allocation2] sm:$0xf] %v9721_v20 }
 0x163   : > { %v3345_v39 = vsel %vm9996_vm2, %v7792_v1, %v3344_v55  ;;  %3737 = vst [vmem:[#allocation2 + $0x4] sm:$0xf] %v9721_v20  ;;  %3738 = vst [vmem:[#allocation2 + $0x8] sm:$0x1] %v9721_v20  ;;  %v9476_v30 = vld [vmem:[#allocation3 + $0x70] sm:$0xff]   ;;  %v11176_v1 = vld [vmem:[#allocation3] sm:$0xff]  }
 0x164   : > { %8656 = vmatmul.mubr.bf16.gmra.mrb[8].mxu0 %v7763_v60  ;;  %v3303_v43 = vsel %vm9996_vm2, %v7786_v2, %v3302_v12  ;;  %v7787_v60 = vrot.slane %v7777_v21, 9  ;;  %v3351_v2 = vrot.slane %v10988_v4, 5  ;;  %v7794_v21 = vrot.slane %v7784_v40, 9  ;;  %3740 = vst [vmem:[#allocation2 + $0x10] sm:$0xf] %v9721_v20 }
 0x165   : > { %8676 = vmatpush3.bf16.msra.mxu0 %v9462_v6  ;;  %8659 = vmatprep.mubr.bf16.mxu0 %v7764_v5  ;;  %v3316_v6 = vrot.slane %v10815_v17, 5  ;;  %v7812_v49 = vcombine.low %v3303_v43, %v3306_v10  ;;  %v3311_v5 = vrot.slane %v3309_v45, 4  ;;  %v3354_v10 = vrot.slane %v11014_v25, 5  ;;  %3741 = vst [vmem:[#allocation2 + $0x14] sm:$0x1] %v9721_v20 }
 0x166   : > { %8677 = vmatprep.subr.bf16.mxu0 %v9464_v37  ;;  %v3310_v44 = vsel %vm9996_vm2, %v7787_v60, %v3309_v45  ;;  %v7793_v45 = vrot.slane %v7783_v53, 9  ;;  %v3353_v43 = vrot.slane %v3351_v2, 4  ;;  %v3361_v4 = vrot.slane %v11032_v32, 5  ;;  %v7785_v60 = vld [vmem:[%s9880_s26 + $0x84] sm:$0xe] }
 0x167   : > { %v3318_v19 = vrot.slane %v3316_v6, 4  ;;  %v3313_v17 = vsel %vm9996_vm2, %v3311_v5, %v3312_v33  ;;  %v3317_v42 = vsel %vm9996_vm2, %v7788_v0, %v3316_v6  ;;  %v3360_v6 = vrot.slane %v3358_v41, 4  ;;  %3742 = vst [vmem:[#allocation2 + $0x18] sm:$0xf] %v9721_v20  ;;  %3743 = vst [vmem:[#allocation2 + $0x1c] sm:$0xf] %v9721_v20 }
 0x168   : > { %v7813_v29 = vcombine.low %v3310_v44, %v3313_v17  ;;  %v3352_v16 = vsel %vm9996_vm2, %v7793_v45, %v3351_v2  ;;  %v3355_v61 = vsel %vm9996_vm2, %v3353_v43, %v3354_v10  ;;  %v7795_v32 = vrot.slane %v7785_v60, 9  ;;  %v9470_v17 = vld [vmem:[#allocation3 + $0x40] sm:$0xff]   ;;  %3744 = vst [vmem:[#allocation2 + $0x20] sm:$0x1] %v9721_v20  ;;  %3745 = vst [vmem:[#allocation2 + $0x24] sm:$0xf] %v9721_v20 }
 0x169   : > { %8678 = vmatpush3.bf16.msra.mxu0 %v9464_v37  ;;  %v3320_v3 = vsel %vm9996_vm2, %v3318_v19, %v3319_v57  ;;  %v3330_v37 = vrot.slane %v10904_v36, 5  ;;  %v3327_v36 = vsel %vm9996_vm2, %v3325_v47, %v3326_v34  ;;  %v3362_v25 = vsel %vm9996_vm2, %v3360_v6, %v3361_v4  ;;  %3746 = vst [vmem:[#allocation2 + $0x28] sm:$0xf] %v9721_v20  ;;  %v9473_v34 = vld [vmem:[#allocation3 + $0x58] sm:$0xff]   ;;  %v11183_v2 = vld [vmem:[%s12235_s2] ss:$0 sm:$0xff] }
 0x16a   : > { %8679 = vmatprep.subr.bf16.mxu0 %v9467_v8  ;;  %v7814_v52 = vcombine.low %v3317_v42, %v3320_v3  ;;  %v7815_v12 = vcombine.low %v3324_v62, %v3327_v36  ;;  %v7819_v5 = vcombine.low %v3352_v16, %v3355_v61  ;;  %v3368_v19 = vrot.slane %v11050_v50, 5  ;;  %3747 = vst [vmem:[#allocation2 + $0x2c] sm:$0x1] %v9721_v20  ;;  %v9471_v50 = vld [vmem:[#allocation3 + $0x48] sm:$0xff]  }
 0x16b   : > { %v3332_v23 = vrot.slane %v3330_v37, 4  ;;  %v3331_v15 = vsel %vm9996_vm2, %v7790_v7, %v3330_v37  ;;  %3748 = vst [vmem:[#allocation2 + $0x30] sm:$0xf] %v9721_v20  ;;  %3749 = vst [vmem:[#allocation2 + $0x34] sm:$0xf] %v9721_v20  ;;  %8703 = vmatprep.subr.bf16.mxu1 %v9470_v17 }
 0x16c   : > { %8660 = vmatmul.mubr.bf16.gmra.mrb[12].mxu0 %v7765_v24  ;;  %v7791_v24 = vrot.slane %v7781_v26, 9  ;;  %3750 = vst [vmem:[#allocation2 + $0x38] sm:$0x1] %v9721_v20  ;;  %3751 = vst [vmem:[#allocation2 + $0x3c] sm:$0xf] %v9721_v20  ;;  %8704 = vmatpush3.bf16.msra.mxu1 %v9470_v17 }
 0x16d   : > { %8663 = vmatprep.mubr.bf16.mxu0 %v7766_v58  ;;  %8680 = vmatpush3.bf16.msra.mxu0 %v9467_v8  ;;  %v3337_v8 = vrot.slane %v10947_v54, 5  ;;  %v3334_v28 = vsel %vm9996_vm2, %v3332_v23, %v3333_v59  ;;  %v3346_v54 = vrot.slane %v3344_v55, 4  ;;  %3752 = vst [vmem:[#allocation2 + $0x40] sm:$0xf] %v9721_v20  ;;  %3753 = vst [vmem:[#allocation2 + $0x44] sm:$0x1] %v9721_v20 }
 0x16e   : > { %8681 = vmatprep.subr.bf16.mxu0 %v9469_v22  ;;  %v7816_v63 = vcombine.low %v3331_v15, %v3334_v28  ;;  %3754 = vst [vmem:[#allocation2 + $0x48] sm:$0xf] %v9721_v20  ;;  %3755 = vst [vmem:[#allocation2 + $0x4c] sm:$0xf] %v9721_v20  ;;  %8705 = vmatprep.subr.bf16.mxu1 %v9471_v50  ;;  %v9474_v23 = vld [vmem:[#allocation3 + $0x60] sm:$0xff]  }
 0x16f   : > { %v3339_v58 = vrot.slane %v3337_v8, 4  ;;  %v3348_v35 = vsel %vm9996_vm2, %v3346_v54, %v3347_v51  ;;  %3756 = vst [vmem:[#allocation2 + $0x50] sm:$0x1] %v9721_v20  ;;  %3757 = vst [vmem:[#allocation2 + $0x54] sm:$0xf] %v9721_v20  ;;  %v3656_v54 = vstv %s7831_s27 }
 0x170   : > { %v7818_v38 = vcombine.low %v3345_v39, %v3348_v35  ;;  %3758 = vst [vmem:[#allocation2 + $0x58] sm:$0xf] %v9721_v20  ;;  %3759 = vst [vmem:[#allocation2 + $0x5c] sm:$0x1] %v9721_v20  ;;  %8706 = vmatpush3.bf16.msra.mxu1 %v9471_v50  ;;  %v3657_v51 = vadd.s32 1, %v3656_v54  ;;  %vm3666_vm8 = vcmp.ge.s32.totalorder %v3656_v54, 0 }
 0x171   : > { %8682 = vmatpush3.bf16.msra.mxu0 %v9469_v22  ;;  %v3338_v22 = vsel %vm9996_vm2, %v7791_v24, %v3337_v8  ;;  %v3341_v31 = vsel %vm9996_vm2, %v3339_v58, %v3340_v9  ;;  %3760 = vst [vmem:[#allocation2 + $0x60] sm:$0xf] %v9721_v20  ;;  %3761 = vst [vmem:[#allocation2 + $0x64] sm:$0xf] %v9721_v20  ;;  %v9475_v8 = vld [vmem:[#allocation3 + $0x68] sm:$0xff]   ;;  %v9477_v58 = vld [vmem:[#allocation3 + $0x78] sm:$0xff]  }
 0x172   : > { %v7817_v14 = vcombine.low %v3338_v22, %v3341_v31  ;;  %3762 = vst [vmem:[#allocation2 + $0x68] sm:$0x1] %v9721_v20  ;;  %3763 = vst [vmem:[#allocation2 + $0x6c] sm:$0xf] %v9721_v20  ;;  %v3659_v22 = vadd.s32 3, %v3656_v54  ;;  %vm3667_vm6 = vcmp.ge.s32.totalorder %v3657_v51, 0 }
 0x173   : > { %3764 = vst [vmem:[#allocation2 + $0x70] sm:$0xf] %v9721_v20  ;;  %3765 = vst [vmem:[#allocation2 + $0x74] sm:$0x1] %v9721_v20  ;;  %vm3677_vm7 = vcmp.lt.s32.totalorder %v3657_v51, 16  ;;  %vm3676_vm9 = vcmp.lt.s32.totalorder %v3656_v54, 16 }
 0x174   : > { %8664 = vmatmul.mubr.bf16.gmra.mrb[16].mxu0 %v7767_v13  ;;  %v3365_v13 = vrot.slane %v11023_v46, 5  ;;  %v11185_v53 = vadd.s32 2, %v3656_v54  ;;  %vm3669_vm11 = vcmp.ge.s32.totalorder %v3659_v22, 0  ;;  %vm3679_vm12 = vcmp.lt.s32.totalorder %v3659_v22, 16  ;;  %vm11190_vm15 = vmand %vm3667_vm6, %vm3677_vm7 }
 0x175   : > { %8683 = vmatprep.mubr.bf16.mxu0 %v7812_v49  ;;  %v3359_v49 = vsel %vm9996_vm2, %v7794_v21, %v3358_v41  ;;  %vm11198_vm3 = vmand %vm3666_vm8, %vm3676_vm9 }
 0x176   : > { %v7820_v33 = vcombine.low %v3359_v49, %v3362_v25  ;;  %v3367_v0 = vrot.slane %v3365_v13, 4  ;;  %v3366_v57 = vsel %vm9996_vm2, %v7795_v32, %v3365_v13  ;;  %vm3668_vm4 = vcmp.ge.s32.totalorder %v11185_v53, 0  ;;  %vm11230_vm7 = vmand %vm3669_vm11, %vm3679_vm12 }
 0x177   : > { %vm3678_vm6 = vcmp.lt.s32.totalorder %v11185_v53, 16  ;;  %v11206_v49 = vadd.s32 5, %v3656_v54  ;;  %v11208_v25 = vadd.s32 4, %v3656_v54  ;;  %v11214_v32 = vadd.s32 6, %v3656_v54 }
 0x178   : > { %v3369_v46 = vsel %vm9996_vm2, %v3367_v0, %v3368_v19 }
 0x179   : > { %v7821_v44 = vcombine.low %v3366_v57, %v3369_v46  ;;  %vm3671_vm8 = vcmp.ge.s32.totalorder %v11206_v49, 0  ;;  %vm3681_vm9 = vcmp.lt.s32.totalorder %v11206_v49, 16  ;;  %vm3670_vm11 = vcmp.ge.s32.totalorder %v11208_v25, 0 }
 0x17a   : > { %vm3680_vm12 = vcmp.lt.s32.totalorder %v11208_v25, 16 }
 0x17c   : > { %8684 = vmatmul.mubr.bf16.vlgmr.msra.gmra.mrb[0].mxu0 %v7813_v29 }
 0x17d   : > { %8687 = vmatprep.mubr.bf16.mxu0 %v7814_v52  ;;  %v9472_v52 = vld [vmem:[#allocation3 + $0x50] sm:$0xff]  }
 0x17e   : > { %8707 = vmatprep.subr.bf16.mxu1 %v9472_v52 }
 0x17f   : > { %8708 = vmatpush3.bf16.msra.mxu1 %v9472_v52 }
 0x180   : > { %8709 = vmatprep.subr.bf16.mxu1 %v9473_v34 }
 0x183   : > { %8710 = vmatpush3.bf16.msra.mxu1 %v9473_v34 }
 0x184   : > { %8688 = vmatmul.mubr.bf16.gmra.mrb[4].mxu0 %v7815_v12  ;;  %8711 = vmatprep.subr.bf16.mxu1 %v9474_v23 }
 0x185   : > { %8691 = vmatprep.mubr.bf16.mxu0 %v7816_v63 }
 0x187   : > { %8712 = vmatpush3.bf16.msra.mxu1 %v9474_v23 }
 0x188   : > { %8713 = vmatprep.subr.bf16.mxu1 %v9475_v8 }
 0x18b   : > { %8714 = vmatpush3.bf16.msra.mxu1 %v9475_v8 }
 0x18c   : > { %8692 = vmatmul.mubr.bf16.gmra.mrb[8].mxu0 %v7817_v14  ;;  %8715 = vmatprep.subr.bf16.mxu1 %v9476_v30 }
 0x18d   : > { %8695 = vmatprep.mubr.bf16.mxu0 %v7818_v38 }
 0x18f   : > { %8716 = vmatpush3.bf16.msra.mxu1 %v9476_v30 }
 0x190   : > { %8717 = vmatprep.subr.bf16.mxu1 %v9477_v58 }
 0x193   : > { %8718 = vmatpush3.bf16.msra.mxu1 %v9477_v58 }
 0x194   : > { %8696 = vmatmul.mubr.bf16.gmra.mrb[12].mxu0 %v7819_v5  ;;  %8735 = vmatprep.subr.bf16.mxu1 %v11176_v1 }
 0x195   : > { %8699 = vmatprep.mubr.bf16.mxu0 %v7820_v33  ;;  %v11212_v33 = vadd.s32 7, %v3656_v54 }
 0x19c   : > { %8700 = vmatmul.mubr.bf16.gmra.mrb[16].mxu0 %v7821_v44  ;;  %v11218_v44 = vadd.s32 9, %v3656_v54 }
 0x1da   : > { %v8397_v42 = vpop.f32.mrb[0].mxu1 }
 0x1db   : > { %v697_v3 = vpop.f32.mrb[1].mxu1 }
 0x1dc   : > { %v8398_v11 = vpop.f32.mrb[2].mxu1 }
 0x1dd   : > { %v11142_v37 = vpop.f32.mrb[3].mxu1 }
 0x1e3   : > { %v11144_v18 = vpop.f32.mrb[4].mxu1 }
 0x1e4   : > { %v11146_v29 = vpop.f32.mrb[5].mxu1 }
 0x1e5   : > { %v11148_v56 = vpop.f32.mrb[6].mxu1 }
 0x1e6   : > { %v11150_v47 = vpop.f32.mrb[7].mxu1 }
 0x1ed   : > { %v11152_v7 = vpop.f32.mrb[8].mxu1 }
 0x1ee   : > { %v11154_v59 = vpop.f32.mrb[9].mxu1 }
 0x1ef   : > { %v11156_v62 = vpop.f32.mrb[10].mxu1 }
 0x1f0   : > { %v11158_v36 = vpop.f32.mrb[11].mxu1 }
 0x1f5   : > { %v11160_v15 = vpop.f32.mrb[12].mxu1 }
 0x1f6   : > { %v11162_v28 = vpop.f32.mrb[13].mxu1 }
 0x1f7   : > { %v11164_v26 = vpop.f32.mrb[14].mxu1 }
 0x1f8   : > { %v11166_v55 = vpop.f32.mrb[15].mxu1 }
 0x201   : > { %v11168_v12 = vpop.f32.mrb[16].mxu1 }
 0x202   : > { %v11170_v63 = vpop.f32.mrb[17].mxu1 }
 0x203   : > { %v11172_v24 = vpop.f32.mrb[18].mxu1 }
 0x204   : > { %v11174_v9 = vpop.f32.mrb[19].mxu1 }
 0x24f   : > { %v8685_v31 = vpop.f32.mrb[0].mxu0 }
 0x250   : > { %v8991_v39 = vadd.f32 %v8685_v31, %v8397_v42  ;;  %v3509_v35 = vpop.f32.mrb[1].mxu0 }
 0x251   : > { %v8992_v41 = vadd.f32 %v3509_v35, %v697_v3  ;;  %v8686_v40 = vpop.f32.mrb[2].mxu0  ;;  %v11223_v3 = vadd.s32 8, %v3656_v54 }
 0x252   : > { %v3617_v14 = vadd.f32 %v8991_v39, %v11183_v2  ;;  %v8993_v38 = vadd.f32 %v8686_v40, %v8398_v11  ;;  %v3512_v45 = vpop.f32.mrb[3].mxu0 }
 0x253   : > { %v3615_v10 = vadd.f32 %v8992_v41, %v11183_v2  ;;  %v8994_v21 = vadd.f32 %v3512_v45, %v11142_v37 }
 0x254   : > { %v3637_v6 = vmax.f32 %v3617_v14, 0.0  ;;  %v3618_v16 = vadd.f32 %v8993_v38, %v11183_v2  ;;  %v4041_v14 = vld [vmem:[#allocation2 + $0xc] sm:$0xf] }
 0x255   : > { %v3635_v61 = vmax.f32 %v3615_v10, 0.0  ;;  %v3616_v13 = vadd.f32 %v8994_v21, %v11183_v2  ;;  %v4032_v21 = vld [vmem:[#allocation2] sm:$0xf] }
 0x256   : > { %v3718_v60 = vsel %vm11190_vm15, %v3637_v6, 0.0  ;;  %v3638_v5 = vmax.f32 %v3618_v16, 0.0 }
 0x257   : > { %v8054_v0 = vpack.c.bf16 %v3718_v60, %v3718_v60  ;;  %v3716_v19 = vsel %vm11198_vm3, %v3635_v61, 0.0  ;;  %v3636_v57 = vmax.f32 %v3616_v13, 0.0  ;;  %v8689_v46 = vpop.f32.mrb[4].mxu0 }
 0x258   : > { %v8052_v17 = vpack.c.bf16 %v3716_v19, %v3716_v19  ;;  %v3719_v20 = vsel %vm11190_vm15, %v3638_v5, 0.0  ;;  %v8995_v50 = vadd.f32 %v8689_v46, %v11144_v18  ;;  %v3525_v42 = vpop.f32.mrb[5].mxu0  ;;  %vm11239_vm15 = vmand %vm4029_vm10, %vm4030_vm13  ;;  %v4045_v5 = vld [vmem:[#allocation2 + $0x14] sm:$0x1] }
 0x259   : > { %v3847_v11 = vshrl.u32 %v8054_v0, 16  ;;  %v3850_v37 = vshll.u32 %v8054_v0, 16  ;;  %v8055_v52 = vpack.c.bf16 %v3719_v20, %v3719_v20  ;;  %v3717_v34 = vsel %vm11198_vm3, %v3636_v57, 0.0  ;;  %v8690_v23 = vpop.f32.mrb[6].mxu0  ;;  %vm11247_vm3 = vmor %vm3826_vm14, %vm3827_vm0  ;;  %v4038_v20 = vld [vmem:[#allocation2 + $0x8] sm:$0x1] }
 0x25a   : > { %v3830_v8 = vshrl.u32 %v8052_v17, 16  ;;  %v3833_v30 = vshll.u32 %v8052_v17, 16  ;;  %v8053_v58 = vpack.c.bf16 %v3717_v34, %v3717_v34  ;;  %v3621_v51 = vadd.f32 %v8995_v50, %v11183_v2  ;;  %v3528_v31 = vpop.f32.mrb[7].mxu0  ;;  %vm11254_vm10 = vmand %vm4036_vm1, %vm3826_vm14 }
 0x25b   : > { %v3849_v39 = vrot.slane %v3847_v11, 7  ;;  %v3855_v35 = vshrl.u32 %v8055_v52, 16  ;;  %v3858_v41 = vshll.u32 %v8055_v52, 16  ;;  %v8996_v54 = vadd.f32 %v3525_v42, %v11146_v29  ;;  %vm11266_vm13 = vmand %vm3668_vm4, %vm3678_vm6 }
 0x25c   : > { %v3832_v38 = vrot.slane %v3830_v8, 7  ;;  %v3838_v45 = vshrl.u32 %v8053_v58, 16  ;;  %v3841_v22 = vshll.u32 %v8053_v58, 16  ;;  %v3641_v43 = vmax.f32 %v3621_v51, 0.0  ;;  %vm11299_vm14 = vmand %vm3671_vm8, %vm3681_vm9 }
 0x25d   : > { %v3852_v29 = vor.u32 %v3850_v37, %v3849_v39  ;;  %v3853_v10 = vrot.slane %v3849_v39, 4  ;;  %v3857_v4 = vrot.slane %v3855_v35, 7  ;;  %v3619_v16 = vadd.f32 %v8996_v54, %v11183_v2  ;;  %vm11312_vm0 = vmand %vm3670_vm11, %vm3680_vm12 }
 0x25e   : > { %v3835_v61 = vor.u32 %v3833_v30, %v3832_v38  ;;  %v3836_v13 = vrot.slane %v3832_v38, 4  ;;  %v3840_v0 = vrot.slane %v3838_v45, 7  ;;  %v3722_v19 = vsel %vm11230_vm7, %v3641_v43, 0.0 }
 0x25f   : > { %v4042_v57 = vsel %vm11239_vm15, %v3852_v29, %v4041_v14  ;;  %v3860_v46 = vor.u32 %v3858_v41, %v3857_v4  ;;  %v3862_v17 = vrot.slane %v3857_v4, 4  ;;  %v8058_v50 = vpack.c.bf16 %v3722_v19, %v3722_v19  ;;  %v8693_v11 = vpop.f32.mrb[8].mxu0 }
 0x260   : > { %4043 = vst [vmem:[#allocation2 + $0xc] sm:$0xf] %v4042_v57  ;;  %v4033_v37 = vsel %vm11239_vm15, %v3835_v61, %v4032_v21  ;;  %v3843_v52 = vor.u32 %v3841_v22, %v3840_v0  ;;  %v3845_v34 = vrot.slane %v3840_v0, 4  ;;  %v3639_v8 = vmax.f32 %v3619_v16, 0.0  ;;  %v3541_v30 = vpop.f32.mrb[9].mxu0 }
 0x261   : > { %4034 = vst [vmem:[#allocation2] sm:$0xf] %v4033_v37  ;;  %v3861_v58 = vsel %vm11247_vm3, %v3853_v10, %v3860_v46  ;;  %v4046_v53 = vsel %vm11254_vm10, %v3862_v17, %v4045_v5  ;;  %v3881_v51 = vshrl.u32 %v8058_v50, 16  ;;  %v3884_v39 = vshll.u32 %v8058_v50, 16  ;;  %v8694_v35 = vpop.f32.mrb[10].mxu0 }
 0x262   : > { %4044 = vst [vmem:[#allocation2 + $0x10] sm:$0xf] %v3861_v58  ;;  %4047 = vst [vmem:[#allocation2 + $0x14] sm:$0x1] %v4046_v53  ;;  %v3844_v41 = vsel %vm11247_vm3, %v3836_v13, %v3843_v52  ;;  %v4039_v54 = vsel %vm11254_vm10, %v3845_v34, %v4038_v20  ;;  %v3720_v14 = vsel %vm11266_vm13, %v3639_v8, 0.0  ;;  %v8997_v38 = vadd.f32 %v8690_v23, %v11148_v56  ;;  %v3544_v45 = vpop.f32.mrb[11].mxu0 }
 0x263   : > { %4035 = vst [vmem:[#allocation2 + $0x4] sm:$0xf] %v3844_v41  ;;  %4040 = vst [vmem:[#allocation2 + $0x8] sm:$0x1] %v4039_v54  ;;  %v11283_v22 = vrot.slane %v3881_v51, 7  ;;  %v8056_v43 = vpack.c.bf16 %v3720_v14, %v3720_v14  ;;  %v8998_v29 = vadd.f32 %v3528_v31, %v11150_v47  ;;  %v8999_v10 = vadd.f32 %v8693_v11, %v11152_v7 }
 0x264   : > { %v4055_v21 = vld [vmem:[#allocation2 + $0x24] sm:$0xf]  ;;  %v3622_v4 = vadd.f32 %v8997_v38, %v11183_v2  ;;  %v9000_v16 = vadd.f32 %v3541_v30, %v11154_v59  ;;  %v9001_v61 = vadd.f32 %v8694_v35, %v11156_v62  ;;  %v9002_v13 = vadd.f32 %v3544_v45, %v11158_v36  ;;  %v4048_v57 = vld [vmem:[#allocation2 + $0x18] sm:$0xf]  ;;  %v4069_v46 = vld [vmem:[#allocation2 + $0x3c] sm:$0xf] }
 0x265   : > { %v3886_v56 = vor.u32 %v3884_v39, %v11283_v22  ;;  %v3887_v23 = vrot.slane %v11283_v22, 4  ;;  %v3864_v5 = vshrl.u32 %v8056_v43, 16  ;;  %v3867_v0 = vshll.u32 %v8056_v43, 16 }
 0x266   : > { %v3642_v19 = vmax.f32 %v3622_v4, 0.0  ;;  %v3620_v47 = vadd.f32 %v8998_v29, %v11183_v2  ;;  %v3625_v7 = vadd.f32 %v8999_v10, %v11183_v2  ;;  %v3623_v62 = vadd.f32 %v9000_v16, %v11183_v2  ;;  %v4059_v4 = vld [vmem:[#allocation2 + $0x2c] sm:$0x1] }
 0x267   : > { %v4056_v36 = vsel %vm11239_vm15, %v3886_v56, %v4055_v21  ;;  %v11306_v31 = vrot.slane %v3864_v5, 7  ;;  %v3626_v49 = vadd.f32 %v9001_v61, %v11183_v2  ;;  %v3624_v17 = vadd.f32 %v9002_v13, %v11183_v2  ;;  %v11318_v20 = vpop.f32.mrb[12].mxu0 }
 0x268   : > { %4057 = vst [vmem:[#allocation2 + $0x24] sm:$0xf] %v4056_v36  ;;  %v3723_v50 = vsel %vm11230_vm7, %v3642_v19, 0.0  ;;  %v3640_v11 = vmax.f32 %v3620_v47, 0.0  ;;  %v3645_v37 = vmax.f32 %v3625_v7, 0.0  ;;  %v3643_v52 = vmax.f32 %v3623_v62, 0.0 }
 0x269   : > { %v11322_v34 = vpop.f32.mrb[13].mxu0  ;;  %v3869_v25 = vor.u32 %v3867_v0, %v11306_v31  ;;  %v3870_v8 = vrot.slane %v11306_v31, 4  ;;  %v8059_v30 = vpack.c.bf16 %v3723_v50, %v3723_v50  ;;  %v3646_v58 = vmax.f32 %v3626_v49, 0.0  ;;  %v4052_v62 = vld [vmem:[#allocation2 + $0x20] sm:$0x1] }
 0x26a   : > { %v11326_v53 = vpop.f32.mrb[14].mxu0  ;;  %v3721_v51 = vsel %vm11266_vm13, %v3640_v11, 0.0  ;;  %v3726_v18 = vsel %vm11299_vm14, %v3645_v37, 0.0  ;;  %v3724_v39 = vsel %vm11312_vm0, %v3643_v52, 0.0  ;;  %v3644_v35 = vmax.f32 %v3624_v17, 0.0 }
 0x26b   : > { %v11334_v41 = vpop.f32.mrb[15].mxu0  ;;  %v4049_v54 = vsel %vm11239_vm15, %v3869_v25, %v4048_v57  ;;  %v3889_v14 = vshrl.u32 %v8059_v30, 16  ;;  %v3892_v38 = vshll.u32 %v8059_v30, 16  ;;  %v8057_v45 = vpack.c.bf16 %v3721_v51, %v3721_v51 }
 0x26c   : > { %4050 = vst [vmem:[#allocation2 + $0x18] sm:$0xf] %v4049_v54  ;;  %v8062_v43 = vpack.c.bf16 %v3726_v18, %v3726_v18  ;;  %v8060_v29 = vpack.c.bf16 %v3724_v39, %v3724_v39  ;;  %v3727_v42 = vsel %vm11299_vm14, %v3646_v58, 0.0  ;;  %v3725_v10 = vsel %vm11312_vm0, %v3644_v35, 0.0  ;;  %v4062_v58 = vld [vmem:[#allocation2 + $0x30] sm:$0xf] }
 0x26d   : > { %vm3673_vm1 = vcmp.ge.s32.totalorder %v11212_v33, 0  ;;  %vm3683_vm4 = vcmp.lt.s32.totalorder %v11212_v33, 16  ;;  %v3891_v21 = vrot.slane %v3889_v14, 7  ;;  %v3872_v16 = vshrl.u32 %v8057_v45, 16 }
 0x26e   : > { %v3875_v61 = vshll.u32 %v8057_v45, 16  ;;  %v8063_v13 = vpack.c.bf16 %v3727_v42, %v3727_v42  ;;  %v3915_v56 = vshrl.u32 %v8062_v43, 16  ;;  %v3918_v5 = vshll.u32 %v8062_v43, 16  ;;  %v4073_v42 = vld [vmem:[#allocation2 + $0x44] sm:$0x1]  ;;  %vm11382_vm13 = vmand %vm3673_vm1, %vm3683_vm4 }
 0x26f   : > { %v3898_v0 = vshrl.u32 %v8060_v29, 16  ;;  %v3901_v19 = vshll.u32 %v8060_v29, 16  ;;  %vm3672_vm6 = vcmp.ge.s32.totalorder %v11214_v32, 0  ;;  %vm3682_vm7 = vcmp.lt.s32.totalorder %v11214_v32, 16  ;;  %v8701_v31 = vpop.f32.mrb[16].mxu0 }
 0x270   : > { %v3894_v47 = vor.u32 %v3892_v38, %v3891_v21  ;;  %v3896_v7 = vrot.slane %v3891_v21, 4  ;;  %v3874_v59 = vrot.slane %v3872_v16, 7  ;;  %v3923_v36 = vshrl.u32 %v8063_v13, 16  ;;  %v3573_v11 = vpop.f32.mrb[17].mxu0  ;;  %vm11397_vm14 = vmand %vm3672_vm6, %vm3682_vm7 }
 0x271   : > { %v3917_v57 = vrot.slane %v3915_v56, 7  ;;  %v3900_v49 = vrot.slane %v3898_v0, 7  ;;  %v3926_v17 = vshll.u32 %v8063_v13, 16  ;;  %v8061_v50 = vpack.c.bf16 %v3725_v10, %v3725_v10  ;;  %v8702_v51 = vpop.f32.mrb[18].mxu0  ;;  %v4066_v13 = vld [vmem:[#allocation2 + $0x38] sm:$0x1] }
 0x272   : > { %vm3675_vm8 = vcmp.ge.s32.totalorder %v11218_v44, 0  ;;  %vm3685_vm9 = vcmp.lt.s32.totalorder %v11218_v44, 16  ;;  %v3895_v37 = vsel %vm11247_vm3, %v3887_v23, %v3894_v47  ;;  %v4060_v52 = vsel %vm11254_vm10, %v3896_v7, %v4059_v4  ;;  %v3576_v14 = vpop.f32.mrb[19].mxu0 }
 0x273   : > { %v3877_v25 = vor.u32 %v3875_v61, %v3874_v59  ;;  %v3879_v30 = vrot.slane %v3874_v59, 4  ;;  %4058 = vst [vmem:[#allocation2 + $0x28] sm:$0xf] %v3895_v37  ;;  %4061 = vst [vmem:[#allocation2 + $0x2c] sm:$0x1] %v4060_v52  ;;  %v3920_v18 = vor.u32 %v3918_v5, %v3917_v57  ;;  %v3921_v39 = vrot.slane %v3917_v57, 4 }
 0x274   : > { %v3903_v35 = vor.u32 %v3901_v19, %v3900_v49  ;;  %v3904_v54 = vrot.slane %v3900_v49, 4  ;;  %v3925_v38 = vrot.slane %v3923_v36, 7  ;;  %v3906_v45 = vshrl.u32 %v8061_v50, 16  ;;  %vm11409_vm0 = vmand %vm3675_vm8, %vm3685_vm9  ;;  %v11482_v40 = vld [vmem:[#allocation2 + $0x18] sm:$0xf] }
 0x275   : > { %v3878_v22 = vsel %vm11247_vm3, %v3870_v8, %v3877_v25  ;;  %v4053_v23 = vsel %vm11254_vm10, %v3879_v30, %v4052_v62  ;;  %v4070_v43 = vsel %vm11239_vm15, %v3920_v18, %v4069_v46  ;;  %v3909_v10 = vshll.u32 %v8061_v50, 16 }
 0x276   : > { %4051 = vst [vmem:[#allocation2 + $0x1c] sm:$0xf] %v3878_v22  ;;  %4054 = vst [vmem:[#allocation2 + $0x20] sm:$0x1] %v4053_v23  ;;  %v4063_v29 = vsel %vm11239_vm15, %v3903_v35, %v4062_v58  ;;  %v9003_v21 = vadd.f32 %v11318_v20, %v11160_v15  ;;  %vm3674_vm11 = vcmp.ge.s32.totalorder %v11223_v3, 0  ;;  %vm3684_vm12 = vcmp.lt.s32.totalorder %v11223_v3, 16 }
 0x277   : > { %4071 = vst [vmem:[#allocation2 + $0x3c] sm:$0xf] %v4070_v43  ;;  %4064 = vst [vmem:[#allocation2 + $0x30] sm:$0xf] %v4063_v29  ;;  %v3928_v8 = vor.u32 %v3926_v17, %v3925_v38  ;;  %v3930_v4 = vrot.slane %v3925_v38, 4  ;;  %v3908_v16 = vrot.slane %v3906_v45, 7  ;;  %v9004_v61 = vadd.f32 %v11322_v34, %v11162_v28 }
 0x278   : > { %v3629_v56 = vadd.f32 %v9003_v21, %v11183_v2  ;;  %v9005_v5 = vadd.f32 %v11326_v53, %v11164_v26  ;;  %v9006_v15 = vadd.f32 %v11334_v41, %v11166_v55  ;;  %v9007_v20 = vadd.f32 %v8701_v31, %v11168_v12  ;;  %v4083_v22 = vld [vmem:[#allocation2 + $0x54] sm:$0xf]  ;;  %vm11429_vm1 = vmand %vm3674_vm11, %vm3684_vm12 }
 0x279   : > { %v3929_v0 = vsel %vm11247_vm3, %v3921_v39, %v3928_v8  ;;  %v4074_v19 = vsel %vm11254_vm10, %v3930_v4, %v4073_v42  ;;  %v3911_v47 = vor.u32 %v3909_v10, %v3908_v16  ;;  %v3913_v7 = vrot.slane %v3908_v16, 4 }
 0x27a   : > { %4072 = vst [vmem:[#allocation2 + $0x40] sm:$0xf] %v3929_v0  ;;  %4075 = vst [vmem:[#allocation2 + $0x44] sm:$0x1] %v4074_v19  ;;  %v3649_v26 = vmax.f32 %v3629_v56, 0.0  ;;  %v3627_v55 = vadd.f32 %v9004_v61, %v11183_v2  ;;  %v3630_v12 = vadd.f32 %v9005_v5, %v11183_v2  ;;  %v3628_v34 = vadd.f32 %v9006_v15, %v11183_v2 }
 0x27b   : > { %v3912_v53 = vsel %vm11247_vm3, %v3904_v54, %v3911_v47  ;;  %v4067_v41 = vsel %vm11254_vm10, %v3913_v7, %v4066_v13  ;;  %v3633_v59 = vadd.f32 %v9007_v20, %v11183_v2  ;;  %v9008_v62 = vadd.f32 %v3573_v11, %v11170_v63  ;;  %v4087_v61 = vld [vmem:[#allocation2 + $0x5c] sm:$0x1]  ;;  %v4080_v56 = vld [vmem:[#allocation2 + $0x50] sm:$0x1]  ;;  %v4097_v7 = vld [vmem:[#allocation2 + $0x6c] sm:$0xf] }
 0x27c   : > { %4065 = vst [vmem:[#allocation2 + $0x34] sm:$0xf] %v3912_v53  ;;  %4068 = vst [vmem:[#allocation2 + $0x38] sm:$0x1] %v4067_v41  ;;  %v3730_v36 = vsel %vm11382_vm13, %v3649_v26, 0.0  ;;  %v3647_v31 = vmax.f32 %v3627_v55, 0.0  ;;  %v9009_v50 = vadd.f32 %v8702_v51, %v11172_v24  ;;  %v9010_v25 = vadd.f32 %v3576_v14, %v11174_v9 }
 0x27d   : > { %v3650_v57 = vmax.f32 %v3630_v12, 0.0  ;;  %v3648_v46 = vmax.f32 %v3628_v34, 0.0  ;;  %v8066_v49 = vpack.c.bf16 %v3730_v36, %v3730_v36  ;;  %v3653_v17 = vmax.f32 %v3633_v59, 0.0  ;;  %v4076_v14 = vld [vmem:[#allocation2 + $0x48] sm:$0xf] }
 0x27e   : > { %v3631_v63 = vadd.f32 %v9008_v62, %v11183_v2  ;;  %v3728_v11 = vsel %vm11397_vm14, %v3647_v31, 0.0  ;;  %v3634_v51 = vadd.f32 %v9009_v50, %v11183_v2  ;;  %v11443_v59 = vld [vmem:[#allocation2] sm:$0xf]  ;;  %v11480_v9 = vld [vmem:[#allocation2 + $0x14] sm:$0x1] }
 0x27f   : > { %v3731_v37 = vsel %vm11382_vm13, %v3650_v57, 0.0  ;;  %v3729_v52 = vsel %vm11397_vm14, %v3648_v46, 0.0  ;;  %v3949_v44 = vshrl.u32 %v8066_v49, 16  ;;  %v3952_v30 = vshll.u32 %v8066_v49, 16  ;;  %v11452_v46 = vld [vmem:[#allocation2 + $0x4] sm:$0xf] }
 0x280   : > { %v8064_v58 = vpack.c.bf16 %v3728_v11, %v3728_v11  ;;  %v8067_v18 = vpack.c.bf16 %v3731_v37, %v3731_v37  ;;  %v8065_v39 = vpack.c.bf16 %v3729_v52, %v3729_v52  ;;  %v3734_v35 = vsel %vm11409_vm0, %v3653_v17, 0.0  ;;  %v4090_v37 = vld [vmem:[#allocation2 + $0x60] sm:$0xf] }
 0x281   : > { %v3651_v24 = vmax.f32 %v3631_v63, 0.0  ;;  %v3951_v54 = vrot.slane %v3949_v44, 7  ;;  %v8070_v10 = vpack.c.bf16 %v3734_v35, %v3734_v35  ;;  %v3654_v33 = vmax.f32 %v3634_v51, 0.0 }
 0x282   : > { %v3932_v23 = vshrl.u32 %v8064_v58, 16  ;;  %v3935_v38 = vshll.u32 %v8064_v58, 16  ;;  %v3957_v45 = vshrl.u32 %v8067_v18, 16  ;;  %v3960_v43 = vshll.u32 %v8067_v18, 16  ;;  %v11463_v18 = vld [vmem:[#allocation2 + $0x8] sm:$0x1] }
 0x283   : > { %v3940_v29 = vshrl.u32 %v8065_v39, 16  ;;  %v3943_v42 = vshll.u32 %v8065_v39, 16  ;;  %v3954_v21 = vor.u32 %v3952_v30, %v3951_v54  ;;  %v3955_v8 = vrot.slane %v3951_v54, 4 }
 0x284   : > { %v3934_v4 = vrot.slane %v3932_v23, 7  ;;  %v3959_v16 = vrot.slane %v3957_v45, 7  ;;  %v3983_v5 = vshrl.u32 %v8070_v10, 16  ;;  %v3986_v15 = vshll.u32 %v8070_v10, 16  ;;  %v11468_v23 = vld [vmem:[#allocation2 + $0xc] sm:$0xf] }
 0x285   : > { %v3942_v13 = vrot.slane %v3940_v29, 7  ;;  %v3732_v3 = vsel %vm11429_vm1, %v3651_v24, 0.0  ;;  %v4084_v20 = vsel %vm11239_vm15, %v3954_v21, %v4083_v22  ;;  %v3735_v50 = vsel %vm11409_vm0, %v3654_v33, 0.0  ;;  %v4101_v21 = vld [vmem:[#allocation2 + $0x74] sm:$0x1] }
 0x286   : > { %v3937_v0 = vor.u32 %v3935_v38, %v3934_v4  ;;  %v3938_v19 = vrot.slane %v3934_v4, 4  ;;  %v3962_v47 = vor.u32 %v3960_v43, %v3959_v16  ;;  %4085 = vst [vmem:[#allocation2 + $0x54] sm:$0xf] %v4084_v20  ;;  %v3964_v28 = vrot.slane %v3959_v16, 4 }
 0x287   : > { %v3945_v26 = vor.u32 %v3943_v42, %v3942_v13  ;;  %v3947_v55 = vrot.slane %v3942_v13, 4  ;;  %v11437_v12 = vrot.slane %v3983_v5, 7  ;;  %v8068_v41 = vpack.c.bf16 %v3732_v3, %v3732_v3 }
 0x288   : > { %v4077_v34 = vsel %vm11239_vm15, %v3937_v0, %v4076_v14  ;;  %v3963_v53 = vsel %vm11247_vm3, %v3955_v8, %v3962_v47  ;;  %v4088_v62 = vsel %vm11254_vm10, %v3964_v28, %v4087_v61  ;;  %v8071_v52 = vpack.c.bf16 %v3735_v50, %v3735_v50  ;;  %v4094_v28 = vld [vmem:[#allocation2 + $0x68] sm:$0x1] }
 0x289   : > { %4078 = vst [vmem:[#allocation2 + $0x48] sm:$0xf] %v4077_v34  ;;  %4086 = vst [vmem:[#allocation2 + $0x58] sm:$0xf] %v3963_v53  ;;  %v3946_v36 = vsel %vm11247_vm3, %v3938_v19, %v3945_v26  ;;  %v4081_v31 = vsel %vm11254_vm10, %v3947_v55, %v4080_v56  ;;  %v3988_v57 = vor.u32 %v3986_v15, %v11437_v12  ;;  %v3989_v49 = vrot.slane %v11437_v12, 4 }
 0x28a   : > { %4089 = vst [vmem:[#allocation2 + $0x5c] sm:$0x1] %v4088_v62  ;;  %4079 = vst [vmem:[#allocation2 + $0x4c] sm:$0xf] %v3946_v36  ;;  %v3966_v17 = vshrl.u32 %v8068_v41, 16  ;;  %v3969_v63 = vshll.u32 %v8068_v41, 16  ;;  %v3632_v44 = vadd.f32 %v9010_v25, %v11183_v2 }
 0x28b   : > { %4082 = vst [vmem:[#allocation2 + $0x50] sm:$0x1] %v4081_v31  ;;  %v4098_v11 = vsel %vm11239_vm15, %v3988_v57, %v4097_v7  ;;  %v4145_v30 = vshrl.u32 %v11443_v59, 16  ;;  %v4148_v39 = vshll.u32 %v11443_v59, 16  ;;  %v4154_v35 = vshll.u32 %v11452_v46, 16 }
 0x28c   : > { %4099 = vst [vmem:[#allocation2 + $0x6c] sm:$0xf] %v4098_v11  ;;  %v11461_v58 = vrot.slane %v3966_v17, 7  ;;  %v4158_v32 = vshrl.u32 %v11452_v46, 16  ;;  %v3991_v24 = vshrl.u32 %v8071_v52, 16  ;;  %v3994_v51 = vshll.u32 %v8071_v52, 16 }
 0x28d   : > { %v3652_v54 = vmax.f32 %v3632_v44, 0.0  ;;  %v4147_v22 = vrot.slane %v4145_v30, 4  ;;  %v4150_v38 = vrot.slane %v4148_v39, 5  ;;  %v4156_v45 = vrot.slane %v4154_v35, 5  ;;  %v11478_v15 = vld [vmem:[#allocation2 + $0x10] sm:$0xf] }
 0x28e   : > { %v3971_v2 = vor.u32 %v3969_v63, %v11461_v58  ;;  %v3972_v25 = vrot.slane %v11461_v58, 4  ;;  %v3993_v14 = vrot.slane %v3991_v24, 7  ;;  %v4160_v29 = vrot.slane %v4158_v32, 4  ;;  %v11489_v12 = vld [vmem:[#allocation2 + $0x1c] sm:$0xf] }
 0x28f   : > { %v3733_v43 = vsel %vm11429_vm1, %v3652_v54, 0.0  ;;  %v4164_v42 = vshll.u32 %v11463_v18, 16  ;;  %v4151_v4 = vor.u32 %v4150_v38, %v4147_v22  ;;  %v4169_v16 = vshrl.u32 %v11468_v23, 16  ;;  %v11499_v11 = vld [vmem:[#allocation2 + $0x20] sm:$0x1] }
 0x290   : > { %v4091_v10 = vsel %vm11239_vm15, %v3971_v2, %v4090_v37  ;;  %v8069_v8 = vpack.c.bf16 %v3733_v43, %v3733_v43  ;;  %v3996_v61 = vor.u32 %v3994_v51, %v3993_v14  ;;  %v3998_v13 = vrot.slane %v3993_v14, 4  ;;  %v11501_v58 = vld [vmem:[#allocation2 + $0x24] sm:$0xf]  ;;  %v11511_v38 = vld [vmem:[#allocation2 + $0x28] sm:$0xf] }
 0x291   : > { %4092 = vst [vmem:[#allocation2 + $0x60] sm:$0xf] %v4091_v10  ;;  %v4161_v56 = vor.u32 %v4160_v29, %v4156_v45  ;;  %v4166_v5 = vrot.slane %v4164_v42, 5  ;;  %v4152_v0 = vrot.slane %v4151_v4, 4  ;;  %v4171_v19 = vrot.slane %v4169_v16, 4 }
 0x292   : > { %v3974_v3 = vshrl.u32 %v8069_v8, 16  ;;  %v3977_v20 = vshll.u32 %v8069_v8, 16  ;;  %v3997_v47 = vsel %vm11247_vm3, %v3989_v49, %v3996_v61  ;;  %v4102_v7 = vsel %vm11254_vm10, %v3998_v13, %v4101_v21  ;;  %v11520_v61 = vld [vmem:[#allocation2 + $0x30] sm:$0xf] }
 0x293   : > { %v4162_v26 = vrot.slane %v4161_v56, 4  ;;  %v4172_v55 = vshll.u32 %v11468_v23, 16  ;;  %4100 = vst [vmem:[#allocation2 + $0x70] sm:$0xf] %v3997_v47  ;;  %4103 = vst [vmem:[#allocation2 + $0x74] sm:$0x1] %v4102_v7  ;;  %v4157_v53 = vsel %vm10238_vm5, %v4152_v0, %v4156_v45 }
 0x294   : > { %v3976_v34 = vrot.slane %v3974_v3, 7  ;;  %v4178_v41 = vshll.u32 %v11478_v15, 16  ;;  %v4182_v33 = vshrl.u32 %v11478_v15, 16  ;;  %v4188_v31 = vshll.u32 %v11480_v9, 16  ;;  %v11513_v45 = vld [vmem:[#allocation2 + $0x2c] sm:$0x1] }
 0x295   : > { %v4167_v62 = vsel %vm10238_vm5, %v4162_v26, %v4166_v5  ;;  %v4174_v36 = vrot.slane %v4172_v55, 5  ;;  %v4193_v57 = vshrl.u32 %v11482_v40, 16  ;;  %v4196_v32 = vshll.u32 %v11482_v40, 16  ;;  %v11528_v26 = vld [vmem:[#allocation2 + $0x3c] sm:$0xf] }
 0x296   : > { %v3979_v49 = vor.u32 %v3977_v20, %v3976_v34  ;;  %v3981_v17 = vrot.slane %v3976_v34, 4  ;;  %v7852_v63 = vcombine.low %v4157_v53, %v4167_v62  ;;  %v4180_v50 = vrot.slane %v4178_v41, 5  ;;  %v11526_v20 = vld [vmem:[#allocation2 + $0x34] sm:$0xf]  ;;  %v11530_v41 = vld [vmem:[#allocation2 + $0x38] sm:$0x1] }
 0x297   : > { %v4175_v37 = vor.u32 %v4174_v36, %v4171_v19  ;;  %v4184_v52 = vrot.slane %v4182_v33, 4  ;;  %v4190_v44 = vrot.slane %v4188_v31, 5  ;;  %v4195_v30 = vrot.slane %v4193_v57, 4  ;;  %v9479_v19 = vld [vmem:[#allocation3 + $0x8] sm:$0xff]  }
 0x298   : > { %v3980_v39 = vsel %vm11247_vm3, %v3972_v25, %v3979_v49  ;;  %v4095_v35 = vsel %vm11254_vm10, %v3981_v17, %v4094_v28  ;;  %8719 = vmatprep.mubr.bf16.mxu1 %v7852_v63  ;;  %v4202_v24 = vshll.u32 %v11489_v12, 16  ;;  %v4206_v22 = vshrl.u32 %v11489_v12, 16 }
 0x299   : > { %4093 = vst [vmem:[#allocation2 + $0x64] sm:$0xf] %v3980_v39  ;;  %4096 = vst [vmem:[#allocation2 + $0x68] sm:$0x1] %v4095_v35  ;;  %v4176_v51 = vrot.slane %v4175_v37, 4  ;;  %v4185_v54 = vor.u32 %v4184_v52, %v4180_v50  ;;  %v4212_v2 = vshll.u32 %v11499_v11, 16 }
 0x29a   : > { %v4198_v6 = vrot.slane %v4196_v32, 5  ;;  %v4204_v25 = vrot.slane %v4202_v24, 5  ;;  %v4217_v60 = vshrl.u32 %v11501_v58, 16  ;;  %v4220_v14 = vshll.u32 %v11501_v58, 16  ;;  %v11541_v37 = vld [vmem:[#allocation2 + $0x40] sm:$0xf] }
 0x29b   : > { %v4181_v43 = vsel %vm10238_vm5, %v4176_v51, %v4180_v50  ;;  %v4186_v29 = vrot.slane %v4185_v54, 4  ;;  %v4208_v42 = vrot.slane %v4206_v22, 4  ;;  %v4214_v10 = vrot.slane %v4212_v2, 5  ;;  %v11546_v51 = vld [vmem:[#allocation2 + $0x44] sm:$0x1] }
 0x29c   : > { %v4199_v21 = vor.u32 %v4198_v6, %v4195_v30  ;;  %v4219_v8 = vrot.slane %v4217_v60, 4  ;;  %v4222_v4 = vrot.slane %v4220_v14, 5  ;;  %v4226_v16 = vshll.u32 %v11511_v38, 16  ;;  %v9480_v30 = vld [vmem:[#allocation3 + $0x10] sm:$0xff]  }
 0x29d   : > { %v4191_v13 = vsel %vm10238_vm5, %v4186_v29, %v4190_v44  ;;  %v4209_v56 = vor.u32 %v4208_v42, %v4204_v25  ;;  %v4230_v5 = vshrl.u32 %v11511_v38, 16  ;;  %v4236_v3 = vshll.u32 %v11513_v45, 16  ;;  %v11552_v60 = vld [vmem:[#allocation2 + $0x48] sm:$0xf] }
 0x29e   : > { %v7853_v0 = vcombine.low %v4181_v43, %v4191_v13  ;;  %v4200_v47 = vrot.slane %v4199_v21, 4  ;;  %v4223_v7 = vor.u32 %v4222_v4, %v4219_v8  ;;  %v4228_v28 = vrot.slane %v4226_v16, 5  ;;  %v9481_v8 = vld [vmem:[#allocation3 + $0x18] sm:$0xff]  }
 0x29f   : > { %v4210_v55 = vrot.slane %v4209_v56, 4  ;;  %v4232_v34 = vrot.slane %v4230_v5, 4  ;;  %v4238_v53 = vrot.slane %v4236_v3, 5  ;;  %v4241_v33 = vshrl.u32 %v11520_v61, 16  ;;  %v11558_v56 = vld [vmem:[#allocation2 + $0x50] sm:$0x1] }
 0x2a0   : > { %8720 = vmatmul.mubr.bf16.vlgmr.msra.gmra.mrb[20].mxu1 %v7853_v0  ;;  %v4205_v62 = vsel %vm10238_vm5, %v4200_v47, %v4204_v25  ;;  %v4224_v36 = vrot.slane %v4223_v7, 4  ;;  %v4244_v31 = vshll.u32 %v11520_v61, 16  ;;  %v4250_v57 = vshll.u32 %v11526_v20, 16  ;;  %v11560_v5 = vld [vmem:[#allocation2 + $0x54] sm:$0xf] }
 0x2a1   : > { %8736 = vmatpush3.bf16.msra.mxu1 %v11176_v1  ;;  %v4215_v49 = vsel %vm10238_vm5, %v4210_v55, %v4214_v10  ;;  %v4233_v17 = vor.u32 %v4232_v34, %v4228_v28  ;;  %v4243_v63 = vrot.slane %v4241_v33, 4  ;;  %v4254_v50 = vshrl.u32 %v11526_v20, 16  ;;  %v11556_v10 = vld [vmem:[#allocation2 + $0x4c] sm:$0xf]  ;;  %v11564_v7 = vld [vmem:[#allocation2 + $0x58] sm:$0xf] }
 0x2a2   : > { %8737 = vmatprep.subr.bf16.mxu1 %v9479_v19  ;;  %v7854_v52 = vcombine.low %v4205_v62, %v4215_v49  ;;  %v4229_v44 = vsel %vm10238_vm5, %v4224_v36, %v4228_v28  ;;  %v4246_v39 = vrot.slane %v4244_v31, 5  ;;  %v4252_v35 = vrot.slane %v4250_v57, 5 }
 0x2a3   : > { %v4234_v32 = vrot.slane %v4233_v17, 4  ;;  %v4256_v24 = vrot.slane %v4254_v50, 4  ;;  %v4260_v1 = vshll.u32 %v11530_v41, 16  ;;  %v4265_v54 = vshrl.u32 %v11528_v26, 16  ;;  %v9482_v17 = vld [vmem:[#allocation3 + $0x20] sm:$0xff]  }
 0x2a4   : > { %8723 = vmatprep.mubr.bf16.mxu1 %v7854_v52  ;;  %v4247_v22 = vor.u32 %v4246_v39, %v4243_v63  ;;  %v4268_v2 = vshll.u32 %v11528_v26, 16  ;;  %v4274_v6 = vshll.u32 %v11541_v37, 16  ;;  %v4278_v25 = vshrl.u32 %v11541_v37, 16 }
 0x2a5   : > { %8738 = vmatpush3.bf16.msra.mxu1 %v9479_v19  ;;  %v4239_v14 = vsel %vm10238_vm5, %v4234_v32, %v4238_v53  ;;  %v4257_v43 = vor.u32 %v4256_v24, %v4252_v35  ;;  %v4262_v29 = vrot.slane %v4260_v1, 5  ;;  %v4267_v42 = vrot.slane %v4265_v54, 4 }
 0x2a6   : > { %v7855_v21 = vcombine.low %v4229_v44, %v4239_v14  ;;  %8739 = vmatprep.subr.bf16.mxu1 %v9480_v30  ;;  %v4248_v4 = vrot.slane %v4247_v22, 4  ;;  %v4270_v16 = vrot.slane %v4268_v2, 5  ;;  %v4276_v13 = vrot.slane %v4274_v6, 5  ;;  %v11581_v2 = vld [vmem:[#allocation2 + $0x5c] sm:$0x1]  ;;  %v9483_v14 = vld [vmem:[#allocation3 + $0x28] sm:$0xff]  }
 0x2a7   : > { %v4258_v3 = vrot.slane %v4257_v43, 4  ;;  %v4280_v0 = vrot.slane %v4278_v25, 4  ;;  %v4284_v19 = vshll.u32 %v11546_v51, 16  ;;  %v4289_v47 = vshrl.u32 %v11552_v60, 16 }
 0x2a8   : > { %8724 = vmatmul.mubr.bf16.gmra.mrb[24].mxu1 %v7855_v21  ;;  %v4253_v28 = vsel %vm10238_vm5, %v4248_v4, %v4252_v35  ;;  %v4271_v55 = vor.u32 %v4270_v16, %v4267_v42  ;;  %v4292_v34 = vshll.u32 %v11552_v60, 16  ;;  %v4298_v53 = vshll.u32 %v11556_v10, 16 }
 0x2a9   : > { %8740 = vmatpush3.bf16.msra.mxu1 %v9480_v30  ;;  %v4263_v33 = vsel %vm10238_vm5, %v4258_v3, %v4262_v29  ;;  %v4281_v62 = vor.u32 %v4280_v0, %v4276_v13  ;;  %v4286_v36 = vrot.slane %v4284_v19, 5  ;;  %v4291_v31 = vrot.slane %v4289_v47, 4  ;;  %v4723_v19 = vld [vmem:[#allocation2] sm:$0xe] }
 0x2aa   : > { %8741 = vmatprep.subr.bf16.mxu1 %v9481_v8  ;;  %v7856_v57 = vcombine.low %v4253_v28, %v4263_v33  ;;  %v4272_v49 = vrot.slane %v4271_v55, 4  ;;  %v4294_v63 = vrot.slane %v4292_v34, 5  ;;  %v4300_v50 = vrot.slane %v4298_v53, 5  ;;  %v9484_v28 = vld [vmem:[#allocation3 + $0x30] sm:$0xff]  }
 0x2ab   : > { %v4282_v52 = vrot.slane %v4281_v62, 4  ;;  %v4302_v44 = vshrl.u32 %v11556_v10, 16  ;;  %v4308_v39 = vshll.u32 %v11558_v56, 16  ;;  %v4313_v35 = vshrl.u32 %v11560_v5, 16  ;;  %v4724_v62 = vld [vmem:[#allocation2 + $0xc] sm:$0xe] }
 0x2ac   : > { %8727 = vmatprep.mubr.bf16.mxu1 %v7856_v57  ;;  %v4295_v30 = vor.u32 %v4294_v63, %v4291_v31  ;;  %v4316_v32 = vshll.u32 %v11560_v5, 16  ;;  %v4322_v24 = vshll.u32 %v11564_v7, 16  ;;  %v4277_v1 = vsel %vm10238_vm5, %v4272_v49, %v4276_v13 }
 0x2ad   : > { %8742 = vmatpush3.bf16.msra.mxu1 %v9481_v8  ;;  %v4287_v54 = vsel %vm10238_vm5, %v4282_v52, %v4286_v36  ;;  %v4304_v22 = vrot.slane %v4302_v44, 4  ;;  %v4315_v6 = vrot.slane %v4313_v35, 4  ;;  %v4326_v4 = vshrl.u32 %v11564_v7, 16 }
 0x2ae   : > { %v7857_v25 = vcombine.low %v4277_v1, %v4287_v54  ;;  %8743 = vmatprep.subr.bf16.mxu1 %v9482_v17  ;;  %v4296_v43 = vrot.slane %v4295_v30, 4  ;;  %v4318_v29 = vrot.slane %v4316_v32, 5  ;;  %v4324_v21 = vrot.slane %v4322_v24, 5  ;;  %v4726_v54 = vld [vmem:[#allocation2 + $0x24] sm:$0xe] }
 0x2af   : > { %v4305_v42 = vor.u32 %v4304_v22, %v4300_v50  ;;  %v4332_v16 = vshll.u32 %v11581_v2, 16  ;;  %v4310_v3 = vrot.slane %v4308_v39, 5  ;;  %v4328_v0 = vrot.slane %v4326_v4, 4  ;;  %v9486_v39 = vld [vmem:[#allocation3 + $0x38] sm:$0xff]   ;;  %v9488_v4 = vld [vmem:[#allocation3 + $0x80] sm:$0xff]  }
 0x2b0   : > { %8728 = vmatmul.mubr.bf16.gmra.mrb[28].mxu1 %v7857_v25  ;;  %v4319_v8 = vor.u32 %v4318_v29, %v4315_v6  ;;  %v4301_v55 = vsel %vm10238_vm5, %v4296_v43, %v4300_v50  ;;  %v7868_v33 = vcombine.low %v11443_v59, %v11452_v46  ;;  %v7884_v57 = vrot.slane %v4723_v19, 9 }
 0x2b1   : > { %8744 = vmatpush3.bf16.msra.mxu1 %v9482_v17  ;;  %v4306_v13 = vrot.slane %v4305_v42, 4  ;;  %v4329_v53 = vor.u32 %v4328_v0, %v4324_v21  ;;  %v4334_v31 = vrot.slane %v4332_v16, 5  ;;  %v4749_v49 = vrot.slane %v11452_v46, 5  ;;  %v4725_v17 = vld [vmem:[#allocation2 + $0x18] sm:$0xe] }
 0x2b2   : > { %8745 = vmatprep.subr.bf16.mxu1 %v9483_v14  ;;  %v4320_v47 = vrot.slane %v4319_v8, 4  ;;  %v4752_v50 = vrot.slane %v11463_v18, 5  ;;  %v4756_v44 = vrot.slane %v11478_v15, 5  ;;  %v7885_v35 = vrot.slane %v4724_v62, 9 }
 0x2b3   : > { %v4311_v34 = vsel %vm10238_vm5, %v4306_v13, %v4310_v3  ;;  %v4330_v52 = vrot.slane %v4329_v53, 4  ;;  %v4751_v59 = vrot.slane %v4749_v49, 4  ;;  %v4759_v30 = vrot.slane %v11480_v9, 5 }
 0x2b4   : > { %v7858_v36 = vcombine.low %v4301_v55, %v4311_v34  ;;  %v4325_v63 = vsel %vm10238_vm5, %v4320_v47, %v4324_v21  ;;  %v4763_v32 = vrot.slane %v11489_v12, 5  ;;  %v11602_v24 = vsel %vm9996_vm2, %v7884_v57, %v4749_v49  ;;  %v4727_v21 = vld [vmem:[#allocation2 + $0x30] sm:$0xe] }
 0x2b5   : > { %8746 = vmatpush3.bf16.msra.mxu1 %v9483_v14  ;;  %v4335_v46 = vsel %vm10238_vm5, %v4330_v52, %v4334_v31  ;;  %v4758_v1 = vrot.slane %v4756_v44, 4  ;;  %v7886_v18 = vrot.slane %v4725_v17, 9  ;;  %v11606_v6 = vsel %vm9996_vm2, %v4751_v59, %v4752_v50  ;;  %v4730_v17 = vld [vmem:[#allocation2 + $0x54] sm:$0xe] }
 0x2b6   : > { %8731 = vmatprep.mubr.bf16.mxu1 %v7858_v36  ;;  %8747 = vmatprep.subr.bf16.mxu1 %v9484_v28  ;;  %v7859_v22 = vcombine.low %v4325_v63, %v4335_v46  ;;  %v4765_v25 = vrot.slane %v4763_v32, 4  ;;  %v4766_v9 = vrot.slane %v11499_v11, 5  ;;  %v7892_v14 = vcombine.low %v11602_v24, %v11606_v6  ;;  %v9492_v46 = vld [vmem:[#allocation3 + $0x90] sm:$0xff]   ;;  %v9506_v6 = vld [vmem:[#allocation3 + $0xe0] sm:$0xff]  }
 0x2b7   : > { %v11613_v43 = vsel %vm9996_vm2, %v7885_v35, %v4756_v44  ;;  %v11617_v29 = vsel %vm9996_vm2, %v4758_v1, %v4759_v30  ;;  %v4770_v42 = vrot.slane %v11511_v38, 5  ;;  %v11624_v8 = vsel %vm9996_vm2, %v7886_v18, %v4763_v32  ;;  %v9494_v18 = vld [vmem:[#allocation3 + $0x98] sm:$0xff]   ;;  %v4729_v24 = vld [vmem:[#allocation2 + $0x48] sm:$0xe] }
 0x2b8   : > { %8732 = vmatmul.mubr.bf16.gmra.mrb[32].mxu1 %v7859_v22  ;;  %v7893_v11 = vcombine.low %v11613_v43, %v11617_v29  ;;  %v11628_v16 = vsel %vm9996_vm2, %v4765_v25, %v4766_v9  ;;  %v7887_v13 = vrot.slane %v4726_v54, 9  ;;  %v4773_v19 = vrot.slane %v11513_v45, 5  ;;  %v9496_v22 = vld [vmem:[#allocation3 + $0xa0] sm:$0xff]   ;;  %v9498_v9 = vld [vmem:[#allocation3 + $0xa8] sm:$0xff]  }
 0x2b9   : > { %8748 = vmatpush3.bf16.msra.mxu1 %v9484_v28  ;;  %8751 = vmatprep.mubr.bf16.mxu1 %v7868_v33  ;;  %v7894_v3 = vcombine.low %v11624_v8, %v11628_v16  ;;  %v4772_v0 = vrot.slane %v4770_v42, 4  ;;  %v4777_v47 = vrot.slane %v11526_v20, 5  ;;  %v4728_v28 = vld [vmem:[#allocation2 + $0x3c] sm:$0xe]  ;;  %v7888_v55 = vrot.slane %v4727_v21, 9  ;;  %v9507_v21 = vld [vmem:[#allocation3 + $0xe8] sm:$0xff]  }
 0x2ba   : > { %8749 = vmatprep.subr.bf16.mxu1 %v9486_v39  ;;  %v4784_v34 = vrot.slane %v11541_v37, 5  ;;  %v11637_v53 = vsel %vm9996_vm2, %v7887_v13, %v4770_v42  ;;  %v4780_v36 = vrot.slane %v11530_v41, 5  ;;  %v7889_v31 = vrot.slane %v4728_v28, 9  ;;  %v9509_v8 = vld [vmem:[#allocation2 + $0xc] sm:$0xff]   ;;  %v9512_v16 = vld [vmem:[#allocation3 + $0x100] sm:$0xff]  }
 0x2bb   : > { %v11641_v33 = vsel %vm9996_vm2, %v4772_v0, %v4773_v19  ;;  %v4779_v62 = vrot.slane %v4777_v47, 4  ;;  %v4787_v49 = vrot.slane %v11546_v51, 5  ;;  %v7869_v63 = vcombine.low %v11468_v23, %v11478_v15  ;;  %v9511_v13 = vld [vmem:[#allocation2 + $0x18] sm:$0xff]   ;;  %v9513_v0 = vld [vmem:[#allocation2 + $0x24] sm:$0xff]   ;;  %v11714_v19 = vld [vmem:[#allocation2 + $0x10] sm:$0xf] }
 0x2bc   : > { %v7895_v45 = vcombine.low %v11637_v53, %v11641_v33  ;;  %v4786_v57 = vrot.slane %v4784_v34, 4  ;;  %v11651_v52 = vsel %vm9996_vm2, %v7888_v55, %v4777_v47  ;;  %v4798_v41 = vrot.slane %v11564_v7, 5  ;;  %v5256_v47 = vld [vmem:[#allocation2 + $0xc] sm:$0xf] }
 0x2bd   : > { %8750 = vmatpush3.bf16.msra.mxu1 %v9486_v39  ;;  %v4781_v50 = vsel %vm9996_vm2, %v4779_v62, %v4780_v36  ;;  %v7870_v44 = vcombine.low %v11482_v40, %v11489_v12  ;;  %v9490_v39 = vld [vmem:[#allocation3 + $0x88] sm:$0xff]   ;;  %v11661_v51 = vsel %vm9996_vm2, %v7889_v31, %v4784_v34  ;;  %v7891_v35 = vrot.slane %v4730_v17, 9  ;;  %v9516_v28 = vld [vmem:[#allocation3 + $0x110] sm:$0xff]   ;;  %v11718_v62 = vld [vmem:[#allocation2 + $0x1c] sm:$0xf] }
 0x2be   : > { %8767 = vmatprep.subr.bf16.mxu1 %v9488_v4  ;;  %v7896_v59 = vcombine.low %v11651_v52, %v4781_v50  ;;  %v11665_v23 = vsel %vm9996_vm2, %v4786_v57, %v4787_v49  ;;  %v4800_v30 = vrot.slane %v4798_v41, 4  ;;  %v4801_v32 = vrot.slane %v11581_v2, 5  ;;  %v9515_v36 = vld [vmem:[#allocation2 + $0x30] sm:$0xff]   ;;  %v5259_v49 = vld [vmem:[#allocation2 + $0x18] sm:$0xf]  ;;  %v9517_v17 = vld [vmem:[#allocation2 + $0x3c] sm:$0xff]  }
 0x2bf   : > { %v7897_v15 = vcombine.low %v11661_v51, %v11665_v23  ;;  %v11672_v40 = vsel %vm9996_vm2, %v7891_v35, %v4798_v41  ;;  %v7871_v2 = vcombine.low %v11501_v58, %v11511_v38  ;;  %v7872_v54 = vcombine.low %v11520_v61, %v11526_v20  ;;  %v9500_v58 = vld [vmem:[#allocation3 + $0xb0] sm:$0xff]   ;;  %v9501_v61 = vld [vmem:[#allocation3 + $0xb8] sm:$0xff]   ;;  %v9502_v20 = vld [vmem:[#allocation3 + $0xc0] sm:$0xff]  }
 0x2c0   : > { %8752 = vmatmul.mubr.bf16.vlgmr.msra.gmra.mrb[20].mxu1 %v7869_v63  ;;  %v11676_v12 = vsel %vm9996_vm2, %v4800_v30, %v4801_v32  ;;  %v7873_v25 = vcombine.low %v11528_v26, %v11541_v37  ;;  %v7874_v42 = vcombine.low %v11552_v60, %v11556_v10  ;;  %v7875_v38 = vcombine.low %v11560_v5, %v11564_v7  ;;  %v9503_v26 = vld [vmem:[#allocation3 + $0xc8] sm:$0xff]   ;;  %v9504_v37 = vld [vmem:[#allocation3 + $0xd0] sm:$0xff]   ;;  %v9505_v5 = vld [vmem:[#allocation3 + $0xd8] sm:$0xff]  }
 0x2c1   : > { %8755 = vmatprep.mubr.bf16.mxu1 %v7870_v44  ;;  %8768 = vmatpush3.bf16.msra.mxu1 %v9488_v4  ;;  %v7899_v1 = vcombine.low %v11672_v40, %v11676_v12  ;;  %v4791_v60 = vrot.slane %v11556_v10, 5  ;;  %v7890_v43 = vrot.slane %v4729_v24, 9  ;;  %v5290_v55 = vshll.u32 %v11714_v19, 16  ;;  %v11724_v44 = vld [vmem:[#allocation2 + $0x28] sm:$0xf]  ;;  %v9520_v23 = vld [vmem:[#allocation3 + $0x120] sm:$0xff]  }
 0x2c2   : > { %8769 = vmatprep.subr.bf16.mxu1 %v9490_v39  ;;  %v5294_v34 = vshrl.u32 %v11714_v19, 16  ;;  %v5281_v53 = vshrl.u32 %v5256_v47, 16  ;;  %v5284_v33 = vshll.u32 %v5256_v47, 16  ;;  %v5314_v63 = vshll.u32 %v11718_v62, 16  ;;  %v5262_v35 = vld [vmem:[#allocation2 + $0x24] sm:$0xf] }
 0x2c3   : > { %v4793_v7 = vrot.slane %v4791_v60, 4  ;;  %v4792_v10 = vsel %vm9996_vm2, %v7890_v43, %v4791_v60  ;;  %v11720_v31 = vrot.slane %v5290_v55, 5  ;;  %v5318_v52 = vshrl.u32 %v11718_v62, 16  ;;  %v11729_v30 = vld [vmem:[#allocation2 + $0x20] sm:$0x1] }
 0x2c4   : > { %v5296_v57 = vrot.slane %v5294_v34, 4  ;;  %v5283_v50 = vrot.slane %v5281_v53, 4  ;;  %v5286_v41 = vrot.slane %v5284_v33, 5  ;;  %v5308_v51 = vshll.u32 %v5259_v49, 16 }
 0x2c5   : > { %8770 = vmatpush3.bf16.msra.mxu1 %v9490_v39  ;;  %v11726_v39 = vld [vmem:[#allocation2 + $0x14] sm:$0x1]  ;;  %v11731_v32 = vrot.slane %v5314_v63, 5  ;;  %v5320_v40 = vrot.slane %v5318_v52, 4  ;;  %v5338_v12 = vshll.u32 %v11724_v44, 16 }
 0x2c6   : > { %8771 = vmatprep.subr.bf16.mxu1 %v9492_v46 }
 0x2c8   : > { %8756 = vmatmul.mubr.bf16.gmra.mrb[24].mxu1 %v7871_v2  ;;  %v5300_v2 = vshll.u32 %v11726_v39, 16 }
 0x2c9   : > { %8759 = vmatprep.mubr.bf16.mxu1 %v7872_v54  ;;  %8772 = vmatpush3.bf16.msra.mxu1 %v9492_v46  ;;  %v5342_v46 = vshrl.u32 %v11724_v44, 16  ;;  %v5310_v54 = vrot.slane %v5308_v51, 5 }
 0x2ca   : > { %8773 = vmatprep.subr.bf16.mxu1 %v9494_v18  ;;  %v5302_v60 = vrot.slane %v5300_v2, 5  ;;  %v11770_v2 = vld [vmem:[#allocation2 + $0x58] sm:$0xf] }
 0x2cd   : > { %8774 = vmatpush3.bf16.msra.mxu1 %v9494_v18 }
 0x2ce   : > { %8775 = vmatprep.subr.bf16.mxu1 %v9496_v22 }
 0x2d0   : > { %8760 = vmatmul.mubr.bf16.gmra.mrb[28].mxu1 %v7873_v25  ;;  %v5332_v25 = vshll.u32 %v5262_v35, 16 }
 0x2d1   : > { %8763 = vmatprep.mubr.bf16.mxu1 %v7874_v42  ;;  %8776 = vmatpush3.bf16.msra.mxu1 %v9496_v22  ;;  %v5329_v22 = vshrl.u32 %v5262_v35, 16  ;;  %v9522_v42 = vld [vmem:[#allocation3 + $0x128] sm:$0xff]   ;;  %v11763_v35 = vld [vmem:[#allocation2 + $0x4c] sm:$0xf] }
 0x2d2   : > { %8777 = vmatprep.subr.bf16.mxu1 %v9498_v9  ;;  %v5334_v43 = vrot.slane %v5332_v25, 5 }
 0x2d5   : > { %8778 = vmatpush3.bf16.msra.mxu1 %v9498_v9  ;;  %v9519_v9 = vld [vmem:[#allocation2 + $0x48] sm:$0xff]  }
 0x2d6   : > { %8779 = vmatprep.subr.bf16.mxu1 %v9500_v58 }
 0x2d8   : > { %8764 = vmatmul.mubr.bf16.gmra.mrb[32].mxu1 %v7875_v38  ;;  %v5324_v38 = vshll.u32 %v11729_v30, 16 }
 0x2d9   : > { %8780 = vmatpush3.bf16.msra.mxu1 %v9500_v58  ;;  %8783 = vmatprep.mubr.bf16.mxu1 %v7892_v14  ;;  %v4794_v14 = vrot.slane %v11558_v56, 5  ;;  %v9510_v56 = vld [vmem:[#allocation3 + $0xf8] sm:$0xff]  }
 0x2da   : > { %8781 = vmatprep.subr.bf16.mxu1 %v9501_v61 }
 0x2db   : > { %v4795_v29 = vsel %vm9996_vm2, %v4793_v7, %v4794_v14  ;;  %v11740_v7 = vld [vmem:[#allocation2 + $0x34] sm:$0xf]  ;;  %v5331_v14 = vrot.slane %v5329_v22, 4 }
 0x2dc   : > { %v7898_v4 = vcombine.low %v4792_v10, %v4795_v29  ;;  %v11742_v29 = vld [vmem:[#allocation2 + $0x40] sm:$0xf]  ;;  %v9524_v10 = vld [vmem:[#allocation3 + $0x130] sm:$0xff]  }
 0x2dd   : > { %8782 = vmatpush3.bf16.msra.mxu1 %v9501_v61  ;;  %v9521_v61 = vld [vmem:[#allocation2 + $0x54] sm:$0xff]   ;;  %v5390_v55 = vshrl.u32 %v11742_v29, 16  ;;  %v5335_v33 = vor.u32 %v5334_v43, %v5331_v14 }
 0x2de   : > { %8799 = vmatprep.subr.bf16.mxu1 %v9502_v20 }
 0x2e0   : > { %8784 = vmatmul.mubr.bf16.vlgmr.msra.gmra.mrb[20].mxu1 %v7893_v11  ;;  %v9508_v11 = vld [vmem:[#allocation3 + $0xf0] sm:$0xff]  }
 0x2e1   : > { %8787 = vmatprep.mubr.bf16.mxu1 %v7894_v3  ;;  %8800 = vmatpush3.bf16.msra.mxu1 %v9502_v20  ;;  %v9514_v3 = vld [vmem:[#allocation3 + $0x108] sm:$0xff]   ;;  %v5321_v20 = vor.u32 %v5320_v40, %v11731_v32 }
 0x2e2   : > { %8801 = vmatprep.subr.bf16.mxu1 %v9503_v26 }
 0x2e5   : > { %8802 = vmatpush3.bf16.msra.mxu1 %v9503_v26  ;;  %v11738_v26 = vrot.slane %v5338_v12, 5  ;;  %v5336_v12 = vrot.slane %v5335_v33, 4  ;;  %v11793_v33 = vld [vmem:[#allocation2 + $0x64] sm:$0xf] }
 0x2e6   : > { %8803 = vmatprep.subr.bf16.mxu1 %v9504_v37 }
 0x2e8   : > { %8788 = vmatmul.mubr.bf16.gmra.mrb[24].mxu1 %v7895_v45  ;;  %v9518_v45 = vld [vmem:[#allocation3 + $0x118] sm:$0xff]  }
 0x2e9   : > { %8791 = vmatprep.mubr.bf16.mxu1 %v7896_v59  ;;  %8804 = vmatpush3.bf16.msra.mxu1 %v9504_v37  ;;  %v5305_v59 = vshrl.u32 %v5259_v49, 16  ;;  %v5344_v37 = vrot.slane %v5342_v46, 4  ;;  %v9525_v49 = vld [vmem:[#allocation3 + $0x138] sm:$0xff]  }
 0x2ea   : > { %8805 = vmatprep.subr.bf16.mxu1 %v9505_v5 }
 0x2eb   : > { %v5307_v18 = vrot.slane %v5305_v59, 4 }
 0x2ed   : > { %8806 = vmatpush3.bf16.msra.mxu1 %v9505_v5  ;;  %v5265_v5 = vld [vmem:[#allocation2 + $0x30] sm:$0xf] }
 0x2ee   : > { %8807 = vmatprep.subr.bf16.mxu1 %v9506_v6  ;;  %v5356_v47 = vshll.u32 %v5265_v5, 16 }
 0x2f0   : > { %8792 = vmatmul.mubr.bf16.gmra.mrb[28].mxu1 %v7897_v15  ;;  %v5297_v15 = vor.u32 %v5296_v57, %v11720_v31 }
 0x2f1   : > { %8795 = vmatprep.mubr.bf16.mxu1 %v7898_v4  ;;  %8808 = vmatpush3.bf16.msra.mxu1 %v9506_v6  ;;  %v5311_v6 = vor.u32 %v5310_v54, %v5307_v18  ;;  %v5326_v4 = vrot.slane %v5324_v38, 5  ;;  %v9526_v54 = vld [vmem:[#allocation3 + $0x140] sm:$0xff]   ;;  %v11775_v38 = vld [vmem:[#allocation2 + $0x44] sm:$0x1] }
 0x2f2   : > { %8809 = vmatprep.subr.bf16.mxu1 %v9507_v21  ;;  %v5298_v58 = vrot.slane %v5297_v15, 4  ;;  %v5392_v15 = vrot.slane %v5390_v55, 4 }
 0x2f3   : > { %v5312_v53 = vrot.slane %v5311_v6, 4  ;;  %v5341_v6 = vsel %vm10238_vm5, %v5336_v12, %v11738_v26  ;;  %v5462_v12 = vshrl.u32 %v11793_v33, 16 }
 0x2f5   : > { %8810 = vmatpush3.bf16.msra.mxu1 %v9507_v21  ;;  %v5303_v21 = vsel %vm10238_vm5, %v5298_v58, %v5302_v60  ;;  %v5317_v40 = vsel %vm10238_vm5, %v5312_v53, %v11731_v32  ;;  %v5410_v32 = vshll.u32 %v11763_v35, 16 }
 0x2f6   : > { %8811 = vmatprep.subr.bf16.mxu1 %v9508_v11 }
 0x2f8   : > { %8796 = vmatmul.mubr.bf16.gmra.mrb[32].mxu1 %v7899_v1  ;;  %v5287_v1 = vor.u32 %v5286_v41, %v5283_v50 }
 0x2f9   : > { %8812 = vmatpush3.bf16.msra.mxu1 %v9508_v11  ;;  %8815 = vmatprep.mubr.bf16.mxu1 %v9509_v8  ;;  %v11746_v11 = vld [vmem:[#allocation2 + $0x2c] sm:$0x1]  ;;  %v5345_v8 = vor.u32 %v5344_v37, %v11738_v26  ;;  %v11789_v26 = vld [vmem:[#allocation2 + $0x50] sm:$0x1] }
 0x2fa   : > { %8813 = vmatprep.subr.bf16.mxu1 %v9510_v56  ;;  %v5288_v24 = vrot.slane %v5287_v1, 4  ;;  %v11768_v1 = vld [vmem:[#allocation2 + $0x38] sm:$0x1] }
 0x2fb   : > { %v5346_v50 = vrot.slane %v5345_v8, 4  ;;  %v5372_v14 = vshll.u32 %v11768_v1, 16 }
 0x2fc   : > { %v5293_v34 = vsel %vm10238_vm5, %v5288_v24, %v11720_v31  ;;  %v5358_v31 = vrot.slane %v5356_v47, 5  ;;  %v5438_v24 = vshrl.u32 %v11770_v2, 16 }
 0x2fd   : > { %8814 = vmatpush3.bf16.msra.mxu1 %v9510_v56  ;;  %v5322_v56 = vrot.slane %v5321_v20, 4  ;;  %v7924_v57 = vcombine.low %v5293_v34, %v5303_v21  ;;  %v5274_v20 = vld [vmem:[#allocation2 + $0x54] sm:$0xf]  ;;  %v9527_v21 = vld [vmem:[#allocation3 + $0x148] sm:$0xff]  }
 0x2fe   : > { %8831 = vmatprep.subr.bf16.mxu1 %v9512_v16  ;;  %v5425_v8 = vshrl.u32 %v5274_v20, 16  ;;  %v5440_v53 = vrot.slane %v5438_v24, 4  ;;  %v5464_v24 = vrot.slane %v5462_v12, 4  ;;  %v5730_v12 = vrot.slane %v11724_v44, 5  ;;  %v5684_v44 = vld [vmem:[#allocation2 + $0x24] sm:$0xe] }
 0x2ff   : > { %v5327_v52 = vsel %vm10238_vm5, %v5322_v56, %v5326_v4  ;;  %v5396_v56 = vshll.u32 %v11775_v38, 16 }
 0x300   : > { %8816 = vmatmul.mubr.bf16.vlgmr.msra.gmra.mrb[20].mxu1 %v9511_v13  ;;  %v5366_v13 = vshrl.u32 %v11740_v7, 16  ;;  %v7925_v18 = vcombine.low %v5317_v40, %v5327_v52  ;;  %v5458_v40 = vshll.u32 %v11793_v33, 16 }
 0x301   : > { %8819 = vmatprep.mubr.bf16.mxu1 %v9513_v0  ;;  %8832 = vmatpush3.bf16.msra.mxu1 %v9512_v16  ;;  %v5362_v16 = vshll.u32 %v11740_v7, 16  ;;  %v5353_v0 = vshrl.u32 %v5265_v5, 16  ;;  %v5434_v5 = vshll.u32 %v11770_v2, 16  ;;  %v5398_v52 = vrot.slane %v5396_v56, 5 }
 0x302   : > { %8833 = vmatprep.subr.bf16.mxu1 %v9514_v3  ;;  %v5368_v59 = vrot.slane %v5366_v13, 4 }
 0x303   : > { %v11759_v41 = vrot.slane %v5362_v16, 5  ;;  %v5355_v51 = vrot.slane %v5353_v0, 4  ;;  %v5428_v16 = vshll.u32 %v5274_v20, 16  ;;  %v11787_v0 = vrot.slane %v5410_v32, 5 }
 0x304   : > { %v11791_v34 = vrot.slane %v5434_v5, 5  ;;  %v5460_v5 = vrot.slane %v5458_v40, 5 }
 0x305   : > { %8834 = vmatpush3.bf16.msra.mxu1 %v9514_v3  ;;  %v5268_v3 = vld [vmem:[#allocation2 + $0x3c] sm:$0xf]  ;;  %v5369_v58 = vor.u32 %v5368_v59, %v11759_v41  ;;  %v5359_v37 = vor.u32 %v5358_v31, %v5355_v51  ;;  %v5430_v59 = vrot.slane %v5428_v16, 5 }
 0x306   : > { %8835 = vmatprep.subr.bf16.mxu1 %v9516_v28  ;;  %v5380_v63 = vshll.u32 %v5268_v3, 16 }
 0x308   : > { %8820 = vmatmul.mubr.bf16.gmra.mrb[24].mxu1 %v9515_v36  ;;  %v5348_v36 = vshll.u32 %v11746_v11, 16  ;;  %v5382_v25 = vrot.slane %v5380_v63, 5 }
 0x309   : > { %8823 = vmatprep.mubr.bf16.mxu1 %v9517_v17  ;;  %8836 = vmatpush3.bf16.msra.mxu1 %v9516_v28  ;;  %v5386_v28 = vshll.u32 %v11742_v29, 16  ;;  %v5377_v17 = vshrl.u32 %v5268_v3, 16  ;;  %v5370_v3 = vrot.slane %v5369_v58, 4 }
 0x30a   : > { %8837 = vmatprep.subr.bf16.mxu1 %v9518_v45  ;;  %v5350_v46 = vrot.slane %v5348_v36, 5  ;;  %v5374_v36 = vrot.slane %v5372_v14, 5 }
 0x30b   : > { %v5379_v22 = vrot.slane %v5377_v17, 4  ;;  %v9528_v17 = vld [vmem:[#allocation3 + $0x150] sm:$0xff]  }
 0x30c   : > { %v5375_v51 = vsel %vm10238_vm5, %v5370_v3, %v5374_v36 }
 0x30d   : > { %8838 = vmatpush3.bf16.msra.mxu1 %v9518_v45  ;;  %v9523_v45 = vld [vmem:[#allocation2 + $0x60] sm:$0xff]   ;;  %v5383_v4 = vor.u32 %v5382_v25, %v5379_v22  ;;  %v5420_v25 = vshll.u32 %v11789_v26, 16 }
 0x30e   : > { %8839 = vmatprep.subr.bf16.mxu1 %v9520_v23 }
 0x30f   : > { %v5384_v63 = vrot.slane %v5383_v4, 4  ;;  %v9530_v4 = vld [vmem:[#allocation3 + $0x160] sm:$0xff]  }
 0x310   : > { %8824 = vmatmul.mubr.bf16.gmra.mrb[28].mxu1 %v9519_v9  ;;  %v5271_v9 = vld [vmem:[#allocation2 + $0x48] sm:$0xf] }
 0x311   : > { %8827 = vmatprep.mubr.bf16.mxu1 %v9521_v61  ;;  %8840 = vmatpush3.bf16.msra.mxu1 %v9520_v23  ;;  %v11761_v23 = vrot.slane %v5386_v28, 5  ;;  %v5414_v61 = vshrl.u32 %v11763_v35, 16  ;;  %v5401_v43 = vshrl.u32 %v5271_v9, 16  ;;  %v5360_v28 = vrot.slane %v5359_v37, 4 }
 0x312   : > { %8841 = vmatprep.subr.bf16.mxu1 %v9522_v42 }
 0x313   : > { %v5393_v60 = vor.u32 %v5392_v15, %v11761_v23  ;;  %v5416_v47 = vrot.slane %v5414_v61, 4  ;;  %v11798_v15 = vld [vmem:[#allocation2 + $0x5c] sm:$0x1]  ;;  %v5389_v32 = vsel %vm10238_vm5, %v5384_v63, %v11761_v23  ;;  %v9529_v61 = vld [vmem:[#allocation3 + $0x158] sm:$0xff]  }
 0x315   : > { %8842 = vmatpush3.bf16.msra.mxu1 %v9522_v42  ;;  %v5351_v42 = vsel %vm10238_vm5, %v5346_v50, %v5350_v46  ;;  %v5394_v55 = vrot.slane %v5393_v60, 4  ;;  %v5427_v50 = vrot.slane %v5425_v8, 4  ;;  %v5417_v31 = vor.u32 %v5416_v47, %v11787_v0  ;;  %v11813_v8 = vld [vmem:[#allocation2 + $0x68] sm:$0x1] }
 0x316   : > { %8843 = vmatprep.subr.bf16.mxu1 %v9524_v10  ;;  %v7926_v13 = vcombine.low %v5341_v6, %v5351_v42  ;;  %v5365_v46 = vsel %vm10238_vm5, %v5360_v28, %v11759_v41  ;;  %v5444_v41 = vshll.u32 %v11798_v15, 16  ;;  %v5716_v47 = vrot.slane %v11714_v19, 5 }
 0x317   : > { %v7927_v58 = vcombine.low %v5365_v46, %v5375_v51  ;;  %v5431_v20 = vor.u32 %v5430_v59, %v5427_v50  ;;  %v5418_v60 = vrot.slane %v5417_v31, 4  ;;  %v5682_v50 = vld [vmem:[#allocation2 + $0xc] sm:$0xe]  ;;  %v5719_v59 = vrot.slane %v11726_v39, 5 }
 0x318   : > { %8828 = vmatmul.mubr.bf16.gmra.mrb[32].mxu1 %v9523_v45  ;;  %v5403_v45 = vrot.slane %v5401_v43, 4  ;;  %v5422_v43 = vrot.slane %v5420_v25, 5  ;;  %v5446_v23 = vrot.slane %v5444_v41, 5  ;;  %v5718_v63 = vrot.slane %v5716_v47, 4 }
 0x319   : > { %8844 = vmatpush3.bf16.msra.mxu1 %v9524_v10  ;;  %8847 = vmatprep.mubr.bf16.mxu1 %v7924_v57  ;;  %v5404_v10 = vshll.u32 %v5271_v9, 16  ;;  %v5432_v56 = vrot.slane %v5431_v20, 4  ;;  %v5723_v31 = vrot.slane %v11718_v62, 5  ;;  %v5683_v62 = vld [vmem:[#allocation2 + $0x18] sm:$0xe]  ;;  %v5737_v41 = vrot.slane %v11740_v7, 5 }
 0x31a   : > { %8845 = vmatprep.subr.bf16.mxu1 %v9525_v49  ;;  %v5423_v16 = vsel %vm10238_vm5, %v5418_v60, %v5422_v43  ;;  %v5720_v40 = vsel %vm9996_vm2, %v5718_v63, %v5719_v59  ;;  %v5685_v7 = vld [vmem:[#allocation2 + $0x30] sm:$0xe]  ;;  %v5761_v63 = vrot.slane %v11798_v15, 5  ;;  %v9539_v15 = vld [vmem:[#allocation3 + $0x1a8] sm:$0xff]  }
 0x31b   : > { %v5406_v57 = vrot.slane %v5404_v10, 5  ;;  %v5725_v25 = vrot.slane %v5723_v31, 4  ;;  %v5739_v43 = vrot.slane %v5737_v41, 4 }
 0x31d   : > { %8846 = vmatpush3.bf16.msra.mxu1 %v9525_v49  ;;  %v5277_v49 = vld [vmem:[#allocation2 + $0x60] sm:$0xf]  ;;  %v5407_v22 = vor.u32 %v5406_v57, %v5403_v45  ;;  %v5437_v45 = vsel %vm10238_vm5, %v5432_v56, %v11791_v34  ;;  %v5747_v56 = vrot.slane %v11775_v38, 5 }
 0x31e   : > { %8863 = vmatprep.subr.bf16.mxu1 %v9526_v54  ;;  %v5449_v9 = vshrl.u32 %v5277_v49, 16  ;;  %v5452_v42 = vshll.u32 %v5277_v49, 16  ;;  %v9531_v57 = vld [vmem:[#allocation3 + $0x168] sm:$0xff]  }
 0x31f   : > { %v5408_v14 = vrot.slane %v5407_v22, 4 }
 0x320   : > { %8848 = vmatmul.mubr.bf16.vlgmr.msra.gmra.mrb[20].mxu1 %v7925_v18  ;;  %v5399_v18 = vsel %vm10238_vm5, %v5394_v55, %v5398_v52  ;;  %v5451_v10 = vrot.slane %v5449_v9, 4  ;;  %v5732_v9 = vrot.slane %v5730_v12, 4 }
 0x321   : > { %8851 = vmatprep.mubr.bf16.mxu1 %v7926_v13  ;;  %8864 = vmatpush3.bf16.msra.mxu1 %v9526_v54  ;;  %v5441_v54 = vor.u32 %v5440_v53, %v11791_v34  ;;  %v7928_v37 = vcombine.low %v5389_v32, %v5399_v18  ;;  %v5465_v13 = vor.u32 %v5464_v24, %v5460_v5  ;;  %v5468_v53 = vshll.u32 %v11813_v8, 16 }
 0x322   : > { %8865 = vmatprep.subr.bf16.mxu1 %v9527_v21  ;;  %v5413_v28 = vsel %vm10238_vm5, %v5408_v14, %v11787_v0  ;;  %v9532_v0 = vld [vmem:[#allocation3 + $0x170] sm:$0xff]   ;;  %v7940_v34 = vrot.slane %v5682_v50, 9  ;;  %v5733_v32 = vrot.slane %v11746_v11, 5  ;;  %v5765_v50 = vrot.slane %v11793_v33, 5 }
 0x323   : > { %v5442_v6 = vrot.slane %v5441_v54, 4  ;;  %v7929_v36 = vcombine.low %v5413_v28, %v5423_v16  ;;  %v5470_v52 = vrot.slane %v5468_v53, 5  ;;  %v9533_v54 = vld [vmem:[#allocation3 + $0x178] sm:$0xff]   ;;  %v5758_v28 = vrot.slane %v11770_v2, 5 }
 0x324   : > { %v5717_v39 = vsel %vm9996_vm2, %v7940_v34, %v5716_v47  ;;  %v5734_v60 = vsel %vm9996_vm2, %v5732_v9, %v5733_v32  ;;  %v9537_v53 = vld [vmem:[#allocation3 + $0x198] sm:$0xff]   ;;  %v5768_v33 = vrot.slane %v11813_v8, 5  ;;  %v9544_v9 = vld [vmem:[#allocation3 + $0x1c0] sm:$0xff]   ;;  %v9543_v8 = vld [vmem:[#allocation2 + $0x24] sm:$0xff]  }
 0x325   : > { %8866 = vmatpush3.bf16.msra.mxu1 %v9527_v21  ;;  %v5454_v21 = vrot.slane %v5452_v42, 5  ;;  %v5447_v3 = vsel %vm10238_vm5, %v5442_v6, %v5446_v23  ;;  %v7948_v22 = vcombine.low %v5717_v39, %v5720_v40  ;;  %v5726_v42 = vrot.slane %v11729_v30, 5  ;;  %v9535_v6 = vld [vmem:[#allocation3 + $0x188] sm:$0xff]   ;;  %v5688_v2 = vld [vmem:[#allocation2 + $0x54] sm:$0xe] }
 0x326   : > { %8867 = vmatprep.subr.bf16.mxu1 %v9528_v17  ;;  %v7930_v49 = vcombine.low %v5437_v45, %v5447_v3  ;;  %v7943_v23 = vrot.slane %v5685_v7, 9  ;;  %v5767_v40 = vrot.slane %v5765_v50, 4  ;;  %v6223_v32 = vld [vmem:[#allocation2 + $0x18] sm:$0xf] }
 0x327   : > { %v5455_v55 = vor.u32 %v5454_v21, %v5451_v10  ;;  %v5727_v20 = vsel %vm9996_vm2, %v5725_v25, %v5726_v42  ;;  %v5740_v21 = vrot.slane %v11768_v1, 5  ;;  %v9542_v25 = vld [vmem:[#allocation3 + $0x1b8] sm:$0xff]   ;;  %v9546_v42 = vld [vmem:[#allocation3 + $0x1c8] sm:$0xff]  }
 0x328   : > { %8852 = vmatmul.mubr.bf16.gmra.mrb[24].mxu1 %v7927_v58  ;;  %v9534_v58 = vld [vmem:[#allocation3 + $0x180] sm:$0xff]   ;;  %v5738_v1 = vsel %vm9996_vm2, %v7943_v23, %v5737_v41  ;;  %v5769_v39 = vsel %vm9996_vm2, %v5767_v40, %v5768_v33 }
 0x329   : > { %8855 = vmatprep.mubr.bf16.mxu1 %v7928_v37  ;;  %8868 = vmatpush3.bf16.msra.mxu1 %v9528_v17  ;;  %v5466_v17 = vrot.slane %v5465_v13, 4  ;;  %v5456_v19 = vrot.slane %v5455_v55, 4  ;;  %v7942_v37 = vrot.slane %v5684_v44, 9  ;;  %v5741_v16 = vsel %vm9996_vm2, %v5739_v43, %v5740_v21  ;;  %v9545_v44 = vld [vmem:[#allocation2 + $0x30] sm:$0xff]  }
 0x32a   : > { %8869 = vmatprep.subr.bf16.mxu1 %v9529_v61  ;;  %v5751_v13 = vrot.slane %v11763_v35, 5  ;;  %v7951_v55 = vcombine.low %v5738_v1, %v5741_v16  ;;  %v5687_v35 = vld [vmem:[#allocation2 + $0x48] sm:$0xe]  ;;  %v11890_v16 = vld [vmem:[#allocation2 + $0x34] sm:$0xf] }
 0x32b   : > { %v5471_v51 = vsel %vm10238_vm5, %v5466_v17, %v5470_v52  ;;  %v5461_v46 = vsel %vm10238_vm5, %v5456_v19, %v5460_v5  ;;  %v5744_v5 = vrot.slane %v11742_v29, 5  ;;  %v5731_v11 = vsel %vm9996_vm2, %v7942_v37, %v5730_v12  ;;  %v5686_v29 = vld [vmem:[#allocation2 + $0x3c] sm:$0xe]  ;;  %v5689_v12 = vld [vmem:[#allocation2 + $0x60] sm:$0xe] }
 0x32c   : > { %v7931_v18 = vcombine.low %v5461_v46, %v5471_v51  ;;  %v7950_v14 = vcombine.low %v5731_v11, %v5734_v60  ;;  %v7944_v3 = vrot.slane %v5686_v29, 9  ;;  %v5753_v45 = vrot.slane %v5751_v13, 4  ;;  %v9538_v17 = vld [vmem:[#allocation3 + $0x1a0] sm:$0xff]   ;;  %v9540_v46 = vld [vmem:[#allocation3 + $0x1b0] sm:$0xff]   ;;  %v9550_v11 = vld [vmem:[#allocation3 + $0x1d8] sm:$0xff]  }
 0x32d   : > { %8870 = vmatpush3.bf16.msra.mxu1 %v9529_v61  ;;  %v7941_v61 = vrot.slane %v5683_v62, 9  ;;  %v5746_v10 = vrot.slane %v5744_v5, 4  ;;  %v7945_v19 = vrot.slane %v5687_v35, 9  ;;  %v9541_v62 = vld [vmem:[#allocation2 + $0x18] sm:$0xff]   ;;  %v11882_v37 = vld [vmem:[#allocation2 + $0x28] sm:$0xf] }
 0x32e   : > { %8871 = vmatprep.subr.bf16.mxu1 %v9530_v4  ;;  %v5745_v38 = vsel %vm9996_vm2, %v7944_v3, %v5744_v5  ;;  %v6248_v60 = vshrl.u32 %v6223_v32, 16  ;;  %v6251_v5 = vshll.u32 %v6223_v32, 16  ;;  %v6281_v43 = vshll.u32 %v11882_v37, 16  ;;  %v6229_v1 = vld [vmem:[#allocation2 + $0x30] sm:$0xf] }
 0x32f   : > { %v5724_v30 = vsel %vm9996_vm2, %v7941_v61, %v5723_v31  ;;  %v5748_v47 = vsel %vm9996_vm2, %v5746_v10, %v5747_v56  ;;  %v5752_v51 = vsel %vm9996_vm2, %v7945_v19, %v5751_v13  ;;  %v9548_v61 = vld [vmem:[#allocation3 + $0x1d0] sm:$0xff]   ;;  %v6285_v7 = vshrl.u32 %v11882_v37, 16  ;;  %v9552_v13 = vld [vmem:[#allocation3 + $0x1e0] sm:$0xff]  }
 0x330   : > { %8856 = vmatmul.mubr.bf16.gmra.mrb[28].mxu1 %v7929_v36  ;;  %v7949_v24 = vcombine.low %v5724_v30, %v5727_v20  ;;  %v7952_v36 = vcombine.low %v5745_v38, %v5748_v47  ;;  %v6226_v30 = vld [vmem:[#allocation2 + $0x24] sm:$0xf]  ;;  %v9549_v10 = vld [vmem:[#allocation2 + $0x48] sm:$0xff]   ;;  %v6250_v21 = vrot.slane %v6248_v60, 4  ;;  %v6253_v29 = vrot.slane %v6251_v5, 5 }
 0x331   : > { %8859 = vmatprep.mubr.bf16.mxu1 %v7930_v49  ;;  %8872 = vmatpush3.bf16.msra.mxu1 %v9530_v4  ;;  %v9536_v4 = vld [vmem:[#allocation3 + $0x190] sm:$0xff]   ;;  %v5754_v49 = vrot.slane %v11789_v26, 5  ;;  %v6272_v56 = vshrl.u32 %v6226_v30, 16  ;;  %v6275_v23 = vshll.u32 %v6226_v30, 16  ;;  %v11893_v47 = vrot.slane %v6281_v43, 5 }
 0x332   : > { %8873 = vmatprep.subr.bf16.mxu1 %v9531_v57 }
 0x333   : > { %v5755_v52 = vsel %vm9996_vm2, %v5753_v45, %v5754_v49  ;;  %v11898_v45 = vld [vmem:[#allocation2 + $0x2c] sm:$0x1]  ;;  %v6274_v35 = vrot.slane %v6272_v56, 4  ;;  %v6296_v49 = vshrl.u32 %v6229_v1, 16 }
 0x334   : > { %v7953_v26 = vcombine.low %v5752_v51, %v5755_v52  ;;  %v6291_v51 = vshll.u32 %v11898_v45, 16 }
 0x335   : > { %8874 = vmatpush3.bf16.msra.mxu1 %v9531_v57  ;;  %v5760_v57 = vrot.slane %v5758_v28, 4 }
 0x336   : > { %8875 = vmatprep.subr.bf16.mxu1 %v9532_v0 }
 0x337   : > { %v5762_v59 = vsel %vm9996_vm2, %v5760_v57, %v5761_v63  ;;  %v6277_v57 = vrot.slane %v6275_v23, 5  ;;  %v9554_v63 = vld [vmem:[#allocation3 + $0x1e8] sm:$0xff]  }
 0x338   : > { %8860 = vmatmul.mubr.bf16.gmra.mrb[32].mxu1 %v7931_v18  ;;  %v7947_v18 = vrot.slane %v5689_v12, 9  ;;  %v6298_v12 = vrot.slane %v6296_v49, 4 }
 0x339   : > { %8876 = vmatpush3.bf16.msra.mxu1 %v9532_v0  ;;  %8879 = vmatprep.mubr.bf16.mxu1 %v7948_v22  ;;  %v7946_v0 = vrot.slane %v5688_v2, 9  ;;  %v6299_v2 = vshll.u32 %v6229_v1, 16  ;;  %v6278_v40 = vor.u32 %v6277_v57, %v6274_v35  ;;  %v9558_v35 = vld [vmem:[#allocation3 + $0x200] sm:$0xff]  }
 0x33a   : > { %8877 = vmatprep.subr.bf16.mxu1 %v9533_v54 }
 0x33b   : > { %v5759_v31 = vsel %vm9996_vm2, %v7946_v0, %v5758_v28  ;;  %v6287_v28 = vrot.slane %v6285_v7, 4  ;;  %v6232_v0 = vld [vmem:[#allocation2 + $0x3c] sm:$0xf]  ;;  %v6301_v33 = vrot.slane %v6299_v2, 5  ;;  %v6279_v60 = vrot.slane %v6278_v40, 4 }
 0x33c   : > { %v7954_v34 = vcombine.low %v5759_v31, %v5762_v59 }
 0x33d   : > { %8878 = vmatpush3.bf16.msra.mxu1 %v9533_v54  ;;  %v5766_v54 = vsel %vm9996_vm2, %v7947_v18, %v5765_v50  ;;  %v6288_v52 = vor.u32 %v6287_v28, %v11893_v47  ;;  %v9553_v50 = vld [vmem:[#allocation2 + $0x60] sm:$0xff]   ;;  %v9556_v18 = vld [vmem:[#allocation3 + $0x1f0] sm:$0xff]   ;;  %v6302_v5 = vor.u32 %v6301_v33, %v6298_v12  ;;  %v11927_v28 = vld [vmem:[#allocation2 + $0x58] sm:$0xf]  ;;  %v6284_v1 = vsel %vm10238_vm5, %v6279_v60, %v11893_v47 }
 0x33e   : > { %8895 = vmatprep.subr.bf16.mxu1 %v9534_v58  ;;  %v7955_v22 = vcombine.low %v5766_v54, %v5769_v39  ;;  %v6381_v47 = vshrl.u32 %v11927_v28, 16 }
 0x33f   : > { %v6289_v54 = vrot.slane %v6288_v52, 4  ;;  %v11937_v52 = vld [vmem:[#allocation2 + $0x50] sm:$0x1] }
 0x340   : > { %8880 = vmatmul.mubr.bf16.vlgmr.msra.gmra.mrb[20].mxu1 %v7949_v24  ;;  %v9547_v24 = vld [vmem:[#allocation2 + $0x3c] sm:$0xff]  }
 0x341   : > { %8883 = vmatprep.mubr.bf16.mxu1 %v7950_v14  ;;  %8896 = vmatpush3.bf16.msra.mxu1 %v9534_v58  ;;  %v11878_v58 = vld [vmem:[#allocation2 + $0x1c] sm:$0xf] }
 0x342   : > { %8897 = vmatprep.subr.bf16.mxu1 %v9535_v6  ;;  %v6257_v20 = vshll.u32 %v11878_v58, 16  ;;  %v6261_v41 = vshrl.u32 %v11878_v58, 16 }
 0x344   : > { %v6263_v14 = vrot.slane %v6261_v41, 4 }
 0x345   : > { %8898 = vmatpush3.bf16.msra.mxu1 %v9535_v6  ;;  %v11884_v6 = vrot.slane %v6257_v20, 5 }
 0x346   : > { %8899 = vmatprep.subr.bf16.mxu1 %v9536_v4 }
 0x347   : > { %v6264_v3 = vor.u32 %v6263_v14, %v11884_v6  ;;  %v9557_v14 = vld [vmem:[#allocation3 + $0x1f8] sm:$0xff]  }
 0x348   : > { %8884 = vmatmul.mubr.bf16.gmra.mrb[24].mxu1 %v7951_v55  ;;  %v6254_v55 = vor.u32 %v6253_v29, %v6250_v21 }
 0x349   : > { %8887 = vmatprep.mubr.bf16.mxu1 %v7952_v36  ;;  %8900 = vmatpush3.bf16.msra.mxu1 %v9536_v4  ;;  %v11888_v4 = vld [vmem:[#allocation2 + $0x20] sm:$0x1]  ;;  %v6309_v36 = vshrl.u32 %v11890_v16, 16  ;;  %v6265_v19 = vrot.slane %v6264_v3, 4 }
 0x34a   : > { %8901 = vmatprep.subr.bf16.mxu1 %v9537_v53  ;;  %v6267_v38 = vshll.u32 %v11888_v4, 16 }
 0x34b   : > { %v6311_v31 = vrot.slane %v6309_v36, 4 }
 0x34c   : > { %v6269_v59 = vrot.slane %v6267_v38, 5  ;;  %v11932_v38 = vld [vmem:[#allocation2 + $0x44] sm:$0x1] }
 0x34d   : > { %8902 = vmatpush3.bf16.msra.mxu1 %v9537_v53  ;;  %v6305_v53 = vshll.u32 %v11890_v16, 16  ;;  %v6339_v12 = vshll.u32 %v11932_v38, 16 }
 0x34e   : > { %8903 = vmatprep.subr.bf16.mxu1 %v9538_v17  ;;  %v6270_v39 = vsel %vm10238_vm5, %v6265_v19, %v6269_v59 }
 0x350   : > { %8888 = vmatmul.mubr.bf16.gmra.mrb[28].mxu1 %v7953_v26  ;;  %v11902_v26 = vrot.slane %v6305_v53, 5  ;;  %v11934_v53 = vld [vmem:[#allocation2 + $0x64] sm:$0xf] }
 0x351   : > { %8891 = vmatprep.mubr.bf16.mxu1 %v7954_v34  ;;  %8904 = vmatpush3.bf16.msra.mxu1 %v9538_v17  ;;  %v9551_v17 = vld [vmem:[#allocation2 + $0x54] sm:$0xff]   ;;  %v6255_v34 = vrot.slane %v6254_v55, 4  ;;  %v6303_v55 = vrot.slane %v6302_v5, 4  ;;  %v11957_v5 = vld [vmem:[#allocation2 + $0x70] sm:$0xf] }
 0x352   : > { %8905 = vmatprep.subr.bf16.mxu1 %v9539_v15  ;;  %v6312_v32 = vor.u32 %v6311_v31, %v11902_v26  ;;  %v6401_v31 = vshll.u32 %v11934_v53, 16 }
 0x353   : > { %v6260_v41 = vsel %vm10238_vm5, %v6255_v34, %v11884_v6  ;;  %v6405_v34 = vshrl.u32 %v11934_v53, 16  ;;  %v6308_v40 = vsel %vm10238_vm5, %v6303_v55, %v11902_v26  ;;  %v11953_v26 = vld [vmem:[#allocation2 + $0x5c] sm:$0x1]  ;;  %v6429_v55 = vshrl.u32 %v11957_v5, 16 }
 0x354   : > { %v6313_v6 = vrot.slane %v6312_v32, 4  ;;  %v6383_v32 = vrot.slane %v6381_v47, 4  ;;  %v9561_v47 = vld [vmem:[#allocation3 + $0x218] sm:$0xff]  }
 0x355   : > { %8906 = vmatpush3.bf16.msra.mxu1 %v9539_v15  ;;  %v11904_v15 = vld [vmem:[#allocation2 + $0x40] sm:$0xf]  ;;  %v6407_v60 = vrot.slane %v6405_v34, 4  ;;  %v6431_v34 = vrot.slane %v6429_v55, 4  ;;  %v6697_v55 = vrot.slane %v11890_v16, 5 }
 0x356   : > { %8907 = vmatprep.subr.bf16.mxu1 %v9540_v46  ;;  %v6651_v16 = vld [vmem:[#allocation2 + $0x30] sm:$0xe] }
 0x358   : > { %8892 = vmatmul.mubr.bf16.gmra.mrb[32].mxu1 %v7955_v22  ;;  %v11910_v22 = vld [vmem:[#allocation2 + $0x38] sm:$0x1] }
 0x359   : > { %8908 = vmatpush3.bf16.msra.mxu1 %v9540_v46  ;;  %8911 = vmatprep.mubr.bf16.mxu1 %v9541_v62  ;;  %v11906_v46 = vld [vmem:[#allocation2 + $0x4c] sm:$0xf]  ;;  %v6323_v62 = vshll.u32 %v6232_v0, 16  ;;  %v6315_v30 = vshll.u32 %v11910_v22, 16 }
 0x35a   : > { %8909 = vmatprep.subr.bf16.mxu1 %v9542_v25  ;;  %v6357_v20 = vshrl.u32 %v11906_v46, 16 }
 0x35b   : > { %v6325_v29 = vrot.slane %v6323_v62, 5  ;;  %v6317_v57 = vrot.slane %v6315_v30, 5  ;;  %v6341_v30 = vrot.slane %v6339_v12, 5 }
 0x35c   : > { %v6359_v3 = vrot.slane %v6357_v20, 4 }
 0x35d   : > { %8910 = vmatpush3.bf16.msra.mxu1 %v9542_v25  ;;  %v6320_v25 = vshrl.u32 %v6232_v0, 16  ;;  %v6241_v0 = vld [vmem:[#allocation2 + $0x60] sm:$0xf]  ;;  %v6318_v59 = vsel %vm10238_vm5, %v6313_v6, %v6317_v57 }
 0x35e   : > { %8927 = vmatprep.subr.bf16.mxu1 %v9544_v9  ;;  %v6392_v62 = vshrl.u32 %v6241_v0, 16 }
 0x35f   : > { %v6322_v21 = vrot.slane %v6320_v25, 4  ;;  %v6363_v25 = vshll.u32 %v11937_v52, 16 }
 0x360   : > { %8912 = vmatmul.mubr.bf16.vlgmr.msra.gmra.mrb[20].mxu1 %v9543_v8  ;;  %v6333_v8 = vshrl.u32 %v11904_v15, 16 }
 0x361   : > { %8915 = vmatprep.mubr.bf16.mxu1 %v9545_v44  ;;  %8928 = vmatpush3.bf16.msra.mxu1 %v9544_v9  ;;  %v6329_v9 = vshll.u32 %v11904_v15, 16  ;;  %v6293_v44 = vrot.slane %v6291_v51, 5 }
 0x362   : > { %8929 = vmatprep.subr.bf16.mxu1 %v9546_v42  ;;  %v6335_v23 = vrot.slane %v6333_v8, 4  ;;  %v7982_v8 = vcombine.low %v6308_v40, %v6318_v59 }
 0x363   : > { %v6294_v43 = vsel %vm10238_vm5, %v6289_v54, %v6293_v44  ;;  %v11923_v56 = vrot.slane %v6329_v9, 5  ;;  %v6395_v9 = vshll.u32 %v6241_v0, 16 }
 0x364   : > { %v7981_v36 = vcombine.low %v6284_v1, %v6294_v43  ;;  %v9560_v43 = vld [vmem:[#allocation3 + $0x210] sm:$0xff]   ;;  %v6425_v1 = vshll.u32 %v11957_v5, 16 }
 0x365   : > { %8930 = vmatpush3.bf16.msra.mxu1 %v9546_v42  ;;  %v6235_v42 = vld [vmem:[#allocation2 + $0x48] sm:$0xf]  ;;  %v6336_v19 = vor.u32 %v6335_v23, %v11923_v56 }
 0x366   : > { %8931 = vmatprep.subr.bf16.mxu1 %v9548_v61  ;;  %v6344_v7 = vshrl.u32 %v6235_v42, 16 }
 0x368   : > { %8916 = vmatmul.mubr.bf16.gmra.mrb[24].mxu1 %v9547_v24  ;;  %v9555_v24 = vld [vmem:[#allocation2 + $0x6c] sm:$0xff]   ;;  %v6346_v49 = vrot.slane %v6344_v7, 4 }
 0x369   : > { %8919 = vmatprep.mubr.bf16.mxu1 %v9549_v10  ;;  %8932 = vmatpush3.bf16.msra.mxu1 %v9548_v61  ;;  %v6353_v61 = vshll.u32 %v11906_v46, 16  ;;  %v6347_v10 = vshll.u32 %v6235_v42, 16  ;;  %v6337_v42 = vrot.slane %v6336_v19, 4 }
 0x36a   : > { %8933 = vmatprep.subr.bf16.mxu1 %v9550_v11 }
 0x36b   : > { %v6349_v2 = vrot.slane %v6347_v10, 5  ;;  %v6365_v10 = vrot.slane %v6363_v25, 5  ;;  %v6342_v23 = vsel %vm10238_vm5, %v6337_v42, %v6341_v30 }
 0x36d   : > { %8934 = vmatpush3.bf16.msra.mxu1 %v9550_v11  ;;  %v7980_v11 = vcombine.low %v6260_v41, %v6270_v39  ;;  %v9559_v39 = vld [vmem:[#allocation3 + $0x208] sm:$0xff]   ;;  %v6350_v54 = vor.u32 %v6349_v2, %v6346_v49  ;;  %v11955_v41 = vrot.slane %v6401_v31, 5  ;;  %v6387_v2 = vshll.u32 %v11953_v26, 16 }
 0x36e   : > { %8935 = vmatprep.subr.bf16.mxu1 %v9552_v13  ;;  %v6427_v31 = vrot.slane %v6425_v1, 5 }
 0x36f   : > { %v6351_v7 = vrot.slane %v6350_v54, 4  ;;  %v6408_v57 = vor.u32 %v6407_v60, %v11955_v41  ;;  %v9562_v54 = vld [vmem:[#allocation3 + $0x220] sm:$0xff]  }
 0x370   : > { %8920 = vmatmul.mubr.bf16.gmra.mrb[28].mxu1 %v9551_v17  ;;  %v6238_v17 = vld [vmem:[#allocation2 + $0x54] sm:$0xf] }
 0x371   : > { %8923 = vmatprep.mubr.bf16.mxu1 %v9553_v50  ;;  %8936 = vmatpush3.bf16.msra.mxu1 %v9552_v13  ;;  %v11925_v13 = vrot.slane %v6353_v61, 5  ;;  %v6377_v50 = vshll.u32 %v11927_v28, 16  ;;  %v6368_v33 = vshrl.u32 %v6238_v17, 16  ;;  %v6409_v40 = vrot.slane %v6408_v57, 4  ;;  %v9565_v57 = vld [vmem:[#allocation3 + $0x238] sm:$0xff]  }
 0x372   : > { %8937 = vmatprep.subr.bf16.mxu1 %v9554_v63 }
 0x373   : > { %v6360_v51 = vor.u32 %v6359_v3, %v11925_v13  ;;  %v11951_v44 = vrot.slane %v6377_v50, 5  ;;  %v11962_v3 = vld [vmem:[#allocation2 + $0x68] sm:$0x1]  ;;  %v6356_v50 = vsel %vm10238_vm5, %v6351_v7, %v11925_v13 }
 0x375   : > { %8938 = vmatpush3.bf16.msra.mxu1 %v9554_v63  ;;  %v6326_v63 = vor.u32 %v6325_v29, %v6322_v21  ;;  %v6361_v20 = vrot.slane %v6360_v51, 4  ;;  %v6394_v21 = vrot.slane %v6392_v62, 4  ;;  %v6397_v29 = vrot.slane %v6395_v9, 5  ;;  %v11977_v62 = vld [vmem:[#allocation2 + $0x74] sm:$0x1] }
 0x376   : > { %8939 = vmatprep.subr.bf16.mxu1 %v9556_v18  ;;  %v6384_v6 = vor.u32 %v6383_v32, %v11951_v44  ;;  %v6683_v32 = vrot.slane %v11878_v58, 5  ;;  %v6435_v60 = vshll.u32 %v11977_v62, 16 }
 0x377   : > { %v6327_v61 = vrot.slane %v6326_v63, 4  ;;  %v6398_v0 = vor.u32 %v6397_v29, %v6394_v21  ;;  %v6649_v21 = vld [vmem:[#allocation2 + $0x18] sm:$0xe]  ;;  %v6686_v29 = vrot.slane %v11888_v4, 5 }
 0x378   : > { %8924 = vmatmul.mubr.bf16.gmra.mrb[32].mxu1 %v9555_v24  ;;  %v6370_v24 = vrot.slane %v6368_v33, 4  ;;  %v6385_v51 = vrot.slane %v6384_v6, 4  ;;  %v6389_v33 = vrot.slane %v6387_v2, 5  ;;  %v6685_v7 = vrot.slane %v6683_v32, 4 }
 0x379   : > { %8940 = vmatpush3.bf16.msra.mxu1 %v9556_v18  ;;  %8943 = vmatprep.mubr.bf16.mxu1 %v7980_v11  ;;  %v6371_v18 = vshll.u32 %v6238_v17, 16  ;;  %v6399_v25 = vrot.slane %v6398_v0, 4  ;;  %v6690_v6 = vrot.slane %v11882_v37, 5  ;;  %v6650_v37 = vld [vmem:[#allocation2 + $0x24] sm:$0xe]  ;;  %v6704_v0 = vrot.slane %v11904_v15, 5 }
 0x37a   : > { %8941 = vmatprep.subr.bf16.mxu1 %v9557_v14  ;;  %v6390_v9 = vsel %vm10238_vm5, %v6385_v51, %v6389_v33  ;;  %v6687_v1 = vsel %vm9996_vm2, %v6685_v7, %v6686_v29  ;;  %v6711_v51 = vrot.slane %v11906_v46, 5  ;;  %v6707_v15 = vrot.slane %v11932_v38, 5 }
 0x37b   : > { %v6373_v11 = vrot.slane %v6371_v18, 5  ;;  %v6692_v2 = vrot.slane %v6690_v6, 4 }
 0x37c   : > { %v6713_v33 = vrot.slane %v6711_v51, 4 }
 0x37d   : > { %8942 = vmatpush3.bf16.msra.mxu1 %v9557_v14  ;;  %v6244_v14 = vld [vmem:[#allocation2 + $0x6c] sm:$0xf]  ;;  %v6374_v49 = vor.u32 %v6373_v11, %v6370_v24  ;;  %v6404_v24 = vsel %vm10238_vm5, %v6399_v25, %v11955_v41  ;;  %v9563_v11 = vld [vmem:[#allocation3 + $0x228] sm:$0xff]   ;;  %v7996_v41 = vrot.slane %v6649_v21, 9  ;;  %v6718_v25 = vrot.slane %v11927_v28, 5 }
 0x37e   : > { %8959 = vmatprep.subr.bf16.mxu1 %v9558_v35  ;;  %v6416_v17 = vshrl.u32 %v6244_v14, 16  ;;  %v6419_v63 = vshll.u32 %v6244_v14, 16  ;;  %v6721_v28 = vrot.slane %v11953_v26, 5 }
 0x37f   : > { %v6375_v12 = vrot.slane %v6374_v49, 4  ;;  %v6684_v4 = vsel %vm9996_vm2, %v7996_v41, %v6683_v32 }
 0x380   : > { %8944 = vmatmul.mubr.bf16.vlgmr.msra.gmra.mrb[20].mxu1 %v7981_v36  ;;  %v6332_v36 = vsel %vm10238_vm5, %v6327_v61, %v11923_v56  ;;  %v6411_v56 = vshll.u32 %v11962_v3, 16  ;;  %v6418_v18 = vrot.slane %v6416_v17, 4  ;;  %v8004_v49 = vcombine.low %v6684_v4, %v6687_v1  ;;  %v8024_v1 = vld [vmem:[%s9880_s26 + $0x24] sm:$0xf]  ;;  %v8021_v4 = vld [vmem:[%s9880_s26 + $0x18] sm:$0xf] }
 0x381   : > { %8947 = vmatprep.mubr.bf16.mxu1 %v7982_v8  ;;  %8960 = vmatpush3.bf16.msra.mxu1 %v9558_v35  ;;  %v6366_v35 = vsel %vm10238_vm5, %v6361_v20, %v6365_v10  ;;  %v7983_v19 = vcombine.low %v6332_v36, %v6342_v23  ;;  %v6432_v8 = vor.u32 %v6431_v34, %v6427_v31  ;;  %v6437_v10 = vrot.slane %v6435_v60, 5 }
 0x382   : > { %8961 = vmatprep.subr.bf16.mxu1 %v9559_v39  ;;  %v7984_v59 = vcombine.low %v6356_v50, %v6366_v35  ;;  %v6413_v13 = vrot.slane %v6411_v56, 5  ;;  %v6380_v61 = vsel %vm10238_vm5, %v6375_v12, %v11951_v44  ;;  %v9564_v44 = vld [vmem:[#allocation3 + $0x230] sm:$0xff]   ;;  %v6699_v17 = vrot.slane %v6697_v55, 4  ;;  %v6652_v12 = vld [vmem:[#allocation2 + $0x3c] sm:$0xe] }
 0x383   : > { %v7985_v30 = vcombine.low %v6380_v61, %v6390_v9  ;;  %v7997_v50 = vrot.slane %v6650_v37, 9  ;;  %v7998_v56 = vrot.slane %v6651_v16, 9  ;;  %v7999_v46 = vrot.slane %v6652_v12, 9  ;;  %v8031_v16 = vld [vmem:[%s9880_s26 + $0x40] sm:$0xf] }
 0x384   : > { %v6414_v42 = vsel %vm10238_vm5, %v6409_v40, %v6413_v13  ;;  %v6706_v40 = vrot.slane %v6704_v0, 4  ;;  %v6720_v61 = vrot.slane %v6718_v25, 4  ;;  %v6998_v48 = vshll.u32 %v8021_v4, 16 }
 0x385   : > { %8962 = vmatpush3.bf16.msra.mxu1 %v9559_v39  ;;  %v6421_v39 = vrot.slane %v6419_v63, 5  ;;  %v7986_v14 = vcombine.low %v6404_v24, %v6414_v42  ;;  %v6693_v63 = vrot.slane %v11898_v45, 5  ;;  %v6691_v45 = vsel %vm9996_vm2, %v7997_v50, %v6690_v6 }
 0x386   : > { %8963 = vmatprep.subr.bf16.mxu1 %v9560_v43  ;;  %v6705_v42 = vsel %vm9996_vm2, %v7999_v46, %v6704_v0  ;;  %v6728_v24 = vrot.slane %v11962_v3, 5  ;;  %v8028_v0 = vld [vmem:[%s9880_s26 + $0x34] sm:$0xf]  ;;  %v7000_v46 = vrot.slane %v6998_v48, 5 }
 0x387   : > { %v6422_v20 = vor.u32 %v6421_v39, %v6418_v18  ;;  %v6653_v18 = vld [vmem:[#allocation2 + $0x48] sm:$0xe]  ;;  %v6714_v39 = vrot.slane %v11937_v52, 5 }
 0x388   : > { %8948 = vmatmul.mubr.bf16.gmra.mrb[24].mxu1 %v7983_v19  ;;  %v6700_v19 = vrot.slane %v11910_v22, 5  ;;  %v6698_v22 = vsel %vm9996_vm2, %v7998_v56, %v6697_v55  ;;  %v8000_v13 = vrot.slane %v6653_v18, 9  ;;  %v8025_v55 = vld [vmem:[%s9880_s26 + $0x28] sm:$0xf]  ;;  %v8036_v18 = vld [vmem:[%s9880_s26 + $0x54] sm:$0xf] }
 0x389   : > { %8951 = vmatprep.mubr.bf16.mxu1 %v7984_v59  ;;  %8964 = vmatpush3.bf16.msra.mxu1 %v9560_v43  ;;  %v6433_v43 = vrot.slane %v6432_v8, 4  ;;  %v6423_v58 = vrot.slane %v6422_v20, 4  ;;  %v6715_v9 = vsel %vm9996_vm2, %v6713_v33, %v6714_v39  ;;  %v6725_v8 = vrot.slane %v11934_v53, 5  ;;  %v6654_v20 = vld [vmem:[#allocation2 + $0x54] sm:$0xe] }
 0x38a   : > { %8965 = vmatprep.subr.bf16.mxu1 %v9561_v47  ;;  %v6701_v59 = vsel %vm9996_vm2, %v6699_v17, %v6700_v19  ;;  %v6712_v38 = vsel %vm9996_vm2, %v8000_v13, %v6711_v51  ;;  %v6722_v53 = vsel %vm9996_vm2, %v6720_v61, %v6721_v28  ;;  %v6995_v19 = vshrl.u32 %v8021_v4, 16  ;;  %v8032_v61 = vld [vmem:[%s9880_s26 + $0x44] sm:$0x1] }
 0x38b   : > { %v6438_v23 = vsel %vm10238_vm5, %v6433_v43, %v6437_v10  ;;  %v6428_v36 = vsel %vm10238_vm5, %v6423_v58, %v6427_v31  ;;  %v8006_v34 = vcombine.low %v6698_v22, %v6701_v59  ;;  %v8008_v52 = vcombine.low %v6712_v38, %v6715_v9  ;;  %v8023_v9 = vld [vmem:[%s9880_s26 + $0x20] sm:$0x1] }
 0x38c   : > { %v7987_v35 = vcombine.low %v6428_v36, %v6438_v23  ;;  %v6727_v60 = vrot.slane %v6725_v8, 4  ;;  %v7019_v36 = vshrl.u32 %v8024_v1, 16  ;;  %v7076_v22 = vshll.u32 %v8031_v16, 16 }
 0x38d   : > { %8966 = vmatpush3.bf16.msra.mxu1 %v9561_v47  ;;  %v6694_v47 = vsel %vm9996_vm2, %v6692_v2, %v6693_v63  ;;  %v8030_v2 = vld [vmem:[%s9880_s26 + $0x3c] sm:$0xf]  ;;  %v7032_v63 = vshrl.u32 %v8025_v55, 16  ;;  %v7052_v33 = vshll.u32 %v8028_v0, 16  ;;  %v6997_v39 = vrot.slane %v6995_v19, 4 }
 0x38e   : > { %8967 = vmatprep.subr.bf16.mxu1 %v9562_v54  ;;  %v8005_v31 = vcombine.low %v6691_v45, %v6694_v47  ;;  %v6729_v7 = vsel %vm9996_vm2, %v6727_v60, %v6728_v24  ;;  %v7021_v37 = vrot.slane %v7019_v36, 4  ;;  %v7067_v56 = vshrl.u32 %v8030_v2, 16 }
 0x38f   : > { %v7070_v59 = vshll.u32 %v8030_v2, 16  ;;  %v7034_v12 = vrot.slane %v7032_v63, 4  ;;  %v7115_v60 = vshrl.u32 %v8036_v18, 16  ;;  %v7118_v28 = vshll.u32 %v8036_v18, 16 }
 0x390   : > { %8952 = vmatmul.mubr.bf16.gmra.mrb[28].mxu1 %v7985_v30  ;;  %v6655_v30 = vld [vmem:[#allocation2 + $0x60] sm:$0xe] }
 0x391   : > { %8955 = vmatprep.mubr.bf16.mxu1 %v7986_v14  ;;  %8968 = vmatpush3.bf16.msra.mxu1 %v9562_v54  ;;  %v6708_v54 = vsel %vm9996_vm2, %v6706_v40, %v6707_v15  ;;  %v6732_v14 = vrot.slane %v11957_v5, 5  ;;  %v8002_v43 = vrot.slane %v6655_v30, 9  ;;  %v6656_v5 = vld [vmem:[#allocation2 + $0x6c] sm:$0xe]  ;;  %v7056_v15 = vshrl.u32 %v8028_v0, 16 }
 0x392   : > { %8969 = vmatprep.subr.bf16.mxu1 %v9563_v11  ;;  %v8007_v32 = vcombine.low %v6705_v42, %v6708_v54  ;;  %v8003_v29 = vrot.slane %v6656_v5, 9  ;;  %v7072_v42 = vrot.slane %v7070_v59, 5 }
 0x393   : > { %v6726_v26 = vsel %vm9996_vm2, %v8002_v43, %v6725_v8  ;;  %v6734_v21 = vrot.slane %v6732_v14, 4  ;;  %v7069_v8 = vrot.slane %v7067_v56, 4 }
 0x394   : > { %v8010_v3 = vcombine.low %v6726_v26, %v6729_v7  ;;  %v6733_v6 = vsel %vm9996_vm2, %v8003_v29, %v6732_v14  ;;  %v7001_v14 = vor.u32 %v7000_v46, %v6997_v39  ;;  %v7120_v29 = vrot.slane %v7118_v28, 5 }
 0x395   : > { %8970 = vmatpush3.bf16.msra.mxu1 %v9563_v11  ;;  %v8001_v11 = vrot.slane %v6654_v20, 9  ;;  %v7073_v26 = vor.u32 %v7072_v42, %v7069_v8 }
 0x396   : > { %8971 = vmatprep.subr.bf16.mxu1 %v9564_v44  ;;  %v7002_v36 = vrot.slane %v7001_v14, 4 }
 0x397   : > { %v6719_v58 = vsel %vm9996_vm2, %v8001_v11, %v6718_v25  ;;  %v8026_v25 = vld [vmem:[%s9880_s26 + $0x2c] sm:$0x1]  ;;  %v7054_v11 = vrot.slane %v7052_v33, 5  ;;  %v7074_v2 = vrot.slane %v7073_v26, 4  ;;  %v8038_v33 = vld [vmem:[%s9880_s26 + $0x5c] sm:$0x1] }
 0x398   : > { %8956 = vmatmul.mubr.bf16.gmra.mrb[32].mxu1 %v7987_v35  ;;  %v8009_v10 = vcombine.low %v6719_v58, %v6722_v53  ;;  %v7022_v35 = vshll.u32 %v8024_v1, 16  ;;  %v7038_v24 = vshll.u32 %v8026_v25, 16  ;;  %v7058_v53 = vrot.slane %v7056_v15, 4 }
 0x399   : > { %8972 = vmatpush3.bf16.msra.mxu1 %v9564_v44  ;;  %8975 = vmatprep.mubr.bf16.mxu1 %v8004_v49  ;;  %v6735_v44 = vrot.slane %v11977_v62, 5  ;;  %v7028_v49 = vshll.u32 %v8025_v55, 16  ;;  %v8027_v62 = vld [vmem:[%s9880_s26 + $0x30] sm:$0xf]  ;;  %v7014_v58 = vshll.u32 %v8023_v9, 16 }
 0x39a   : > { %8973 = vmatprep.subr.bf16.mxu1 %v9565_v57  ;;  %v7024_v17 = vrot.slane %v7022_v35, 5  ;;  %v7043_v51 = vshrl.u32 %v8027_v62, 16  ;;  %v7046_v45 = vshll.u32 %v8027_v62, 16  ;;  %v8033_v55 = vld [vmem:[%s9880_s26 + $0x48] sm:$0xf] }
 0x39b   : > { %v6736_v23 = vsel %vm9996_vm2, %v6734_v21, %v6735_v44  ;;  %v7086_v21 = vshll.u32 %v8032_v61, 16  ;;  %v7117_v44 = vrot.slane %v7115_v60, 4  ;;  %v7091_v19 = vshrl.u32 %v8033_v55, 16  ;;  %v8035_v61 = vld [vmem:[%s9880_s26 + $0x50] sm:$0x1] }
 0x39c   : > { %v8011_v41 = vcombine.low %v6733_v6, %v6736_v23  ;;  %v7025_v40 = vor.u32 %v7024_v17, %v7021_v37  ;;  %v7048_v38 = vrot.slane %v7046_v45, 5  ;;  %v7040_v6 = vrot.slane %v7038_v24, 5 }
 0x39d   : > { %8974 = vmatpush3.bf16.msra.mxu1 %v9565_v57  ;;  %v8022_v57 = vld [vmem:[%s9880_s26 + $0x1c] sm:$0xf]  ;;  %v7088_v37 = vrot.slane %v7086_v21, 5  ;;  %v7121_v63 = vor.u32 %v7120_v29, %v7117_v44  ;;  %v7094_v48 = vshll.u32 %v8033_v55, 16  ;;  %v7093_v39 = vrot.slane %v7091_v19, 4 }
 0x39e   : > { %v7004_v50 = vshll.u32 %v8022_v57, 16  ;;  %v7008_v47 = vshrl.u32 %v8022_v57, 16  ;;  %v7026_v30 = vrot.slane %v7025_v40, 4  ;;  %v7016_v57 = vrot.slane %v7014_v58, 5  ;;  %v8039_v44 = vld [vmem:[%s9880_s26 + $0x60] sm:$0xf] }
 0x39f   : > { %v7122_v18 = vrot.slane %v7121_v63, 4  ;;  %v7096_v46 = vrot.slane %v7094_v48, 5  ;;  %v8043_v55 = vld [vmem:[%s9880_s26 + $0x70] sm:$0xf] }
 0x3a0   : > { %8976 = vmatmul.mubr.bf16.vlgmr.msra.gmra.mrb[20].mxu1 %v8005_v31  ;;  %v7030_v31 = vrot.slane %v7028_v49, 5  ;;  %v12051_v54 = vrot.slane %v7004_v50, 5  ;;  %v7010_v13 = vrot.slane %v7008_v47, 4  ;;  %v8037_v49 = vld [vmem:[%s9880_s26 + $0x58] sm:$0xf]  ;;  %v7172_v19 = vshll.u32 %v8043_v55, 16 }
 0x3a1   : > { %8979 = vmatprep.mubr.bf16.mxu1 %v8006_v34  ;;  %v7080_v34 = vshrl.u32 %v8031_v16, 16  ;;  %v8034_v16 = vld [vmem:[%s9880_s26 + $0x4c] sm:$0xf]  ;;  %v7124_v56 = vshll.u32 %v8037_v49, 16  ;;  %v7097_v58 = vor.u32 %v7096_v46, %v7093_v39  ;;  %v7176_v48 = vshrl.u32 %v8043_v55, 16 }
 0x3a2   : > { %v7035_v43 = vor.u32 %v7034_v12, %v7030_v31  ;;  %v7011_v7 = vor.u32 %v7010_v13, %v12051_v54  ;;  %v7031_v23 = vsel %vm10238_vm5, %v7026_v30, %v7030_v31  ;;  %v7007_v59 = vsel %vm10238_vm5, %v7002_v36, %v12051_v54  ;;  %v12081_v54 = vld [vmem:[%s12237_s4] ss:$0 sm:$0xff] }
 0x3a3   : > { %v7082_v20 = vrot.slane %v7080_v34, 4  ;;  %v7204_v50 = vunpack.c.l.bf16 %v7031_v23  ;;  %v7128_v31 = vshrl.u32 %v8037_v49, 16  ;;  %v7100_v40 = vshll.u32 %v8034_v16, 16  ;;  %v8040_v49 = vld [vmem:[%s9880_s26 + $0x64] sm:$0xf] }
 0x3a4   : > { %v7036_v35 = vrot.slane %v7035_v43, 4  ;;  %v7012_v4 = vrot.slane %v7011_v7, 4  ;;  %v7104_v12 = vshrl.u32 %v8034_v16, 16  ;;  %v7202_v25 = vunpack.c.l.bf16 %v7007_v59 }
 0x3a5   : > { %v7126_v8 = vrot.slane %v7124_v56, 5  ;;  %v12093_v24 = vrot.slane %v7100_v40, 5  ;;  %v7152_v56 = vshrl.u32 %v8040_v49, 16 }
 0x3a6   : > { %v7017_v45 = vsel %vm10238_vm5, %v7012_v4, %v7016_v57 }
 0x3a7   : > { %v7203_v42 = vunpack.c.l.bf16 %v7017_v45  ;;  %v7127_v7 = vsel %vm10238_vm5, %v7122_v18, %v7126_v8 }
 0x3a8   : > { %8980 = vmatmul.mubr.bf16.gmra.mrb[24].mxu1 %v8007_v32  ;;  %v7045_v32 = vrot.slane %v7043_v51, 4  ;;  %v7041_v51 = vsel %vm10238_vm5, %v7036_v35, %v7040_v6  ;;  %v12111_v4 = vunpack.c.l.bf16 %v7127_v7 }
 0x3a9   : > { %8983 = vmatprep.mubr.bf16.mxu1 %v8008_v52  ;;  %v7078_v52 = vrot.slane %v7076_v22, 5  ;;  %v7205_v13 = vunpack.c.l.bf16 %v7041_v51 }
 0x3ab   : > { %v7083_v5 = vor.u32 %v7082_v20, %v7078_v52  ;;  %v7079_v22 = vsel %vm10238_vm5, %v7074_v2, %v7078_v52  ;;  %v7134_v52 = vshll.u32 %v8038_v33, 16  ;;  %v8042_v20 = vld [vmem:[%s9880_s26 + $0x6c] sm:$0xf] }
 0x3ac   : > { %v7163_v21 = vshrl.u32 %v8042_v20, 16 }
 0x3ad   : > { %v7084_v17 = vrot.slane %v7083_v5, 4  ;;  %v7166_v5 = vshll.u32 %v8042_v20, 16 }
 0x3af   : > { %v7089_v15 = vsel %vm10238_vm5, %v7084_v17, %v7088_v37  ;;  %v7139_v37 = vshrl.u32 %v8039_v44, 16  ;;  %v7142_v17 = vshll.u32 %v8039_v44, 16 }
 0x3b0   : > { %8984 = vmatmul.mubr.bf16.gmra.mrb[28].mxu1 %v8009_v10  ;;  %v8029_v10 = vld [vmem:[%s9880_s26 + $0x38] sm:$0x1]  ;;  %v12091_v30 = vunpack.c.l.bf16 %v7089_v15 }
 0x3b1   : > { %8987 = vmatprep.mubr.bf16.mxu1 %v8010_v3  ;;  %v7049_v3 = vor.u32 %v7048_v38, %v7045_v32  ;;  %v7062_v1 = vshll.u32 %v8029_v10, 16  ;;  %v12085_v32 = vunpack.c.l.bf16 %v7079_v22  ;;  %v7130_v38 = vrot.slane %v7128_v31, 4 }
 0x3b2   : > { %v7165_v31 = vrot.slane %v7163_v21, 4  ;;  %v7168_v22 = vrot.slane %v7166_v5, 5  ;;  %v7141_v33 = vrot.slane %v7139_v37, 4  ;;  %v7144_v15 = vrot.slane %v7142_v17, 5 }
 0x3b3   : > { %v7050_v62 = vrot.slane %v7049_v3, 4  ;;  %v7064_v0 = vrot.slane %v7062_v1, 5  ;;  %v7110_v3 = vshll.u32 %v8035_v61, 16  ;;  %v12107_v1 = vrot.slane %v7134_v52, 5  ;;  %v8044_v52 = vld [vmem:[%s9880_s26 + $0x74] sm:$0x1] }
 0x3b4   : > { %v7154_v61 = vrot.slane %v7152_v56, 4  ;;  %v7182_v21 = vshll.u32 %v8044_v52, 16 }
 0x3b5   : > { %v7055_v34 = vsel %vm10238_vm5, %v7050_v62, %v7054_v11  ;;  %v7112_v45 = vrot.slane %v7110_v3, 5 }
 0x3b6   : > { %v12089_v28 = vunpack.c.l.bf16 %v7055_v34 }
 0x3b8   : > { %8988 = vmatmul.mubr.bf16.gmra.mrb[32].mxu1 %v8011_v41  ;;  %v7059_v41 = vor.u32 %v7058_v53, %v7054_v11  ;;  %v7106_v11 = vrot.slane %v7104_v12, 4 }
 0x3ba   : > { %v7060_v47 = vrot.slane %v7059_v41, 4  ;;  %v7131_v41 = vor.u32 %v7130_v38, %v7126_v8  ;;  %v7107_v57 = vor.u32 %v7106_v11, %v12093_v24 }
 0x3bc   : > { %v7065_v9 = vsel %vm10238_vm5, %v7060_v47, %v7064_v0  ;;  %v7098_v47 = vrot.slane %v7097_v58, 4  ;;  %v7148_v0 = vshll.u32 %v8040_v49, 16  ;;  %v7132_v12 = vrot.slane %v7131_v41, 4 }
 0x3bd   : > { %v12100_v43 = vunpack.c.l.bf16 %v7065_v9  ;;  %v7108_v46 = vrot.slane %v7107_v57, 4 }
 0x3be   : > { %v7150_v38 = vrot.slane %v7148_v0, 5  ;;  %v7103_v11 = vsel %vm10238_vm5, %v7098_v47, %v12093_v24  ;;  %v7137_v58 = vsel %vm10238_vm5, %v7132_v12, %v12107_v1 }
 0x3bf   : > { %v7113_v5 = vsel %vm10238_vm5, %v7108_v46, %v7112_v45 }
 0x3c0   : > { %v7155_v44 = vor.u32 %v7154_v61, %v7150_v38  ;;  %v7211_v49 = vunpack.c.l.bf16 %v7113_v5 }
 0x473   : > { %v8977_v60 = vpop.f32.mrb[20].mxu1 }
 0x474   : > { %v6956_v53 = vadd.f32 %v8977_v60, %v12081_v54  ;;  %v6868_v14 = vpop.f32.mrb[21].mxu1 }
 0x475   : > { %v6954_v10 = vadd.f32 %v12081_v54, %v6868_v14  ;;  %v8978_v26 = vpop.f32.mrb[22].mxu1  ;;  %v8041_v14 = vld [vmem:[%s9880_s26 + $0x68] sm:$0x1]  ;;  %s8072_s26 = sshll.u32 %s9700_s21, 4 }
 0x476   : > { %v7220_v29 = vadd.f32 %v7204_v50, %v6956_v53  ;;  %v6957_v23 = vadd.f32 %v8978_v26, %v12081_v54  ;;  %v6871_v6 = vpop.f32.mrb[23].mxu1  ;;  %v7169_v53 = vor.u32 %v7168_v22, %v7165_v31  ;;  %s7280_s14 = sadd.s32 %s8072_s26, %s8048_s15 }
 0x477   : > { %v7218_v36 = vadd.f32 %v7202_v25, %v6954_v10  ;;  %v6955_v35 = vadd.f32 %v12081_v54, %v6871_v6  ;;  %v7174_v25 = vrot.slane %v7172_v19, 5  ;;  %v7145_v10 = vor.u32 %v7144_v15, %v7141_v33  ;;  %s8049_s21 = sshll.u32 %s7280_s14, 7 }
 0x478   : > { %v7236_v2 = vmax.f32 %v7220_v29, 0.0  ;;  %v7221_v62 = vadd.f32 %v7205_v13, %v6957_v23  ;;  %v7178_v13 = vrot.slane %v7176_v48, 4  ;;  %v7158_v29 = vshll.u32 %v8041_v14, 16  ;;  %s12172_s27 = scalar_lea.hbm %s12238_s5, %s8049_s21 }
 0x479   : > { %v7234_v63 = vmax.f32 %v7218_v36, 0.0  ;;  %v7219_v16 = vadd.f32 %v7203_v42, %v6955_v35  ;;  %v7210_v6 = vunpack.c.l.bf16 %v7103_v11  ;;  %v7170_v41 = vrot.slane %v7169_v53, 4 }
 0x47a   : > { %7252 = vst [vmem:[%s12116_s3 + $0x10] sm:$0xff] %v7236_v2  ;;  %v7237_v50 = vmax.f32 %v7221_v62, 0.0  ;;  %v7179_v3 = vor.u32 %v7178_v13, %v7174_v25  ;;  %v7146_v36 = vrot.slane %v7145_v10, 4  ;;  %v7184_v62 = vrot.slane %v7182_v21, 5 }
 0x47b   : > { %7250 = vst [vmem:[%s12116_s3] sm:$0xff] %v7234_v63  ;;  %v7235_v59 = vmax.f32 %v7219_v16, 0.0  ;;  %v8981_v51 = vpop.f32.mrb[24].mxu1  ;;  %v7156_v16 = vrot.slane %v7155_v44, 4  ;;  %v7160_v19 = vrot.slane %v7158_v29, 5  ;;  %v7175_v47 = vsel %vm10238_vm5, %v7170_v41, %v7174_v25 }
 0x47c   : > { %7253 = vst [vmem:[%s12116_s3 + $0x18] sm:$0xff] %v7237_v50  ;;  %v6960_v34 = vadd.f32 %v8981_v51, %v12081_v54  ;;  %v6884_v40 = vpop.f32.mrb[25].mxu1  ;;  %v7180_v2 = vrot.slane %v7179_v3, 4  ;;  %v7216_v22 = vunpack.c.l.bf16 %v7175_v47 }
 0x47d   : > { %7251 = vst [vmem:[%s12116_s3 + $0x8] sm:$0xff] %v7235_v59  ;;  %v6958_v18 = vadd.f32 %v12081_v54, %v6884_v40  ;;  %v8982_v39 = vpop.f32.mrb[26].mxu1  ;;  %v7151_v59 = vsel %vm10238_vm5, %v7146_v36, %v7150_v38 }
 0x47e   : > { %v7224_v9 = vadd.f32 %v12085_v32, %v6960_v34  ;;  %v6961_v8 = vadd.f32 %v8982_v39, %v12081_v54  ;;  %v6887_v42 = vpop.f32.mrb[27].mxu1  ;;  %v7185_v45 = vsel %vm10238_vm5, %v7180_v2, %v7184_v62  ;;  %v7161_v34 = vsel %vm10238_vm5, %v7156_v16, %v7160_v19 }
 0x47f   : > { %v7222_v20 = vadd.f32 %v12089_v28, %v6958_v18  ;;  %v6959_v60 = vadd.f32 %v12081_v54, %v6887_v42  ;;  %v7214_v33 = vunpack.c.l.bf16 %v7151_v59  ;;  %v7217_v39 = vunpack.c.l.bf16 %v7185_v45 }
 0x480   : > { %v7240_v7 = vmax.f32 %v7224_v9, 0.0  ;;  %v7225_v32 = vadd.f32 %v12091_v30, %v6961_v8  ;;  %v7215_v13 = vunpack.c.l.bf16 %v7161_v34 }
 0x481   : > { %v7238_v26 = vmax.f32 %v7222_v20, 0.0  ;;  %v7223_v28 = vadd.f32 %v12100_v43, %v6959_v60  ;;  %v7213_v43 = vunpack.c.l.bf16 %v7137_v58 }
 0x482   : > { %7256 = vst [vmem:[%s12116_s3 + $0x30] sm:$0xff] %v7240_v7  ;;  %v7241_v24 = vmax.f32 %v7225_v32, 0.0 }
 0x483   : > { %7254 = vst [vmem:[%s12116_s3 + $0x20] sm:$0xff] %v7238_v26  ;;  %v7239_v30 = vmax.f32 %v7223_v28, 0.0  ;;  %v8985_v23 = vpop.f32.mrb[28].mxu1 }
 0x484   : > { %7257 = vst [vmem:[%s12116_s3 + $0x38] sm:$0xff] %v7241_v24  ;;  %v6964_v1 = vadd.f32 %v8985_v23, %v12081_v54  ;;  %v6900_v55 = vpop.f32.mrb[29].mxu1 }
 0x485   : > { %7255 = vst [vmem:[%s12116_s3 + $0x28] sm:$0xff] %v7239_v30  ;;  %v6962_v35 = vadd.f32 %v12081_v54, %v6900_v55  ;;  %v8986_v57 = vpop.f32.mrb[30].mxu1 }
 0x486   : > { %v7228_v37 = vadd.f32 %v12111_v4, %v6964_v1  ;;  %v6965_v17 = vadd.f32 %v8986_v57, %v12081_v54  ;;  %v6903_v63 = vpop.f32.mrb[31].mxu1 }
 0x487   : > { %v7226_v48 = vadd.f32 %v7210_v6, %v6962_v35  ;;  %v6963_v50 = vadd.f32 %v12081_v54, %v6903_v63 }
 0x488   : > { %v7244_v0 = vmax.f32 %v7228_v37, 0.0  ;;  %v7229_v56 = vadd.f32 %v7213_v43, %v6965_v17 }
 0x489   : > { %v7242_v4 = vmax.f32 %v7226_v48, 0.0  ;;  %v7227_v51 = vadd.f32 %v7211_v49, %v6963_v50 }
 0x48a   : > { %7260 = vst [vmem:[%s12116_s3 + $0x50] sm:$0xff] %v7244_v0  ;;  %v7245_v31 = vmax.f32 %v7229_v56, 0.0 }
 0x48b   : > { %7258 = vst [vmem:[%s12116_s3 + $0x40] sm:$0xff] %v7242_v4  ;;  %v7243_v40 = vmax.f32 %v7227_v51, 0.0  ;;  %v8989_v12 = vpop.f32.mrb[32].mxu1 }
 0x48c   : > { %7261 = vst [vmem:[%s12116_s3 + $0x58] sm:$0xff] %v7245_v31  ;;  %v6968_v15 = vadd.f32 %v8989_v12, %v12081_v54  ;;  %v6916_v18 = vpop.f32.mrb[33].mxu1 }
 0x48d   : > { %7259 = vst [vmem:[%s12116_s3 + $0x48] sm:$0xff] %v7243_v40  ;;  %v6966_v46 = vadd.f32 %v12081_v54, %v6916_v18  ;;  %v8990_v25 = vpop.f32.mrb[34].mxu1 }
 0x48e   : > { %v7232_v27 = vadd.f32 %v7216_v22, %v6968_v15  ;;  %v6969_v9 = vadd.f32 %v8990_v25, %v12081_v54  ;;  %v6919_v8 = vpop.f32.mrb[35].mxu1 }
 0x48f   : > { %v7230_v42 = vadd.f32 %v7214_v33, %v6966_v46  ;;  %v6967_v38 = vadd.f32 %v12081_v54, %v6919_v8 }
 0x490   : > { %v7248_v52 = vmax.f32 %v7232_v27, 0.0  ;;  %v7233_v61 = vadd.f32 %v7217_v39, %v6969_v9 }
 0x491   : > { %v7246_v20 = vmax.f32 %v7230_v42, 0.0  ;;  %v7231_v60 = vadd.f32 %v7215_v13, %v6967_v38 }
 0x492   : > { %7264 = vst [vmem:[%s12116_s3 + $0x70] sm:$0xff] %v7248_v52  ;;  %v7249_v11 = vmax.f32 %v7233_v61, 0.0 }
 0x493   : > { %7262 = vst [vmem:[%s12116_s3 + $0x60] sm:$0xff] %v7246_v20  ;;  %v7247_v54 = vmax.f32 %v7231_v60, 0.0 }
 0x494   : > { %7265 = vst [vmem:[%s12116_s3 + $0x78] sm:$0xff] %v7249_v11 }
 0x495   : > { %7263 = vst [vmem:[%s12116_s3 + $0x68] sm:$0xff] %v7247_v54 }
 0x496   : > { %9631 = shalt.err (!%p9628_p9)
}
 0x497   : > { %s9632_s9 = scalar_lea.hbm %s12172_s27, 2048  ;;  %s9636_s15 = scalar_lea.hbm %s12238_s5, 8192 }
 0x498   : > { %p9633_p11 = scmp.ne.s32.totalorder %s12172_s27, %s9632_s9  ;;  %p9637_p4 = scmp.lt.u32.totalorder %s12172_s27, %s12238_s5 }
 0x499   : > { %p9638_p3 = scmp.lt.u32.totalorder %s9636_s15, %s9632_s9  ;;  %p9640_p10 = scmp.lt.u32.totalorder %s9632_s9, %s12172_s27 }
 0x49a   : > { %p9634_p13 = pnand %p9633_p11, %p12338_p12 }
 0x49b   : > { %p9639_p8 = por %p9638_p3, %p9637_p4 }
 0x49c   : > { %p9635_p1 = pneg %p9634_p13 }
 0x49d   : > { %p9641_p0 = por %p9640_p10, %p9639_p8 }
 0x49f   : > { %p9642_p2 = pnand %p9641_p0, %p9635_p1 }
 0x4a1   : > { %9645 = shalt.err (!%p9642_p2)
}
 0x4a2   : > { %s9723_s11 = smov 128   ;;  %s9724_s17 = smov 8  }
 0x4a3   : > { %9285 = dma.vmem_to_hbm [thread:$0]  (%p12338_p12), %s12174_s22, 2048, %s12172_s27, %s12181_s12, %s9723_s11, %s9723_s11, %s9724_s17  }
 0x4a4 PF: > { %p9297_p5 = scmp.ge.s32.totalorder %s9716_s25, 2  ;;  %s7298_s6 = sand.u32 1, %s9688_s18  }
 0x4a5   : > { %p12339_p6 = scmp.ne.s32.totalorder %s12253_s8, 0  ;;  %s7299_s16 = scalar_lea.sflag [#allocation5], %s7298_s6 }
 0x4a7   : > { %p9292_p7 = pnand %p9297_p5, %p12339_p6 }
 0x4a9   : > { %9683 = dma.done.wait (!%p9292_p7), %s7299_s16, 2048  }
 0x4aa   : > { %9685 = vsyncadd (!%p9292_p7), %s7299_s16, 4294965248  ;;  %s19_s25 = sadd.s32 1, %s9716_s25   ;;  %s12340_s18 = smov %s9692_s19 }
 0x4ab   : > { %p16_p9 = scmp.ge.s32.totalorder %s19_s25, 6   ;;  %s12341_s19 = smov %s9696_s20 }
 0x4ac   : > { %s12342_s20 = smov %s9834_s13  ;;  %s12343_s21 = smov %s9708_s23 }
 0x4ad   : > { %s12344_s22 = smov %s9712_s24  ;;  %s12345_s23 = smov %s12348_s28 }
 0x4ae   : > { %s12346_s24 = smov %s12352_s29  ;;  %18 = sbr.rel (!%p16_p9) target bundleno = 8 (0x8), region = 100 }
 0x4b5   :  { %7304 = vsyncpa [#allocation4], 1 }
 0x4b6   :  { %7306 = vsyncpa [#allocation4 + $0x1], 1 }
 0x4b7   :  { %7307 = vsyncpa [#allocation5], 1 }
 0x4b8   :  { %7309 = vsyncpa [#allocation5 + $0x1], 1 }

</bundles_post_ra>
